<compile_context>
chip_gen: v7x
topology: tpu7x:2x2x1
jax: 0.10.0
libtpu: 0.0.40
codegen_flags: <defaults>
</compile_context>

<pallas_src>
import functools
import math

import jax
import jax.numpy as jnp
from jax.experimental import pallas as pl
from jax.experimental.pallas import tpu as pltpu


# --------------------------------------------------------------------------
# Fused Pallas kernel:
#   (patches @ W)  [+ BatchNorm(batch stats)]  + LeakyReLU
#   [+ fused final 1-channel conv head + Sigmoid]
# --------------------------------------------------------------------------
def _conv_act_kernel(*refs, use_bn, fuse_head):
    if fuse_head:
        p_ref, w_ref, g_ref, b_ref, w4_ref, sel_ref, o_ref = refs
    elif use_bn:
        p_ref, w_ref, g_ref, b_ref, o_ref = refs
    else:
        p_ref, w_ref, o_ref = refs

    # Full-K single-block matmul on the MXU: bf16 operands, f32 accumulation.
    y = jnp.dot(p_ref[...], w_ref[...], preferred_element_type=jnp.float32)

    if use_bn:
        # nn.BatchNorm2d training-mode forward: biased batch statistics over
        # (N, H, W) == the rows of the (M, C) matrix, eps = 1e-5.
        # Single-pass stats; gamma * rsqrt folded into one per-channel scale.
        inv_m = 1.0 / y.shape[0]
        mean = jnp.sum(y, axis=0, keepdims=True) * inv_m
        ex2 = jnp.sum(y * y, axis=0, keepdims=True) * inv_m
        var = jnp.maximum(ex2 - mean * mean, 0.0)
        scale = g_ref[...] * jax.lax.rsqrt(var + 1e-5)
        y = y * scale + (b_ref[...] - mean * scale)

    y = jnp.maximum(y, 0.2 * y)                          # LeakyReLU(0.2)

    if fuse_head:
        # Final Conv2d(4*ndf, 1, 4, 2, 1) on the 3x3 map (-> 1x1) + Sigmoid,
        # fused here so the layer-3 activation never leaves VMEM:
        #   logit[n] = sum_{r in rows of image n} sum_c y[r, c] * w4_rows[r, c]
        z = jnp.sum(y * w4_ref[...], axis=1, keepdims=True)          # (M, 1)
        logits = jnp.dot(sel_ref[...], z,
                         preferred_element_type=jnp.float32)         # (N, 1)
        e = jnp.exp(-jnp.abs(logits))                                 # stable sigmoid
        o_ref[...] = jnp.where(logits >= 0.0, 1.0 / (1.0 + e), e / (1.0 + e))
    else:
        o_ref[...] = y.astype(o_ref.dtype)


def conv_block_pallas(patches, wmat, gamma=None, beta=None,
                      w4rows=None, sel=None, out_dtype=jnp.bfloat16):
    """y = LeakyReLU(BN(patches @ wmat)); optionally the fused sigmoid head."""
    M, K = patches.shape
    K2, C = wmat.shape
    assert K == K2
    use_bn = gamma is not None
    fuse_head = w4rows is not None

    args = [patches, wmat]
    if use_bn:
        args += [gamma.reshape(1, C).astype(jnp.float32),
                 beta.reshape(1, C).astype(jnp.float32)]
    if fuse_head:
        assert use_bn and sel is not None and w4rows.shape == (M, C)
        args += [w4rows.astype(jnp.float32), sel.astype(jnp.float32)]
        out_shape = jax.ShapeDtypeStruct((sel.shape[0], 1), jnp.float32)
    else:
        out_shape = jax.ShapeDtypeStruct((M, C), out_dtype)

    in_bytes = sum(int(a.size) * a.dtype.itemsize for a in args)
    out_bytes = math.prod(out_shape.shape) * jnp.dtype(out_shape.dtype).itemsize
    flops = 2 * M * K * C
    transcendentals = 0
    if fuse_head:
        flops += 3 * M * C + 2 * sel.shape[0] * M
        transcendentals = sel.shape[0]

    kernel = functools.partial(_conv_act_kernel,
                               use_bn=use_bn, fuse_head=fuse_head)
    vmem_spec = pl.BlockSpec(memory_space=pltpu.MemorySpace.VMEM)
    return pl.pallas_call(
        kernel,
        out_shape=out_shape,
        in_specs=[vmem_spec] * len(args),
        out_specs=vmem_spec,
        compiler_params=pltpu.CompilerParams(
            # Sized from actual operand bytes (with headroom); stays valid on
            # v7x's 64 MiB VMEM as well as v5e/v6e's 128 MiB.
            vmem_limit_bytes=int(min(max(2 * (in_bytes + out_bytes), 4 << 20),
                                     64 << 20))),
        cost_estimate=pl.CostEstimate(flops=flops,
                                      transcendentals=transcendentals,
                                      bytes_accessed=in_bytes + out_bytes),
    )(*args)


# --------------------------------------------------------------------------
# Conv2d(k=4, s=2, p=1) im2col glue (plain JAX, pixel-unshuffle based)
# --------------------------------------------------------------------------
def _space_to_depth_pad(x):
    """Zero-pad by 1 (+1 extra on the high side if odd) + 2x2 pixel-unshuffle.

    Turns the stride-2 4x4 conv into a stride-1 2x2 conv over 4*C channels, so
    the im2col needs only 4 unit-stride tap slices instead of 16 strided ones.
    """
    N, H, W, C = x.shape
    ho, wo = H // 2, W // 2
    xp = jnp.pad(x, ((0, 0), (1, 1 + H % 2), (1, 1 + W % 2), (0, 0)))
    hp2, wp2 = xp.shape[1] // 2, xp.shape[2] // 2
    s = xp.reshape(N, hp2, 2, wp2, 2, C)
    s = jnp.transpose(s, (0, 1, 3, 2, 4, 5)).reshape(N, hp2, wp2, 4 * C)
    return s, (N, ho, wo)


def _conv_patches(x_nhwc, dtype=jnp.bfloat16):
    """im2col for Conv2d(kernel=4, stride=2, padding=1), NHWC input.

    Returns (N*Ho*Wo, 16*C) patches with columns ordered (a, b, py, px, ci),
    where ky = 2a+py, kx = 2b+px (matching _to_matmul_weight).
    """
    s, (n, ho, wo) = _space_to_depth_pad(x_nhwc.astype(dtype))
    taps = [s[:, a:a + ho, b:b + wo, :] for a in range(2) for b in range(2)]
    p = jnp.concatenate(taps, axis=-1)                     # (N, Ho, Wo, 16*C)
    return p.reshape(n * ho * wo, p.shape[-1]), (n, ho, wo)


def _to_matmul_weight(w, dtype=jnp.bfloat16):
    """PyTorch Conv2d weight (Cout, Cin, 4, 4) -> (16*Cin, Cout).

    Row order (a, b, py, px, ci) with ky = 2a+py, kx = 2b+px, matching the
    patch column order produced by _conv_patches.
    """
    cout, cin = w.shape[0], w.shape[1]
    wt = jnp.transpose(w, (2, 3, 1, 0))                    # (ky, kx, ci, co)
    wt = wt.reshape(2, 2, 2, 2, cin, cout)                 # (a, py, b, px, ci, co)
    wt = jnp.transpose(wt, (0, 2, 1, 3, 4, 5))             # (a, b, py, px, ci, co)
    return wt.reshape(16 * cin, cout).astype(dtype)


def _head_weight_rows(w4, n):
    """Final Conv2d(4*ndf, 1, 4, 2, 1) on a 3x3 map -> 1x1 output: with p=1
    only taps (ky, kx) in [1, 4) touch valid input, so spatial row (dy, dx)
    uses w4[0, :, dy+1, dx+1].  Tiled over the n images to align with the
    (n, oy, ox) ordering of the layer-3 activation rows."""
    rows = jnp.transpose(w4[0, :, 1:4, 1:4], (1, 2, 0)).reshape(9, -1)   # (9, C3)
    return jnp.tile(rows, (n, 1)).astype(jnp.float32)                    # (9n, C3)


def _head_row_selector(n):
    """sel[i, r] = 1 iff activation row r belongs to image i (9 rows/image)."""
    return jnp.repeat(jnp.eye(n, dtype=jnp.float32), 9, axis=1)          # (n, 9n)


# --------------------------------------------------------------------------
# Discriminator forward
# --------------------------------------------------------------------------
def discriminator_forward(x_nchw, params):
    x = jnp.transpose(x_nchw, (0, 2, 3, 1))                # NCHW -> NHWC

    # Layer 1: Conv(nc, ndf) + LeakyReLU(0.2)   (no BN)
    p, (n, ho, wo) = _conv_patches(x)
    h = conv_block_pallas(p, _to_matmul_weight(params["w1"]))
    h = h.reshape(n, ho, wo, -1)

    # Layer 2: Conv(ndf, 2ndf) + BatchNorm2d (batch stats) + LeakyReLU(0.2)
    p, (n, ho, wo) = _conv_patches(h)
    h = conv_block_pallas(p, _to_matmul_weight(params["w2"]),
                          gamma=params["g2"], beta=params["b2"])
    h = h.reshape(n, ho, wo, -1)

    # Layer 3 + 4 fused: Conv(2ndf, 4ndf) + BN + LeakyReLU
    #                    + Conv(4ndf, 1) + Sigmoid, all in one kernel.
    p, (n, ho, wo) = _conv_patches(h)
    # TODO(synk): generic final-layer path for inputs whose last feature map
    # is not 3x3 (the 28x28 MNIST-DCGAN case used here always hits this path).
    assert ho == 3 and wo == 3, "fused head assumes a 3x3 -> 1x1 final conv"
    out = conv_block_pallas(p, _to_matmul_weight(params["w3"]),
                            gamma=params["g3"], beta=params["b3"],
                            w4rows=_head_weight_rows(params["w4"], n),
                            sel=_head_row_selector(n))
    return out.reshape(-1)                 # == output.view(-1, 1).squeeze(1)


# --------------------------------------------------------------------------
# Deterministic parameter init (DCGAN-style N(0, 0.02) conv weights)
# --------------------------------------------------------------------------
def init_params(key, nc=1, ndf=64):
    ks = jax.random.split(key, 6)

    def w(k, shape):
        return 0.02 * jax.random.normal(k, shape, jnp.float32)

    return {
        "w1": w(ks[0], (ndf, nc, 4, 4)),
        "w2": w(ks[1], (ndf * 2, ndf, 4, 4)),
        "w3": w(ks[2], (ndf * 4, ndf * 2, 4, 4)),
        "w4": w(ks[3], (1, ndf * 4, 4, 4)),
        "g2": 1.0 + 0.02 * jax.random.normal(ks[4], (ndf * 2,), jnp.float32),
        "b2": jnp.zeros((ndf * 2,), jnp.float32),
        "g3": 1.0 + 0.02 * jax.random.normal(ks[5], (ndf * 4,), jnp.float32),
        "b3": jnp.zeros((ndf * 4,), jnp.float32),
    }


if __name__ == "__main__":
    key = jax.random.PRNGKey(0)
    k_in, k_par = jax.random.split(key)

    batch, nc, ndf = 2, 1, 64
    params = init_params(k_par, nc=nc, ndf=ndf)
    x = jax.random.normal(k_in, (batch, nc, 28, 28), jnp.float32)   # NCHW

    fwd = jax.jit(discriminator_forward)
    out = jax.block_until_ready(fwd(x, params))

    # 28 -> 14 -> 7 -> 3 -> 1 spatially; final view(-1,1).squeeze(1) -> (batch,)
    assert out.shape == (batch,), out.shape
    assert bool(jnp.all(jnp.isfinite(out)))
    assert bool(jnp.all((out >= 0.0) & (out <= 1.0)))               # sigmoid range
    print("KERNEL_OK")
</pallas_src>

<mosaic_0001>
module attributes {stable_mosaic.version = 11 : i64} {
  func.func @_conv_act_kernel(%arg0: memref<392x16xbf16, #tpu.memory_space<vmem>>, %arg1: memref<16x64xbf16, #tpu.memory_space<vmem>>, %arg2: memref<392x64xbf16, #tpu.memory_space<vmem>>) attributes {dimension_semantics = [], scalar_prefetch = 0 : i64, scratch_operands = 0 : i64, tpu.core_type = #tpu.core_type<tc>} {
    %c0 = arith.constant 0 : index
    %c0_0 = arith.constant 0 : index
    %0 = vector.load %arg0[%c0, %c0_0] : memref<392x16xbf16, #tpu.memory_space<vmem>>, vector<392x16xbf16>
    %c0_1 = arith.constant 0 : index
    %c0_2 = arith.constant 0 : index
    %1 = vector.load %arg1[%c0_1, %c0_2] : memref<16x64xbf16, #tpu.memory_space<vmem>>, vector<16x64xbf16>
    %cst = arith.constant dense<0.000000e+00> : vector<392x64xf32>
    %2 = tpu.matmul %0, %1, %cst {dimension_numbers = #tpu.dot_dimension_numbers<[1], [0], [0], [1], [0, 0, 1, 1], [], []>} : vector<392x16xbf16>, vector<16x64xbf16>, vector<392x64xf32> -> vector<392x64xf32>
    %cst_3 = arith.constant 2.000000e-01 : f32
    %3 = vector.broadcast %cst_3 : f32 to vector<392x64xf32>
    %4 = arith.mulf %3, %2 : vector<392x64xf32>
    %5 = arith.maximumf %2, %4 : vector<392x64xf32>
    %6 = arith.truncf %5 : vector<392x64xf32> to vector<392x64xbf16>
    %c0_4 = arith.constant 0 : index
    %c0_5 = arith.constant 0 : index
    %7 = vector.load %arg2[%c0_4, %c0_5] : memref<392x64xbf16, #tpu.memory_space<vmem>>, vector<392x64xbf16>
    tpu.vector_store %arg2[%c0_4, %c0_5], %6 {strides = array<i32>} : memref<392x64xbf16, #tpu.memory_space<vmem>>, vector<392x64xbf16>,
    return
  }
}

module attributes {stable_mosaic.version = 11 : i64} {
  func.func @_conv_act_kernel(%arg0: memref<98x1024xbf16, #tpu.memory_space<vmem>>, %arg1: memref<1024x128xbf16, #tpu.memory_space<vmem>>, %arg2: memref<1x128xf32, #tpu.memory_space<vmem>>, %arg3: memref<1x128xf32, #tpu.memory_space<vmem>>, %arg4: memref<98x128xbf16, #tpu.memory_space<vmem>>) attributes {dimension_semantics = [], scalar_prefetch = 0 : i64, scratch_operands = 0 : i64, tpu.core_type = #tpu.core_type<tc>} {
    %c0 = arith.constant 0 : index
    %c0_0 = arith.constant 0 : index
    %0 = vector.load %arg0[%c0, %c0_0] : memref<98x1024xbf16, #tpu.memory_space<vmem>>, vector<98x1024xbf16>
    %c0_1 = arith.constant 0 : index
    %c0_2 = arith.constant 0 : index
    %1 = vector.load %arg1[%c0_1, %c0_2] : memref<1024x128xbf16, #tpu.memory_space<vmem>>, vector<1024x128xbf16>
    %cst = arith.constant dense<0.000000e+00> : vector<98x128xf32>
    %2 = tpu.matmul %0, %1, %cst {dimension_numbers = #tpu.dot_dimension_numbers<[1], [0], [0], [1], [0, 0, 1, 1], [], []>} : vector<98x1024xbf16>, vector<1024x128xbf16>, vector<98x128xf32> -> vector<98x128xf32>
    %cst_3 = arith.constant dense<0.000000e+00> : vector<128xf32>
    %3 = vector.multi_reduction <add>, %2, %cst_3 [0] : vector<98x128xf32> to vector<128xf32>
    %4 = vector.shape_cast %3 : vector<128xf32> to vector<1x128xf32>
    %cst_4 = arith.constant 0.0102040814 : f32
    %5 = vector.broadcast %cst_4 : f32 to vector<1x128xf32>
    %6 = arith.mulf %4, %5 : vector<1x128xf32>
    %7 = arith.mulf %2, %2 : vector<98x128xf32>
    %cst_5 = arith.constant dense<0.000000e+00> : vector<128xf32>
    %8 = vector.multi_reduction <add>, %7, %cst_5 [0] : vector<98x128xf32> to vector<128xf32>
    %9 = vector.shape_cast %8 : vector<128xf32> to vector<1x128xf32>
    %cst_6 = arith.constant 0.0102040814 : f32
    %10 = vector.broadcast %cst_6 : f32 to vector<1x128xf32>
    %11 = arith.mulf %9, %10 : vector<1x128xf32>
    %12 = arith.mulf %6, %6 : vector<1x128xf32>
    %13 = arith.subf %11, %12 : vector<1x128xf32>
    %cst_7 = arith.constant 0.000000e+00 : f32
    %14 = vector.broadcast %cst_7 : f32 to vector<1x128xf32>
    %15 = arith.maximumf %13, %14 : vector<1x128xf32>
    %c0_8 = arith.constant 0 : index
    %c0_9 = arith.constant 0 : index
    %16 = vector.load %arg2[%c0_8, %c0_9] : memref<1x128xf32, #tpu.memory_space<vmem>>, vector<1x128xf32>
    %cst_10 = arith.constant 9.99999974E-6 : f32
    %17 = vector.broadcast %cst_10 : f32 to vector<1x128xf32>
    %18 = arith.addf %15, %17 : vector<1x128xf32>
    %19 = math.rsqrt %18 : vector<1x128xf32>
    %20 = arith.mulf %16, %19 : vector<1x128xf32>
    %21 = vector.broadcast %20 : vector<1x128xf32> to vector<98x128xf32>
    %22 = arith.mulf %2, %21 : vector<98x128xf32>
    %c0_11 = arith.constant 0 : index
    %c0_12 = arith.constant 0 : index
    %23 = vector.load %arg3[%c0_11, %c0_12] : memref<1x128xf32, #tpu.memory_space<vmem>>, vector<1x128xf32>
    %24 = arith.mulf %6, %20 : vector<1x128xf32>
    %25 = arith.subf %23, %24 : vector<1x128xf32>
    %26 = vector.broadcast %25 : vector<1x128xf32> to vector<98x128xf32>
    %27 = arith.addf %22, %26 : vector<98x128xf32>
    %cst_13 = arith.constant 2.000000e-01 : f32
    %28 = vector.broadcast %cst_13 : f32 to vector<98x128xf32>
    %29 = arith.mulf %28, %27 : vector<98x128xf32>
    %30 = arith.maximumf %27, %29 : vector<98x128xf32>
    %31 = arith.truncf %30 : vector<98x128xf32> to vector<98x128xbf16>
    %c0_14 = arith.constant 0 : index
    %c0_15 = arith.constant 0 : index
    %32 = vector.load %arg4[%c0_14, %c0_15] : memref<98x128xbf16, #tpu.memory_space<vmem>>, vector<98x128xbf16>
    tpu.vector_store %arg4[%c0_14, %c0_15], %31 {strides = array<i32>} : memref<98x128xbf16, #tpu.memory_space<vmem>>, vector<98x128xbf16>,
    return
  }
}

module attributes {stable_mosaic.version = 11 : i64} {
  func.func @_conv_act_kernel(%arg0: memref<18x2048xbf16, #tpu.memory_space<vmem>>, %arg1: memref<2048x256xbf16, #tpu.memory_space<vmem>>, %arg2: memref<1x256xf32, #tpu.memory_space<vmem>>, %arg3: memref<1x256xf32, #tpu.memory_space<vmem>>, %arg4: memref<18x256xf32, #tpu.memory_space<vmem>>, %arg5: memref<2x18xf32, #tpu.memory_space<vmem>>, %arg6: memref<2x1xf32, #tpu.memory_space<vmem>>) attributes {dimension_semantics = [], scalar_prefetch = 0 : i64, scratch_operands = 0 : i64, tpu.core_type = #tpu.core_type<tc>} {
    %c0 = arith.constant 0 : index
    %c0_0 = arith.constant 0 : index
    %0 = vector.load %arg0[%c0, %c0_0] : memref<18x2048xbf16, #tpu.memory_space<vmem>>, vector<18x2048xbf16>
    %c0_1 = arith.constant 0 : index
    %c0_2 = arith.constant 0 : index
    %1 = vector.load %arg1[%c0_1, %c0_2] : memref<2048x256xbf16, #tpu.memory_space<vmem>>, vector<2048x256xbf16>
    %cst = arith.constant dense<0.000000e+00> : vector<18x256xf32>
    %2 = tpu.matmul %0, %1, %cst {dimension_numbers = #tpu.dot_dimension_numbers<[1], [0], [0], [1], [0, 0, 1, 1], [], []>} : vector<18x2048xbf16>, vector<2048x256xbf16>, vector<18x256xf32> -> vector<18x256xf32>
    %cst_3 = arith.constant dense<0.000000e+00> : vector<256xf32>
    %3 = vector.multi_reduction <add>, %2, %cst_3 [0] : vector<18x256xf32> to vector<256xf32>
    %4 = vector.shape_cast %3 : vector<256xf32> to vector<1x256xf32>
    %cst_4 = arith.constant 0.055555556 : f32
    %5 = vector.broadcast %cst_4 : f32 to vector<1x256xf32>
    %6 = arith.mulf %4, %5 : vector<1x256xf32>
    %7 = arith.mulf %2, %2 : vector<18x256xf32>
    %cst_5 = arith.constant dense<0.000000e+00> : vector<256xf32>
    %8 = vector.multi_reduction <add>, %7, %cst_5 [0] : vector<18x256xf32> to vector<256xf32>
    %9 = vector.shape_cast %8 : vector<256xf32> to vector<1x256xf32>
    %cst_6 = arith.constant 0.055555556 : f32
    %10 = vector.broadcast %cst_6 : f32 to vector<1x256xf32>
    %11 = arith.mulf %9, %10 : vector<1x256xf32>
    %12 = arith.mulf %6, %6 : vector<1x256xf32>
    %13 = arith.subf %11, %12 : vector<1x256xf32>
    %cst_7 = arith.constant 0.000000e+00 : f32
    %14 = vector.broadcast %cst_7 : f32 to vector<1x256xf32>
    %15 = arith.maximumf %13, %14 : vector<1x256xf32>
    %c0_8 = arith.constant 0 : index
    %c0_9 = arith.constant 0 : index
    %16 = vector.load %arg2[%c0_8, %c0_9] : memref<1x256xf32, #tpu.memory_space<vmem>>, vector<1x256xf32>
    %cst_10 = arith.constant 9.99999974E-6 : f32
    %17 = vector.broadcast %cst_10 : f32 to vector<1x256xf32>
    %18 = arith.addf %15, %17 : vector<1x256xf32>
    %19 = math.rsqrt %18 : vector<1x256xf32>
    %20 = arith.mulf %16, %19 : vector<1x256xf32>
    %21 = vector.broadcast %20 : vector<1x256xf32> to vector<18x256xf32>
    %22 = arith.mulf %2, %21 : vector<18x256xf32>
    %c0_11 = arith.constant 0 : index
    %c0_12 = arith.constant 0 : index
    %23 = vector.load %arg3[%c0_11, %c0_12] : memref<1x256xf32, #tpu.memory_space<vmem>>, vector<1x256xf32>
    %24 = arith.mulf %6, %20 : vector<1x256xf32>
    %25 = arith.subf %23, %24 : vector<1x256xf32>
    %26 = vector.broadcast %25 : vector<1x256xf32> to vector<18x256xf32>
    %27 = arith.addf %22, %26 : vector<18x256xf32>
    %cst_13 = arith.constant 2.000000e-01 : f32
    %28 = vector.broadcast %cst_13 : f32 to vector<18x256xf32>
    %29 = arith.mulf %28, %27 : vector<18x256xf32>
    %30 = arith.maximumf %27, %29 : vector<18x256xf32>
    %c0_14 = arith.constant 0 : index
    %c0_15 = arith.constant 0 : index
    %31 = vector.load %arg4[%c0_14, %c0_15] : memref<18x256xf32, #tpu.memory_space<vmem>>, vector<18x256xf32>
    %32 = arith.mulf %30, %31 : vector<18x256xf32>
    %cst_16 = arith.constant dense<0.000000e+00> : vector<18xf32>
    %33 = vector.multi_reduction <add>, %32, %cst_16 [1] : vector<18x256xf32> to vector<18xf32>
    %34 = vector.shape_cast %33 : vector<18xf32> to vector<18x1xf32>
    %c0_17 = arith.constant 0 : index
    %c0_18 = arith.constant 0 : index
    %35 = vector.load %arg5[%c0_17, %c0_18] : memref<2x18xf32, #tpu.memory_space<vmem>>, vector<2x18xf32>
    %cst_19 = arith.constant dense<0.000000e+00> : vector<2x1xf32>
    %36 = tpu.matmul %35, %34, %cst_19 {dimension_numbers = #tpu.dot_dimension_numbers<[1], [0], [0], [1], [0, 0, 1, 1], [], []>} : vector<2x18xf32>, vector<18x1xf32>, vector<2x1xf32> -> vector<2x1xf32>
    %37 = math.absf %36 : vector<2x1xf32>
    %cst_20 = arith.constant 0.000000e+00 : f32
    %38 = vector.broadcast %cst_20 : f32 to vector<2x1xf32>
    %39 = arith.subf %38, %37 : vector<2x1xf32>
    %40 = math.exp %39 : vector<2x1xf32>
    %cst_21 = arith.constant 0.000000e+00 : f32
    %41 = vector.broadcast %cst_21 : f32 to vector<2x1xf32>
    %42 = arith.cmpf oge, %36, %41 : vector<2x1xf32>
    %cst_22 = arith.constant 1.000000e+00 : f32
    %43 = vector.broadcast %cst_22 : f32 to vector<2x1xf32>
    %44 = arith.addf %43, %40 : vector<2x1xf32>
    %cst_23 = arith.constant 1.000000e+00 : f32
    %45 = vector.broadcast %cst_23 : f32 to vector<2x1xf32>
    %46 = arith.divf %45, %44 : vector<2x1xf32>
    %cst_24 = arith.constant 1.000000e+00 : f32
    %47 = vector.broadcast %cst_24 : f32 to vector<2x1xf32>
    %48 = arith.addf %47, %40 : vector<2x1xf32>
    %49 = arith.divf %40, %48 : vector<2x1xf32>
    %50 = arith.select %42, %46, %49 : vector<2x1xi1>, vector<2x1xf32>
    %c0_25 = arith.constant 0 : index
    %c0_26 = arith.constant 0 : index
    %51 = vector.load %arg6[%c0_25, %c0_26] : memref<2x1xf32, #tpu.memory_space<vmem>>, vector<2x1xf32>
    tpu.vector_store %arg6[%c0_25, %c0_26], %50 {strides = array<i32>} : memref<2x1xf32, #tpu.memory_space<vmem>>, vector<2x1xf32>,
    return
  }
}

</mosaic_0001>

<bundles_post_ra>
// kernel: discriminator_forward.3
= control target key start
LH: loop header
LB: loop body
LE: loop exit
PB: predicated region body
PF: predicated region fallthrough
CT: control target
= control target key end

     0   :  { %v1156_v0 = vmov 0.0   ;;  %vm1157_vm0 = vmmov 0   ;;  %vm192_vm1 = vcmask 130048   ;;  %vm795_vm2 = vcmask 519168   ;;  %s1524_s1 = inlined_call_operand.vmem [shape: bf16[16,64], index: 1, kind: input, shape index: {}]   ;;  %s1525_s0 = inlined_call_operand.vmem [shape: bf16[392,16], index: 0, kind: input, shape index: {}]   ;;  %s1526_s2 = inlined_call_operand.vmem [shape: bf16[392,64], index: 2, kind: output, shape index: {}]  }
   0x1   :  { %1024 = vmatprep.subr.bf16.mxu0 %v1156_v0  ;;  %v1130_v1 = vld [vmem:[%s1524_s1] sm:$0xff]   ;;  %1026 = vmatprep.mubr.msk.bf16.mxu0 %vm1157_vm0, %v1156_v0  ;;  %v1132_v3 = vld [vmem:[%s1525_s0 + $0x68] sm:$0xff]   ;;  %v1134_v5 = vld [vmem:[%s1525_s0 + $0x70] sm:$0xff]  }
   0x2   :  { %v1131_v2 = vld [vmem:[%s1525_s0] sm:$0xff]   ;;  %1126 = vmatprep.subr.bf16.mxu1 %v1156_v0  ;;  %1078 = vmatprep.mubr.msk.bf16.mxu1 %vm1157_vm0, %v1156_v0  ;;  %v1133_v4 = vld [vmem:[%s1525_s0 + $0x8] sm:$0xff]   ;;  %v1135_v6 = vld [vmem:[%s1525_s0 + $0x10] sm:$0xff]  }
   0x3   :  { %1025 = vmatpush3.bf16.msra.mxu0 %v1130_v1  ;;  %1127 = vmatpush3.bf16.msra.mxu1 %v1130_v1  ;;  %v1136_v7 = vld [vmem:[%s1525_s0 + $0x78] sm:$0xff]   ;;  %v1138_v9 = vld [vmem:[%s1525_s0 + $0x80] sm:$0xff]   ;;  %v1140_v11 = vld [vmem:[%s1525_s0 + $0x88] sm:$0xff]  }
   0x4   :  { %v1137_v8 = vld [vmem:[%s1525_s0 + $0x18] sm:$0xff]   ;;  %v1139_v10 = vld [vmem:[%s1525_s0 + $0x20] sm:$0xff]   ;;  %v1141_v12 = vld [vmem:[%s1525_s0 + $0x28] sm:$0xff]  }
   0x5   :  { %v1142_v13 = vld [vmem:[%s1525_s0 + $0x90] sm:$0xff]   ;;  %v1144_v15 = vld [vmem:[%s1525_s0 + $0x98] sm:$0xff]   ;;  %v1146_v17 = vld [vmem:[%s1525_s0 + $0xa0] sm:$0xff]  }
   0x6   :  { %1027 = vmatmul.mubr.msk.bf16.vlgmr.msra.gmra.mrb[0].mxu0 %vm192_vm1, %v1131_v2  ;;  %1079 = vmatmul.mubr.msk.bf16.vlgmr.msra.gmra.mrb[0].mxu1 %vm192_vm1, %v1132_v3  ;;  %v1143_v14 = vld [vmem:[%s1525_s0 + $0x30] sm:$0xff]   ;;  %v1145_v16 = vld [vmem:[%s1525_s0 + $0x38] sm:$0xff]   ;;  %v1147_v18 = vld [vmem:[%s1525_s0 + $0x40] sm:$0xff]  }
   0x7   :  { %1030 = vmatprep.mubr.msk.bf16.mxu0 %vm1157_vm0, %v1156_v0  ;;  %1082 = vmatprep.mubr.msk.bf16.mxu1 %vm1157_vm0, %v1156_v0  ;;  %v1148_v19 = vld [vmem:[%s1525_s0 + $0xa8] sm:$0xff]   ;;  %v1150_v21 = vld [vmem:[%s1525_s0 + $0xb0] sm:$0xff]   ;;  %v1152_v23 = vld [vmem:[%s1525_s0 + $0xb8] sm:$0xff]  }
   0x8   :  { %v1149_v20 = vld [vmem:[%s1525_s0 + $0x48] sm:$0xff]   ;;  %v1151_v22 = vld [vmem:[%s1525_s0 + $0x50] sm:$0xff]   ;;  %v1153_v24 = vld [vmem:[%s1525_s0 + $0x58] sm:$0xff]  }
   0x9   :  { %v1154_v25 = vld [vmem:[%s1525_s0 + $0xc0] ss:$0 sps:$4 sm:$0xff]  }
   0xa   :  { %v1155_v26 = vld [vmem:[%s1525_s0 + $0x60] sm:$0xff]  }
   0xe   :  { %1031 = vmatmul.mubr.msk.bf16.gmra.mrb[4].mxu0 %vm192_vm1, %v1133_v4  ;;  %1083 = vmatmul.mubr.msk.bf16.gmra.mrb[4].mxu1 %vm192_vm1, %v1134_v5 }
   0xf   :  { %1034 = vmatprep.mubr.msk.bf16.mxu0 %vm1157_vm0, %v1156_v0  ;;  %1086 = vmatprep.mubr.msk.bf16.mxu1 %vm1157_vm0, %v1156_v0 }
  0x16   :  { %1035 = vmatmul.mubr.msk.bf16.gmra.mrb[8].mxu0 %vm192_vm1, %v1135_v6  ;;  %1087 = vmatmul.mubr.msk.bf16.gmra.mrb[8].mxu1 %vm192_vm1, %v1136_v7 }
  0x17   :  { %1038 = vmatprep.mubr.msk.bf16.mxu0 %vm1157_vm0, %v1156_v0  ;;  %1090 = vmatprep.mubr.msk.bf16.mxu1 %vm1157_vm0, %v1156_v0 }
  0x1e   :  { %1039 = vmatmul.mubr.msk.bf16.gmra.mrb[12].mxu0 %vm192_vm1, %v1137_v8  ;;  %1091 = vmatmul.mubr.msk.bf16.gmra.mrb[12].mxu1 %vm192_vm1, %v1138_v9 }
  0x1f   :  { %1042 = vmatprep.mubr.msk.bf16.mxu0 %vm1157_vm0, %v1156_v0  ;;  %1094 = vmatprep.mubr.msk.bf16.mxu1 %vm1157_vm0, %v1156_v0 }
  0x26   :  { %1043 = vmatmul.mubr.msk.bf16.gmra.mrb[16].mxu0 %vm192_vm1, %v1139_v10  ;;  %1095 = vmatmul.mubr.msk.bf16.gmra.mrb[16].mxu1 %vm192_vm1, %v1140_v11 }
  0x27   :  { %1046 = vmatprep.mubr.msk.bf16.mxu0 %vm1157_vm0, %v1156_v0  ;;  %1098 = vmatprep.mubr.msk.bf16.mxu1 %vm1157_vm0, %v1156_v0 }
  0x2e   :  { %1047 = vmatmul.mubr.msk.bf16.gmra.mrb[20].mxu0 %vm192_vm1, %v1141_v12  ;;  %1099 = vmatmul.mubr.msk.bf16.gmra.mrb[20].mxu1 %vm192_vm1, %v1142_v13 }
  0x2f   :  { %1050 = vmatprep.mubr.msk.bf16.mxu0 %vm1157_vm0, %v1156_v0  ;;  %1102 = vmatprep.mubr.msk.bf16.mxu1 %vm1157_vm0, %v1156_v0 }
  0x36   :  { %1051 = vmatmul.mubr.msk.bf16.gmra.mrb[24].mxu0 %vm192_vm1, %v1143_v14  ;;  %1103 = vmatmul.mubr.msk.bf16.gmra.mrb[24].mxu1 %vm192_vm1, %v1144_v15 }
  0x37   :  { %1054 = vmatprep.mubr.msk.bf16.mxu0 %vm1157_vm0, %v1156_v0  ;;  %1106 = vmatprep.mubr.msk.bf16.mxu1 %vm1157_vm0, %v1156_v0 }
  0x3e   :  { %1055 = vmatmul.mubr.msk.bf16.gmra.mrb[28].mxu0 %vm192_vm1, %v1145_v16  ;;  %1107 = vmatmul.mubr.msk.bf16.gmra.mrb[28].mxu1 %vm192_vm1, %v1146_v17 }
  0x3f   :  { %1058 = vmatprep.mubr.msk.bf16.mxu0 %vm1157_vm0, %v1156_v0  ;;  %1110 = vmatprep.mubr.msk.bf16.mxu1 %vm1157_vm0, %v1156_v0 }
  0x46   :  { %1059 = vmatmul.mubr.msk.bf16.gmra.mrb[32].mxu0 %vm192_vm1, %v1147_v18  ;;  %1111 = vmatmul.mubr.msk.bf16.gmra.mrb[32].mxu1 %vm192_vm1, %v1148_v19 }
  0x47   :  { %1062 = vmatprep.mubr.msk.bf16.mxu0 %vm1157_vm0, %v1156_v0  ;;  %1114 = vmatprep.mubr.msk.bf16.mxu1 %vm1157_vm0, %v1156_v0 }
  0x4e   :  { %1063 = vmatmul.mubr.msk.bf16.gmra.mrb[36].mxu0 %vm192_vm1, %v1149_v20  ;;  %1115 = vmatmul.mubr.msk.bf16.gmra.mrb[36].mxu1 %vm192_vm1, %v1150_v21 }
  0x4f   :  { %1066 = vmatprep.mubr.msk.bf16.mxu0 %vm1157_vm0, %v1156_v0  ;;  %1118 = vmatprep.mubr.msk.bf16.mxu1 %vm1157_vm0, %v1156_v0 }
  0x56   :  { %1067 = vmatmul.mubr.msk.bf16.gmra.mrb[40].mxu0 %vm192_vm1, %v1151_v22  ;;  %1119 = vmatmul.mubr.msk.bf16.gmra.mrb[40].mxu1 %vm192_vm1, %v1152_v23 }
  0x57   :  { %1070 = vmatprep.mubr.msk.bf16.mxu0 %vm1157_vm0, %v1156_v0  ;;  %1122 = vmatprep.mubr.msk.bf16.mxu1 %vm1157_vm0, %v1156_v0 }
  0x5e   :  { %1071 = vmatmul.mubr.msk.bf16.gmra.mrb[44].mxu0 %vm192_vm1, %v1153_v24  ;;  %1123 = vmatmul.mubr.msk.bf16.gmra.mrb[44].mxu1 %vm192_vm1, %v1154_v25 }
  0x5f   :  { %1074 = vmatprep.mubr.msk.bf16.mxu0 %vm1157_vm0, %v1156_v0 }
  0x66   :  { %1075 = vmatmul.mubr.msk.bf16.gmra.mrb[48].mxu0 %vm192_vm1, %v1155_v26 }
  0xd9   :  { %v302_v27 = vpop.f32.mrb[0].mxu0  ;;  %v406_v28 = vpop.f32.mrb[0].mxu1 }
  0xda   :  { %v500_v29 = vmul.f32 0.2, %v302_v27  ;;  %v1028_v30 = vpop.f32.mrb[1].mxu0  ;;  %v526_v31 = vmul.f32 0.2, %v406_v28  ;;  %v1080_v32 = vpop.f32.mrb[1].mxu1 }
  0xdb   :  { %v305_v33 = vpop.f32.mrb[2].mxu0  ;;  %v409_v34 = vpop.f32.mrb[2].mxu1 }
  0xdc   :  { %v549_v35 = vmax.f32 %v302_v27, %v500_v29  ;;  %v501_v36 = vmul.f32 0.2, %v305_v33  ;;  %v1029_v37 = vpop.f32.mrb[3].mxu0  ;;  %v575_v38 = vmax.f32 %v406_v28, %v526_v31  ;;  %v527_v39 = vmul.f32 0.2, %v409_v34  ;;  %v1081_v40 = vpop.f32.mrb[3].mxu1 }
  0xde   :  { %v949_v41 = vpack.c.bf16 %v549_v35, %v549_v35  ;;  %v550_v42 = vmax.f32 %v305_v33, %v501_v36  ;;  %v975_v43 = vpack.c.bf16 %v575_v38, %v575_v38  ;;  %v576_v44 = vmax.f32 %v409_v34, %v527_v39 }
  0xe0   :  { %796 = vst.msk [vmem:[%s1526_s2] sm:$0xf] %vm795_vm2, %v949_v41  ;;  %v950_v45 = vpack.c.bf16 %v550_v42, %v550_v42  ;;  %822 = vst.msk [vmem:[%s1526_s2 + $0x68] sm:$0xf] %vm795_vm2, %v975_v43  ;;  %v976_v46 = vpack.c.bf16 %v576_v44, %v576_v44 }
  0xe1   :  { %v310_v47 = vpop.f32.mrb[4].mxu0  ;;  %v414_v48 = vpop.f32.mrb[4].mxu1 }
  0xe2   :  { %797 = vst.msk [vmem:[%s1526_s2 + $0x4] sm:$0xf] %vm795_vm2, %v950_v45  ;;  %v502_v49 = vmul.f32 0.2, %v310_v47  ;;  %823 = vst.msk [vmem:[%s1526_s2 + $0x6c] sm:$0xf] %vm795_vm2, %v976_v46 }
  0xe3   :  { %v1032_v50 = vpop.f32.mrb[5].mxu0  ;;  %v528_v51 = vmul.f32 0.2, %v414_v48  ;;  %v1084_v52 = vpop.f32.mrb[5].mxu1 }
  0xe4   :  { %v313_v53 = vpop.f32.mrb[6].mxu0  ;;  %v417_v54 = vpop.f32.mrb[6].mxu1  ;;  %v551_v55 = vmax.f32 %v310_v47, %v502_v49 }
  0xe5   :  { %v503_v56 = vmul.f32 0.2, %v313_v53  ;;  %v1033_v57 = vpop.f32.mrb[7].mxu0  ;;  %v577_v58 = vmax.f32 %v414_v48, %v528_v51  ;;  %v529_v59 = vmul.f32 0.2, %v417_v54  ;;  %v1085_v60 = vpop.f32.mrb[7].mxu1 }
  0xe6   :  { %v951_v61 = vpack.c.bf16 %v551_v55, %v551_v55 }
  0xe7   :  { %v552_v62 = vmax.f32 %v313_v53, %v503_v56  ;;  %v977_v63 = vpack.c.bf16 %v577_v58, %v577_v58  ;;  %v578_v0 = vmax.f32 %v417_v54, %v529_v59 }
  0xe8   :  { %798 = vst.msk [vmem:[%s1526_s2 + $0x8] sm:$0xf] %vm795_vm2, %v951_v61 }
  0xe9   :  { %v952_v1 = vpack.c.bf16 %v552_v62, %v552_v62  ;;  %824 = vst.msk [vmem:[%s1526_s2 + $0x70] sm:$0xf] %vm795_vm2, %v977_v63  ;;  %v978_v2 = vpack.c.bf16 %v578_v0, %v578_v0  ;;  %v318_v3 = vpop.f32.mrb[8].mxu0  ;;  %v422_v4 = vpop.f32.mrb[8].mxu1 }
  0xea   :  { %v504_v5 = vmul.f32 0.2, %v318_v3  ;;  %v1036_v6 = vpop.f32.mrb[9].mxu0  ;;  %v530_v7 = vmul.f32 0.2, %v422_v4  ;;  %v1088_v8 = vpop.f32.mrb[9].mxu1 }
  0xeb   :  { %799 = vst.msk [vmem:[%s1526_s2 + $0xc] sm:$0xf] %vm795_vm2, %v952_v1  ;;  %825 = vst.msk [vmem:[%s1526_s2 + $0x74] sm:$0xf] %vm795_vm2, %v978_v2  ;;  %v321_v9 = vpop.f32.mrb[10].mxu0  ;;  %v425_v10 = vpop.f32.mrb[10].mxu1 }
  0xec   :  { %v553_v11 = vmax.f32 %v318_v3, %v504_v5  ;;  %v505_v12 = vmul.f32 0.2, %v321_v9  ;;  %v1037_v13 = vpop.f32.mrb[11].mxu0  ;;  %v579_v14 = vmax.f32 %v422_v4, %v530_v7  ;;  %v531_v15 = vmul.f32 0.2, %v425_v10  ;;  %v1089_v16 = vpop.f32.mrb[11].mxu1 }
  0xee   :  { %v953_v17 = vpack.c.bf16 %v553_v11, %v553_v11  ;;  %v554_v18 = vmax.f32 %v321_v9, %v505_v12  ;;  %v979_v19 = vpack.c.bf16 %v579_v14, %v579_v14  ;;  %v580_v20 = vmax.f32 %v425_v10, %v531_v15 }
  0xf0   :  { %800 = vst.msk [vmem:[%s1526_s2 + $0x10] sm:$0xf] %vm795_vm2, %v953_v17  ;;  %v954_v21 = vpack.c.bf16 %v554_v18, %v554_v18  ;;  %826 = vst.msk [vmem:[%s1526_s2 + $0x78] sm:$0xf] %vm795_vm2, %v979_v19  ;;  %v980_v22 = vpack.c.bf16 %v580_v20, %v580_v20 }
  0xf1   :  { %v326_v23 = vpop.f32.mrb[12].mxu0  ;;  %v430_v24 = vpop.f32.mrb[12].mxu1 }
  0xf2   :  { %801 = vst.msk [vmem:[%s1526_s2 + $0x14] sm:$0xf] %vm795_vm2, %v954_v21  ;;  %v506_v25 = vmul.f32 0.2, %v326_v23  ;;  %827 = vst.msk [vmem:[%s1526_s2 + $0x7c] sm:$0xf] %vm795_vm2, %v980_v22 }
  0xf3   :  { %v1040_v26 = vpop.f32.mrb[13].mxu0  ;;  %v532_v27 = vmul.f32 0.2, %v430_v24  ;;  %v1092_v28 = vpop.f32.mrb[13].mxu1 }
  0xf4   :  { %v329_v29 = vpop.f32.mrb[14].mxu0  ;;  %v433_v30 = vpop.f32.mrb[14].mxu1  ;;  %v555_v31 = vmax.f32 %v326_v23, %v506_v25 }
  0xf5   :  { %v507_v32 = vmul.f32 0.2, %v329_v29  ;;  %v1041_v33 = vpop.f32.mrb[15].mxu0  ;;  %v581_v34 = vmax.f32 %v430_v24, %v532_v27  ;;  %v533_v35 = vmul.f32 0.2, %v433_v30  ;;  %v1093_v36 = vpop.f32.mrb[15].mxu1 }
  0xf6   :  { %v955_v37 = vpack.c.bf16 %v555_v31, %v555_v31 }
  0xf7   :  { %v556_v38 = vmax.f32 %v329_v29, %v507_v32  ;;  %v981_v39 = vpack.c.bf16 %v581_v34, %v581_v34  ;;  %v582_v40 = vmax.f32 %v433_v30, %v533_v35 }
  0xf8   :  { %802 = vst.msk [vmem:[%s1526_s2 + $0x18] sm:$0xf] %vm795_vm2, %v955_v37 }
  0xf9   :  { %v956_v41 = vpack.c.bf16 %v556_v38, %v556_v38  ;;  %828 = vst.msk [vmem:[%s1526_s2 + $0x80] sm:$0xf] %vm795_vm2, %v981_v39  ;;  %v982_v42 = vpack.c.bf16 %v582_v40, %v582_v40  ;;  %v334_v43 = vpop.f32.mrb[16].mxu0  ;;  %v438_v44 = vpop.f32.mrb[16].mxu1 }
  0xfa   :  { %v508_v45 = vmul.f32 0.2, %v334_v43  ;;  %v1044_v46 = vpop.f32.mrb[17].mxu0  ;;  %v534_v47 = vmul.f32 0.2, %v438_v44  ;;  %v1096_v48 = vpop.f32.mrb[17].mxu1 }
  0xfb   :  { %803 = vst.msk [vmem:[%s1526_s2 + $0x1c] sm:$0xf] %vm795_vm2, %v956_v41  ;;  %829 = vst.msk [vmem:[%s1526_s2 + $0x84] sm:$0xf] %vm795_vm2, %v982_v42  ;;  %v337_v49 = vpop.f32.mrb[18].mxu0  ;;  %v441_v50 = vpop.f32.mrb[18].mxu1 }
  0xfc   :  { %v557_v51 = vmax.f32 %v334_v43, %v508_v45  ;;  %v509_v52 = vmul.f32 0.2, %v337_v49  ;;  %v1045_v53 = vpop.f32.mrb[19].mxu0  ;;  %v583_v54 = vmax.f32 %v438_v44, %v534_v47  ;;  %v535_v55 = vmul.f32 0.2, %v441_v50  ;;  %v1097_v56 = vpop.f32.mrb[19].mxu1 }
  0xfe   :  { %v957_v57 = vpack.c.bf16 %v557_v51, %v557_v51  ;;  %v558_v58 = vmax.f32 %v337_v49, %v509_v52  ;;  %v983_v59 = vpack.c.bf16 %v583_v54, %v583_v54  ;;  %v584_v60 = vmax.f32 %v441_v50, %v535_v55 }
 0x100   :  { %804 = vst.msk [vmem:[%s1526_s2 + $0x20] sm:$0xf] %vm795_vm2, %v957_v57  ;;  %v958_v61 = vpack.c.bf16 %v558_v58, %v558_v58  ;;  %830 = vst.msk [vmem:[%s1526_s2 + $0x88] sm:$0xf] %vm795_vm2, %v983_v59  ;;  %v984_v62 = vpack.c.bf16 %v584_v60, %v584_v60 }
 0x101   :  { %v342_v63 = vpop.f32.mrb[20].mxu0  ;;  %v446_v0 = vpop.f32.mrb[20].mxu1 }
 0x102   :  { %805 = vst.msk [vmem:[%s1526_s2 + $0x24] sm:$0xf] %vm795_vm2, %v958_v61  ;;  %v510_v1 = vmul.f32 0.2, %v342_v63  ;;  %831 = vst.msk [vmem:[%s1526_s2 + $0x8c] sm:$0xf] %vm795_vm2, %v984_v62 }
 0x103   :  { %v1048_v2 = vpop.f32.mrb[21].mxu0  ;;  %v536_v3 = vmul.f32 0.2, %v446_v0  ;;  %v1100_v4 = vpop.f32.mrb[21].mxu1 }
 0x104   :  { %v345_v5 = vpop.f32.mrb[22].mxu0  ;;  %v449_v6 = vpop.f32.mrb[22].mxu1  ;;  %v559_v7 = vmax.f32 %v342_v63, %v510_v1 }
 0x105   :  { %v511_v8 = vmul.f32 0.2, %v345_v5  ;;  %v1049_v9 = vpop.f32.mrb[23].mxu0  ;;  %v585_v10 = vmax.f32 %v446_v0, %v536_v3  ;;  %v537_v11 = vmul.f32 0.2, %v449_v6  ;;  %v1101_v12 = vpop.f32.mrb[23].mxu1 }
 0x106   :  { %v959_v13 = vpack.c.bf16 %v559_v7, %v559_v7 }
 0x107   :  { %v560_v14 = vmax.f32 %v345_v5, %v511_v8  ;;  %v985_v15 = vpack.c.bf16 %v585_v10, %v585_v10  ;;  %v586_v16 = vmax.f32 %v449_v6, %v537_v11 }
 0x108   :  { %806 = vst.msk [vmem:[%s1526_s2 + $0x28] sm:$0xf] %vm795_vm2, %v959_v13 }
 0x109   :  { %v960_v17 = vpack.c.bf16 %v560_v14, %v560_v14  ;;  %832 = vst.msk [vmem:[%s1526_s2 + $0x90] sm:$0xf] %vm795_vm2, %v985_v15  ;;  %v986_v18 = vpack.c.bf16 %v586_v16, %v586_v16  ;;  %v350_v19 = vpop.f32.mrb[24].mxu0  ;;  %v454_v20 = vpop.f32.mrb[24].mxu1 }
 0x10a   :  { %v512_v21 = vmul.f32 0.2, %v350_v19  ;;  %v1052_v22 = vpop.f32.mrb[25].mxu0  ;;  %v538_v23 = vmul.f32 0.2, %v454_v20  ;;  %v1104_v24 = vpop.f32.mrb[25].mxu1 }
 0x10b   :  { %807 = vst.msk [vmem:[%s1526_s2 + $0x2c] sm:$0xf] %vm795_vm2, %v960_v17  ;;  %833 = vst.msk [vmem:[%s1526_s2 + $0x94] sm:$0xf] %vm795_vm2, %v986_v18  ;;  %v353_v25 = vpop.f32.mrb[26].mxu0  ;;  %v457_v26 = vpop.f32.mrb[26].mxu1 }
 0x10c   :  { %v561_v27 = vmax.f32 %v350_v19, %v512_v21  ;;  %v513_v28 = vmul.f32 0.2, %v353_v25  ;;  %v1053_v29 = vpop.f32.mrb[27].mxu0  ;;  %v587_v30 = vmax.f32 %v454_v20, %v538_v23  ;;  %v539_v31 = vmul.f32 0.2, %v457_v26  ;;  %v1105_v32 = vpop.f32.mrb[27].mxu1 }
 0x10e   :  { %v961_v33 = vpack.c.bf16 %v561_v27, %v561_v27  ;;  %v562_v34 = vmax.f32 %v353_v25, %v513_v28  ;;  %v987_v35 = vpack.c.bf16 %v587_v30, %v587_v30  ;;  %v588_v36 = vmax.f32 %v457_v26, %v539_v31 }
 0x110   :  { %808 = vst.msk [vmem:[%s1526_s2 + $0x30] sm:$0xf] %vm795_vm2, %v961_v33  ;;  %v962_v37 = vpack.c.bf16 %v562_v34, %v562_v34  ;;  %834 = vst.msk [vmem:[%s1526_s2 + $0x98] sm:$0xf] %vm795_vm2, %v987_v35  ;;  %v988_v38 = vpack.c.bf16 %v588_v36, %v588_v36 }
 0x111   :  { %v358_v39 = vpop.f32.mrb[28].mxu0  ;;  %v462_v40 = vpop.f32.mrb[28].mxu1 }
 0x112   :  { %809 = vst.msk [vmem:[%s1526_s2 + $0x34] sm:$0xf] %vm795_vm2, %v962_v37  ;;  %v514_v41 = vmul.f32 0.2, %v358_v39  ;;  %835 = vst.msk [vmem:[%s1526_s2 + $0x9c] sm:$0xf] %vm795_vm2, %v988_v38 }
 0x113   :  { %v1056_v42 = vpop.f32.mrb[29].mxu0  ;;  %v540_v43 = vmul.f32 0.2, %v462_v40  ;;  %v1108_v44 = vpop.f32.mrb[29].mxu1 }
 0x114   :  { %v361_v45 = vpop.f32.mrb[30].mxu0  ;;  %v465_v46 = vpop.f32.mrb[30].mxu1  ;;  %v563_v47 = vmax.f32 %v358_v39, %v514_v41 }
 0x115   :  { %v515_v48 = vmul.f32 0.2, %v361_v45  ;;  %v1057_v49 = vpop.f32.mrb[31].mxu0  ;;  %v589_v50 = vmax.f32 %v462_v40, %v540_v43  ;;  %v541_v51 = vmul.f32 0.2, %v465_v46  ;;  %v1109_v52 = vpop.f32.mrb[31].mxu1 }
 0x116   :  { %v963_v53 = vpack.c.bf16 %v563_v47, %v563_v47 }
 0x117   :  { %v564_v54 = vmax.f32 %v361_v45, %v515_v48  ;;  %v989_v55 = vpack.c.bf16 %v589_v50, %v589_v50  ;;  %v590_v56 = vmax.f32 %v465_v46, %v541_v51 }
 0x118   :  { %810 = vst.msk [vmem:[%s1526_s2 + $0x38] sm:$0xf] %vm795_vm2, %v963_v53 }
 0x119   :  { %v964_v57 = vpack.c.bf16 %v564_v54, %v564_v54  ;;  %836 = vst.msk [vmem:[%s1526_s2 + $0xa0] sm:$0xf] %vm795_vm2, %v989_v55  ;;  %v990_v58 = vpack.c.bf16 %v590_v56, %v590_v56  ;;  %v366_v59 = vpop.f32.mrb[32].mxu0  ;;  %v470_v60 = vpop.f32.mrb[32].mxu1 }
 0x11a   :  { %v516_v61 = vmul.f32 0.2, %v366_v59  ;;  %v1060_v62 = vpop.f32.mrb[33].mxu0  ;;  %v542_v63 = vmul.f32 0.2, %v470_v60  ;;  %v1112_v0 = vpop.f32.mrb[33].mxu1 }
 0x11b   :  { %811 = vst.msk [vmem:[%s1526_s2 + $0x3c] sm:$0xf] %vm795_vm2, %v964_v57  ;;  %837 = vst.msk [vmem:[%s1526_s2 + $0xa4] sm:$0xf] %vm795_vm2, %v990_v58  ;;  %v369_v1 = vpop.f32.mrb[34].mxu0  ;;  %v473_v2 = vpop.f32.mrb[34].mxu1 }
 0x11c   :  { %v565_v3 = vmax.f32 %v366_v59, %v516_v61  ;;  %v517_v4 = vmul.f32 0.2, %v369_v1  ;;  %v1061_v5 = vpop.f32.mrb[35].mxu0  ;;  %v591_v6 = vmax.f32 %v470_v60, %v542_v63  ;;  %v543_v7 = vmul.f32 0.2, %v473_v2  ;;  %v1113_v8 = vpop.f32.mrb[35].mxu1 }
 0x11e   :  { %v965_v9 = vpack.c.bf16 %v565_v3, %v565_v3  ;;  %v566_v10 = vmax.f32 %v369_v1, %v517_v4  ;;  %v991_v11 = vpack.c.bf16 %v591_v6, %v591_v6  ;;  %v592_v12 = vmax.f32 %v473_v2, %v543_v7 }
 0x120   :  { %812 = vst.msk [vmem:[%s1526_s2 + $0x40] sm:$0xf] %vm795_vm2, %v965_v9  ;;  %v966_v13 = vpack.c.bf16 %v566_v10, %v566_v10  ;;  %838 = vst.msk [vmem:[%s1526_s2 + $0xa8] sm:$0xf] %vm795_vm2, %v991_v11  ;;  %v992_v14 = vpack.c.bf16 %v592_v12, %v592_v12 }
 0x121   :  { %v374_v15 = vpop.f32.mrb[36].mxu0  ;;  %v478_v16 = vpop.f32.mrb[36].mxu1 }
 0x122   :  { %813 = vst.msk [vmem:[%s1526_s2 + $0x44] sm:$0xf] %vm795_vm2, %v966_v13  ;;  %v518_v17 = vmul.f32 0.2, %v374_v15  ;;  %839 = vst.msk [vmem:[%s1526_s2 + $0xac] sm:$0xf] %vm795_vm2, %v992_v14 }
 0x123   :  { %v1064_v18 = vpop.f32.mrb[37].mxu0  ;;  %v544_v19 = vmul.f32 0.2, %v478_v16  ;;  %v1116_v20 = vpop.f32.mrb[37].mxu1 }
 0x124   :  { %v377_v21 = vpop.f32.mrb[38].mxu0  ;;  %v481_v22 = vpop.f32.mrb[38].mxu1  ;;  %v567_v23 = vmax.f32 %v374_v15, %v518_v17 }
 0x125   :  { %v519_v24 = vmul.f32 0.2, %v377_v21  ;;  %v1065_v25 = vpop.f32.mrb[39].mxu0  ;;  %v593_v26 = vmax.f32 %v478_v16, %v544_v19  ;;  %v545_v27 = vmul.f32 0.2, %v481_v22  ;;  %v1117_v28 = vpop.f32.mrb[39].mxu1 }
 0x126   :  { %v967_v29 = vpack.c.bf16 %v567_v23, %v567_v23 }
 0x127   :  { %v568_v30 = vmax.f32 %v377_v21, %v519_v24  ;;  %v993_v31 = vpack.c.bf16 %v593_v26, %v593_v26  ;;  %v594_v32 = vmax.f32 %v481_v22, %v545_v27 }
 0x128   :  { %814 = vst.msk [vmem:[%s1526_s2 + $0x48] sm:$0xf] %vm795_vm2, %v967_v29 }
 0x129   :  { %v968_v33 = vpack.c.bf16 %v568_v30, %v568_v30  ;;  %840 = vst.msk [vmem:[%s1526_s2 + $0xb0] sm:$0xf] %vm795_vm2, %v993_v31  ;;  %v994_v34 = vpack.c.bf16 %v594_v32, %v594_v32  ;;  %v382_v35 = vpop.f32.mrb[40].mxu0  ;;  %v486_v36 = vpop.f32.mrb[40].mxu1 }
 0x12a   :  { %v520_v37 = vmul.f32 0.2, %v382_v35  ;;  %v1068_v38 = vpop.f32.mrb[41].mxu0  ;;  %v546_v39 = vmul.f32 0.2, %v486_v36  ;;  %v1120_v40 = vpop.f32.mrb[41].mxu1 }
 0x12b   :  { %815 = vst.msk [vmem:[%s1526_s2 + $0x4c] sm:$0xf] %vm795_vm2, %v968_v33  ;;  %841 = vst.msk [vmem:[%s1526_s2 + $0xb4] sm:$0xf] %vm795_vm2, %v994_v34  ;;  %v385_v41 = vpop.f32.mrb[42].mxu0  ;;  %v489_v42 = vpop.f32.mrb[42].mxu1 }
 0x12c   :  { %v569_v43 = vmax.f32 %v382_v35, %v520_v37  ;;  %v521_v44 = vmul.f32 0.2, %v385_v41  ;;  %v1069_v45 = vpop.f32.mrb[43].mxu0  ;;  %v595_v46 = vmax.f32 %v486_v36, %v546_v39  ;;  %v547_v47 = vmul.f32 0.2, %v489_v42  ;;  %v1121_v48 = vpop.f32.mrb[43].mxu1 }
 0x12e   :  { %v969_v49 = vpack.c.bf16 %v569_v43, %v569_v43  ;;  %v570_v50 = vmax.f32 %v385_v41, %v521_v44  ;;  %v995_v51 = vpack.c.bf16 %v595_v46, %v595_v46  ;;  %v596_v52 = vmax.f32 %v489_v42, %v547_v47 }
 0x130   :  { %816 = vst.msk [vmem:[%s1526_s2 + $0x50] sm:$0xf] %vm795_vm2, %v969_v49  ;;  %v970_v53 = vpack.c.bf16 %v570_v50, %v570_v50  ;;  %842 = vst.msk [vmem:[%s1526_s2 + $0xb8] sm:$0xf] %vm795_vm2, %v995_v51  ;;  %v996_v54 = vpack.c.bf16 %v596_v52, %v596_v52 }
 0x131   :  { %v390_v55 = vpop.f32.mrb[44].mxu0  ;;  %v494_v56 = vpop.f32.mrb[44].mxu1 }
 0x132   :  { %817 = vst.msk [vmem:[%s1526_s2 + $0x54] sm:$0xf] %vm795_vm2, %v970_v53  ;;  %v522_v57 = vmul.f32 0.2, %v390_v55  ;;  %843 = vst.msk [vmem:[%s1526_s2 + $0xbc] sm:$0xf] %vm795_vm2, %v996_v54 }
 0x133   :  { %v1072_v58 = vpop.f32.mrb[45].mxu0  ;;  %v548_v59 = vmul.f32 0.2, %v494_v56  ;;  %v1124_v60 = vpop.f32.mrb[45].mxu1 }
 0x134   :  { %v393_v61 = vpop.f32.mrb[46].mxu0  ;;  %v497_v62 = vpop.f32.mrb[46].mxu1  ;;  %v571_v63 = vmax.f32 %v390_v55, %v522_v57 }
 0x135   :  { %v523_v0 = vmul.f32 0.2, %v393_v61  ;;  %v1073_v1 = vpop.f32.mrb[47].mxu0  ;;  %v597_v2 = vmax.f32 %v494_v56, %v548_v59  ;;  %v1125_v3 = vpop.f32.mrb[47].mxu1 }
 0x136   :  { %v971_v4 = vpack.c.bf16 %v571_v63, %v571_v63 }
 0x137   :  { %v572_v5 = vmax.f32 %v393_v61, %v523_v0  ;;  %v997_v6 = vpack.c.bf16 %v597_v2, %v597_v2 }
 0x138   :  { %818 = vst.msk [vmem:[%s1526_s2 + $0x58] sm:$0xf] %vm795_vm2, %v971_v4 }
 0x139   :  { %v972_v7 = vpack.c.bf16 %v572_v5, %v572_v5  ;;  %844 = vst.msk [vmem:[%s1526_s2 + $0xc0] sm:$0xf] %vm795_vm2, %v997_v6  ;;  %v398_v8 = vpop.f32.mrb[48].mxu0 }
 0x13a   :  { %v524_v9 = vmul.f32 0.2, %v398_v8  ;;  %v1076_v10 = vpop.f32.mrb[49].mxu0 }
 0x13b   :  { %819 = vst.msk [vmem:[%s1526_s2 + $0x5c] sm:$0xf] %vm795_vm2, %v972_v7  ;;  %v401_v11 = vpop.f32.mrb[50].mxu0 }
 0x13c   :  { %v573_v12 = vmax.f32 %v398_v8, %v524_v9  ;;  %v525_v13 = vmul.f32 0.2, %v401_v11  ;;  %v1077_v14 = vpop.f32.mrb[51].mxu0 }
 0x13e   :  { %v973_v15 = vpack.c.bf16 %v573_v12, %v573_v12  ;;  %v574_v16 = vmax.f32 %v401_v11, %v525_v13 }
 0x140   :  { %820 = vst.msk [vmem:[%s1526_s2 + $0x60] sm:$0xf] %vm795_vm2, %v973_v15  ;;  %v974_v17 = vpack.c.bf16 %v574_v16, %v574_v16 }
 0x142   :  { %821 = vst.msk [vmem:[%s1526_s2 + $0x64] sm:$0xf] %vm795_vm2, %v974_v17 }

// kernel: discriminator_forward.4
= control target key start
LH: loop header
LB: loop body
LE: loop exit
PB: predicated region body
PF: predicated region fallthrough
CT: control target
= control target key end

     0   :  { %vm1213_vm0 = vcmask 1041408   ;;  %s2398_s1 = inlined_call_operand.vmem [shape: bf16[1024,128], index: 1, kind: input, shape index: {}]   ;;  %s2399_s0 = inlined_call_operand.vmem [shape: bf16[98,1024], index: 0, kind: input, shape index: {}]   ;;  %s2400_s2 = inlined_call_operand.vmem [shape: f32[1,128], index: 2, kind: input, shape index: {}]   ;;  %s2401_s3 = inlined_call_operand.vmem [shape: f32[1,128], index: 3, kind: input, shape index: {}]   ;;  %s2402_s4 = inlined_call_operand.vmem [shape: bf16[98,128], index: 4, kind: output, shape index: {}]  }
   0x1   :  { %v1813_v0 = vld [vmem:[%s2398_s1 + $0x40] sm:$0xff]   ;;  %v1817_v4 = vld [vmem:[%s2398_s1 + $0x48] sm:$0xff]   ;;  %v1821_v8 = vld [vmem:[%s2398_s1 + $0x50] sm:$0xff]  }
   0x2   :  { %v1814_v1 = vld [vmem:[%s2398_s1 + $0xc0] sm:$0xff]   ;;  %1581 = vmatprep.subr.bf16.mxu0 %v1813_v0  ;;  %v1818_v5 = vld [vmem:[%s2398_s1 + $0xc8] sm:$0xff]   ;;  %v1822_v9 = vld [vmem:[%s2398_s1 + $0xd0] sm:$0xff]  }
   0x3   :  { %v1815_v2 = vld [vmem:[%s2398_s1] sm:$0xff]   ;;  %1639 = vmatprep.subr.bf16.mxu1 %v1814_v1  ;;  %v1819_v6 = vld [vmem:[%s2398_s1 + $0x8] sm:$0xff]   ;;  %v1823_v10 = vld [vmem:[%s2398_s1 + $0x10] sm:$0xff]  }
   0x4   :  { %v1816_v3 = vld [vmem:[%s2398_s1 + $0x80] sm:$0xff]   ;;  %1582 = vmatpush3.bf16.msra.mxu0 %v1815_v2  ;;  %v1820_v7 = vld [vmem:[%s2398_s1 + $0x88] sm:$0xff]   ;;  %v1824_v11 = vld [vmem:[%s2398_s1 + $0x90] sm:$0xff]  }
   0x5   :  { %1640 = vmatpush3.bf16.msra.mxu1 %v1816_v3  ;;  %1583 = vmatprep.subr.bf16.mxu0 %v1817_v4  ;;  %v1825_v12 = vld [vmem:[%s2398_s1 + $0x58] sm:$0xff]   ;;  %v1829_v16 = vld [vmem:[%s2398_s1 + $0x60] sm:$0xff]   ;;  %v1833_v20 = vld [vmem:[%s2398_s1 + $0x68] sm:$0xff]  }
   0x6   :  { %1641 = vmatprep.subr.bf16.mxu1 %v1818_v5  ;;  %v1826_v13 = vld [vmem:[%s2398_s1 + $0xd8] sm:$0xff]   ;;  %v1830_v17 = vld [vmem:[%s2398_s1 + $0xe0] sm:$0xff]   ;;  %v1834_v21 = vld [vmem:[%s2398_s1 + $0xe8] sm:$0xff]  }
   0x7   :  { %v1827_v14 = vld [vmem:[%s2398_s1 + $0x18] sm:$0xff]   ;;  %v1831_v18 = vld [vmem:[%s2398_s1 + $0x20] sm:$0xff]   ;;  %v1835_v22 = vld [vmem:[%s2398_s1 + $0x28] sm:$0xff]  }
   0x8   :  { %1584 = vmatpush3.bf16.msra.mxu0 %v1819_v6  ;;  %v1828_v15 = vld [vmem:[%s2398_s1 + $0x98] sm:$0xff]   ;;  %v1832_v19 = vld [vmem:[%s2398_s1 + $0xa0] sm:$0xff]   ;;  %v1836_v23 = vld [vmem:[%s2398_s1 + $0xa8] sm:$0xff]  }
   0x9   :  { %1642 = vmatpush3.bf16.msra.mxu1 %v1820_v7  ;;  %1585 = vmatprep.subr.bf16.mxu0 %v1821_v8  ;;  %v1837_v24 = vld [vmem:[%s2398_s1 + $0x70] sm:$0xff]   ;;  %v1841_v28 = vld [vmem:[%s2398_s1 + $0x78] sm:$0xff]   ;;  %v18_v32 = vld [vmem:[%s2399_s0] sm:$0xff] }
   0xa   :  { %1643 = vmatprep.subr.bf16.mxu1 %v1822_v9  ;;  %v1838_v25 = vld [vmem:[%s2398_s1 + $0xf0] sm:$0xff]   ;;  %v1842_v29 = vld [vmem:[%s2398_s1 + $0xf8] sm:$0xff]   ;;  %v22_v33 = vld [vmem:[%s2399_s0 + $0x20] sm:$0xff] }
   0xb   :  { %v1839_v26 = vld [vmem:[%s2398_s1 + $0x30] sm:$0xff]   ;;  %v1843_v30 = vld [vmem:[%s2398_s1 + $0x38] sm:$0xff]   ;;  %v19_v34 = vld [vmem:[%s2399_s0 + $0x8] sm:$0xff]  ;;  %v1400_v35 = vcombine.low %v18_v32, %v22_v33  ;;  %v1401_v36 = vcombine.high %v18_v32, %v22_v33 }
   0xc   :  { %1586 = vmatpush3.bf16.msra.mxu0 %v1823_v10  ;;  %v1840_v27 = vld [vmem:[%s2398_s1 + $0xb0] sm:$0xff]   ;;  %v1844_v31 = vld [vmem:[%s2398_s1 + $0xb8] sm:$0xff]   ;;  %v23_v37 = vld [vmem:[%s2399_s0 + $0x28] sm:$0xff] }
   0xd   :  { %1644 = vmatpush3.bf16.msra.mxu1 %v1824_v11  ;;  %1587 = vmatprep.subr.bf16.mxu0 %v1825_v12  ;;  %v1402_v38 = vcombine.low %v19_v34, %v23_v37  ;;  %v1403_v39 = vcombine.high %v19_v34, %v23_v37  ;;  %v1845_v40 = vld [vmem:[%s2398_s1 + $0x140] sm:$0xff]   ;;  %v27_v47 = vld [vmem:[%s2399_s0 + $0x48] sm:$0xff]  ;;  %v1853_v56 = vld [vmem:[%s2398_s1 + $0x150] sm:$0xff]  }
   0xe   :  { %1645 = vmatprep.subr.bf16.mxu1 %v1826_v13  ;;  %882 = vmatprep.mubr.bf16.mxu0 %v1401_v36  ;;  %v1846_v41 = vld [vmem:[%s2398_s1 + $0x100] sm:$0xff]   ;;  %v31_v48 = vld [vmem:[%s2399_s0 + $0x68] sm:$0xff]  ;;  %v1854_v63 = vld [vmem:[%s2398_s1 + $0x110] sm:$0xff]  }
   0xf   :  { %970 = vmatprep.mubr.bf16.mxu1 %v1403_v39  ;;  %v1847_v42 = vld [vmem:[%s2398_s1 + $0x1c0] sm:$0xff]   ;;  %v1411_v49 = vcombine.high %v27_v47, %v31_v48  ;;  %v1849_v50 = vld [vmem:[%s2398_s1 + $0x148] sm:$0xff]   ;;  %v1410_v53 = vcombine.low %v27_v47, %v31_v48  ;;  %v1855_v0 = vld [vmem:[%s2398_s1 + $0x1d0] sm:$0xff]  }
  0x10   :  { %1588 = vmatpush3.bf16.msra.mxu0 %v1827_v14  ;;  %v1848_v43 = vld [vmem:[%s2398_s1 + $0x180] sm:$0xff]   ;;  %v1850_v52 = vld [vmem:[%s2398_s1 + $0x108] sm:$0xff]   ;;  %v1856_v1 = vld [vmem:[%s2398_s1 + $0x190] sm:$0xff]  }
  0x11   :  { %1646 = vmatpush3.bf16.msra.mxu1 %v1828_v15  ;;  %1589 = vmatprep.subr.bf16.mxu0 %v1829_v16  ;;  %v26_v44 = vld [vmem:[%s2399_s0 + $0x40] sm:$0xff]  ;;  %v1851_v54 = vld [vmem:[%s2398_s1 + $0x1c8] sm:$0xff]   ;;  %v1857_v3 = vld [vmem:[%s2398_s1 + $0x158] sm:$0xff]  }
  0x12   :  { %1647 = vmatprep.subr.bf16.mxu1 %v1830_v17  ;;  %v30_v45 = vld [vmem:[%s2399_s0 + $0x60] sm:$0xff]  ;;  %v1852_v55 = vld [vmem:[%s2398_s1 + $0x188] sm:$0xff]   ;;  %v1858_v5 = vld [vmem:[%s2398_s1 + $0x118] sm:$0xff]  }
  0x13   :  { %v1409_v46 = vcombine.high %v26_v44, %v30_v45  ;;  %v1408_v51 = vcombine.low %v26_v44, %v30_v45  ;;  %v34_v57 = vld [vmem:[%s2399_s0 + $0x80] sm:$0xff]  ;;  %v35_v59 = vld [vmem:[%s2399_s0 + $0x88] sm:$0xff]  ;;  %v1859_v12 = vld [vmem:[%s2398_s1 + $0x1d8] sm:$0xff]  }
  0x14   :  { %1590 = vmatpush3.bf16.msra.mxu0 %v1831_v18  ;;  %v38_v58 = vld [vmem:[%s2399_s0 + $0xa0] sm:$0xff]  ;;  %v39_v60 = vld [vmem:[%s2399_s0 + $0xa8] sm:$0xff]  ;;  %v1860_v13 = vld [vmem:[%s2398_s1 + $0x198] sm:$0xff]  }
  0x15   :  { %1648 = vmatpush3.bf16.msra.mxu1 %v1832_v19  ;;  %1591 = vmatprep.subr.bf16.mxu0 %v1833_v20  ;;  %v1417_v61 = vcombine.high %v34_v57, %v38_v58  ;;  %v1419_v62 = vcombine.high %v35_v59, %v39_v60  ;;  %v1416_v2 = vcombine.low %v34_v57, %v38_v58  ;;  %v42_v6 = vld [vmem:[%s2399_s0 + $0xc0] sm:$0xff]  ;;  %v43_v8 = vld [vmem:[%s2399_s0 + $0xc8] sm:$0xff]  ;;  %v1877_v44 = vld [vmem:[%s2398_s1 + $0x178] sm:$0xff]  }
  0x16   :  { %1649 = vmatprep.subr.bf16.mxu1 %v1834_v21  ;;  %v1418_v4 = vcombine.low %v35_v59, %v39_v60  ;;  %v46_v7 = vld [vmem:[%s2399_s0 + $0xe0] sm:$0xff]  ;;  %v47_v10 = vld [vmem:[%s2399_s0 + $0xe8] sm:$0xff]  ;;  %v1878_v45 = vld [vmem:[%s2398_s1 + $0x138] sm:$0xff]  }
  0x17   :  { %v1425_v9 = vcombine.high %v42_v6, %v46_v7  ;;  %v1427_v11 = vcombine.high %v43_v8, %v47_v10  ;;  %v1861_v14 = vld [vmem:[%s2398_s1 + $0x160] sm:$0xff]   ;;  %v1424_v16 = vcombine.low %v42_v6, %v46_v7  ;;  %v1426_v20 = vcombine.low %v43_v8, %v47_v10  ;;  %v59_v32 = vld [vmem:[%s2399_s0 + $0x148] sm:$0xff]  ;;  %v1880_v48 = vld [vmem:[%s2398_s1 + $0x1b8] sm:$0xff]  }
  0x18   :  { %1592 = vmatpush3.bf16.msra.mxu0 %v1835_v22  ;;  %v1862_v15 = vld [vmem:[%s2398_s1 + $0x120] sm:$0xff]   ;;  %v51_v22 = vld [vmem:[%s2399_s0 + $0x108] sm:$0xff]  ;;  %v28_v60 = vld [vmem:[%s2399_s0 + $0x50] sm:$0xff] }
  0x19   :  { %1650 = vmatpush3.bf16.msra.mxu1 %v1836_v23  ;;  %1593 = vmatprep.subr.bf16.mxu0 %v1837_v24  ;;  %v1863_v17 = vld [vmem:[%s2398_s1 + $0x1e0] sm:$0xff]   ;;  %v55_v23 = vld [vmem:[%s2399_s0 + $0x128] sm:$0xff]  ;;  %v37_v6 = vld [vmem:[%s2399_s0 + $0x98] sm:$0xff] }
  0x1a   :  { %1651 = vmatprep.subr.bf16.mxu1 %v1838_v25  ;;  %v50_v18 = vld [vmem:[%s2399_s0 + $0x100] sm:$0xff]  ;;  %v1435_v24 = vcombine.high %v51_v22, %v55_v23  ;;  %v63_v33 = vld [vmem:[%s2399_s0 + $0x168] sm:$0xff]  ;;  %v1434_v36 = vcombine.low %v51_v22, %v55_v23  ;;  %v41_v7 = vld [vmem:[%s2399_s0 + $0xb8] sm:$0xff] }
  0x1b   :  { %v54_v19 = vld [vmem:[%s2399_s0 + $0x120] sm:$0xff]  ;;  %v1443_v39 = vcombine.high %v59_v32, %v63_v33  ;;  %v53_v22 = vld [vmem:[%s2399_s0 + $0x118] sm:$0xff] }
  0x1c   :  { %1594 = vmatpush3.bf16.msra.mxu0 %v1839_v26  ;;  %v1433_v21 = vcombine.high %v50_v18, %v54_v19  ;;  %v1864_v25 = vld [vmem:[%s2398_s1 + $0x1a0] sm:$0xff]   ;;  %v1865_v26 = vld [vmem:[%s2398_s1 + $0x168] sm:$0xff]   ;;  %v1432_v34 = vcombine.low %v50_v18, %v54_v19  ;;  %v57_v23 = vld [vmem:[%s2399_s0 + $0x138] sm:$0xff] }
  0x1d   :  { %1652 = vmatpush3.bf16.msra.mxu1 %v1840_v27  ;;  %1595 = vmatprep.subr.bf16.mxu0 %v1841_v28  ;;  %v1866_v27 = vld [vmem:[%s2398_s1 + $0x128] sm:$0xff]  }
  0x1e   :  { %1653 = vmatprep.subr.bf16.mxu1 %v1842_v29  ;;  %v1867_v28 = vld [vmem:[%s2398_s1 + $0x1e8] sm:$0xff]  }
  0x1f   :  { %v1868_v29 = vld [vmem:[%s2398_s1 + $0x1a8] sm:$0xff]  }
  0x20   :  { %1596 = vmatpush3.bf16.msra.mxu0 %v1843_v30  ;;  %v58_v30 = vld [vmem:[%s2399_s0 + $0x140] sm:$0xff] }
  0x21   :  { %1654 = vmatpush3.bf16.msra.mxu1 %v1844_v31  ;;  %1697 = vmatprep.subr.bf16.mxu0 %v1845_v40  ;;  %v62_v31 = vld [vmem:[%s2399_s0 + $0x160] sm:$0xff]  ;;  %v1871_v40 = vld [vmem:[%s2398_s1 + $0x1f0] sm:$0xff]  }
  0x22   :  { %1755 = vmatprep.subr.bf16.mxu1 %v1847_v42  ;;  %v1441_v37 = vcombine.high %v58_v30, %v62_v31  ;;  %v66_v42 = vld [vmem:[%s2399_s0 + $0x180] sm:$0x11]  ;;  %v1440_v47 = vcombine.low %v58_v30, %v62_v31  ;;  %v61_v30 = vld [vmem:[%s2399_s0 + $0x158] sm:$0xff] }
  0x23   :  { %883 = vmatmul.mubr.bf16.vlgmr.msra.gmra.mrb[0].mxu0 %v1400_v35  ;;  %v1869_v35 = vld [vmem:[%s2398_s1 + $0x170] sm:$0xff]   ;;  %v65_v31 = vld [vmem:[%s2399_s0 + $0x178] sm:$0xff] }
  0x24   :  { %971 = vmatmul.mubr.bf16.vlgmr.msra.gmra.mrb[0].mxu1 %v1402_v38  ;;  %1698 = vmatpush3.bf16.msra.mxu0 %v1846_v41  ;;  %v1870_v38 = vld [vmem:[%s2398_s1 + $0x130] sm:$0xff]  }
  0x25   :  { %1756 = vmatpush3.bf16.msra.mxu1 %v1848_v43  ;;  %890 = vmatprep.mubr.bf16.mxu0 %v1409_v46  ;;  %v1872_v41 = vld [vmem:[%s2398_s1 + $0x1b0] sm:$0xff]   ;;  %v67_v43 = vld [vmem:[%s2399_s0 + $0x188] sm:$0x11]  ;;  %v1879_v46 = vld [vmem:[%s2398_s1 + $0x1f8] sm:$0xff]  }
  0x26   :  { %978 = vmatprep.mubr.bf16.mxu1 %v1411_v49  ;;  %1699 = vmatprep.subr.bf16.mxu0 %v1849_v50  ;;  %v1442_v49 = vcombine.low %v59_v32, %v63_v33  ;;  %v1449_v50 = vcombine.high %v66_v42, %v66_v42  ;;  %v1450_v57 = vcombine.low %v67_v43, %v67_v43 }
  0x27   :  { %1757 = vmatprep.subr.bf16.mxu1 %v1851_v54  ;;  %v21_v54 = vld [vmem:[%s2399_s0 + $0x18] sm:$0xff]  ;;  %v1438_v33 = vcombine.low %v53_v22, %v57_v23 }
  0x28   :  { %1700 = vmatpush3.bf16.msra.mxu0 %v1850_v52  ;;  %v20_v52 = vld [vmem:[%s2399_s0 + $0x10] sm:$0xff] }
  0x29   :  { %1758 = vmatpush3.bf16.msra.mxu1 %v1852_v55  ;;  %1701 = vmatprep.subr.bf16.mxu0 %v1853_v56  ;;  %v25_v55 = vld [vmem:[%s2399_s0 + $0x38] sm:$0xff]  ;;  %v1448_v56 = vcombine.low %v66_v42, %v66_v42 }
  0x2a   :  { %1759 = vmatprep.subr.bf16.mxu1 %v1855_v0  ;;  %v1407_v59 = vcombine.high %v21_v54, %v25_v55 }
  0x2b   :  { %891 = vmatmul.mubr.bf16.gmra.mrb[4].mxu0 %v1408_v51  ;;  %v1451_v51 = vcombine.high %v67_v43, %v67_v43 }
  0x2c   :  { %979 = vmatmul.mubr.bf16.gmra.mrb[4].mxu1 %v1410_v53  ;;  %898 = vmatprep.mubr.bf16.mxu0 %v1417_v61  ;;  %v24_v53 = vld [vmem:[%s2399_s0 + $0x30] sm:$0xff] }
  0x2d   :  { %986 = vmatprep.mubr.bf16.mxu1 %v1419_v62  ;;  %1702 = vmatpush3.bf16.msra.mxu0 %v1854_v63  ;;  %v1405_v58 = vcombine.high %v20_v52, %v24_v53  ;;  %v32_v61 = vld [vmem:[%s2399_s0 + $0x70] sm:$0xff]  ;;  %v29_v62 = vld [vmem:[%s2399_s0 + $0x58] sm:$0xff]  ;;  %v1404_v0 = vcombine.low %v20_v52, %v24_v53 }
  0x2e   :  { %1760 = vmatpush3.bf16.msra.mxu1 %v1856_v1  ;;  %1703 = vmatprep.subr.bf16.mxu0 %v1857_v3  ;;  %v33_v63 = vld [vmem:[%s2399_s0 + $0x78] sm:$0xff]  ;;  %v1406_v1 = vcombine.low %v21_v54, %v25_v55  ;;  %v1412_v8 = vcombine.low %v28_v60, %v32_v61 }
  0x2f   :  { %1761 = vmatprep.subr.bf16.mxu1 %v1859_v12  ;;  %v1415_v3 = vcombine.high %v29_v62, %v33_v63  ;;  %v44_v12 = vld [vmem:[%s2399_s0 + $0xd0] sm:$0xff] }
  0x31   :  { %1704 = vmatpush3.bf16.msra.mxu0 %v1858_v5  ;;  %v40_v5 = vld [vmem:[%s2399_s0 + $0xb0] sm:$0xff] }
  0x32   :  { %1762 = vmatpush3.bf16.msra.mxu1 %v1860_v13  ;;  %1705 = vmatprep.subr.bf16.mxu0 %v1861_v14  ;;  %v48_v13 = vld [vmem:[%s2399_s0 + $0xf0] sm:$0xff]  ;;  %v45_v14 = vld [vmem:[%s2399_s0 + $0xd8] sm:$0xff] }
  0x33   :  { %899 = vmatmul.mubr.bf16.gmra.mrb[8].mxu0 %v1416_v2  ;;  %1763 = vmatprep.subr.bf16.mxu1 %v1863_v17  ;;  %v1413_v2 = vcombine.high %v28_v60, %v32_v61  ;;  %v1422_v17 = vcombine.low %v37_v6, %v41_v7  ;;  %v1429_v18 = vcombine.high %v44_v12, %v48_v13 }
  0x34   :  { %987 = vmatmul.mubr.bf16.gmra.mrb[8].mxu1 %v1418_v4  ;;  %906 = vmatprep.mubr.bf16.mxu0 %v1425_v9  ;;  %v36_v4 = vld [vmem:[%s2399_s0 + $0x90] sm:$0xff]  ;;  %v1414_v9 = vcombine.low %v29_v62, %v33_v63 }
  0x35   :  { %994 = vmatprep.mubr.bf16.mxu1 %v1427_v11  ;;  %1706 = vmatpush3.bf16.msra.mxu0 %v1862_v15  ;;  %v1421_v10 = vcombine.high %v36_v4, %v40_v5  ;;  %v1423_v11 = vcombine.high %v37_v6, %v41_v7  ;;  %v49_v15 = vld [vmem:[%s2399_s0 + $0xf8] sm:$0xff] }
  0x36   :  { %1764 = vmatpush3.bf16.msra.mxu1 %v1864_v25  ;;  %1707 = vmatprep.subr.bf16.mxu0 %v1865_v26  ;;  %v1431_v19 = vcombine.high %v45_v14, %v49_v15  ;;  %v1430_v25 = vcombine.low %v45_v14, %v49_v15 }
  0x37   :  { %1765 = vmatprep.subr.bf16.mxu1 %v1867_v28  ;;  %v60_v28 = vld [vmem:[%s2399_s0 + $0x150] sm:$0xff] }
  0x39   :  { %1708 = vmatpush3.bf16.msra.mxu0 %v1866_v27  ;;  %v1439_v27 = vcombine.high %v53_v22, %v57_v23 }
  0x3a   :  { %1766 = vmatpush3.bf16.msra.mxu1 %v1868_v29  ;;  %1709 = vmatprep.subr.bf16.mxu0 %v1869_v35  ;;  %v64_v29 = vld [vmem:[%s2399_s0 + $0x170] sm:$0xff]  ;;  %v1447_v35 = vcombine.high %v61_v30, %v65_v31 }
  0x3b   :  { %907 = vmatmul.mubr.bf16.gmra.mrb[12].mxu0 %v1424_v16  ;;  %1767 = vmatprep.subr.bf16.mxu1 %v1871_v40  ;;  %v1420_v16 = vcombine.low %v36_v4, %v40_v5 }
  0x3c   :  { %995 = vmatmul.mubr.bf16.gmra.mrb[12].mxu1 %v1426_v20  ;;  %914 = vmatprep.mubr.bf16.mxu0 %v1433_v21  ;;  %v52_v20 = vld [vmem:[%s2399_s0 + $0x110] sm:$0xff] }
  0x3d   :  { %1002 = vmatprep.mubr.bf16.mxu1 %v1435_v24  ;;  %1710 = vmatpush3.bf16.msra.mxu0 %v1870_v38  ;;  %v56_v21 = vld [vmem:[%s2399_s0 + $0x130] sm:$0xff]  ;;  %v1428_v24 = vcombine.low %v44_v12, %v48_v13  ;;  %v1444_v38 = vcombine.low %v60_v28, %v64_v29 }
  0x3e   :  { %1768 = vmatpush3.bf16.msra.mxu1 %v1872_v41  ;;  %1711 = vmatprep.subr.bf16.mxu0 %v1877_v44  ;;  %v1437_v26 = vcombine.high %v52_v20, %v56_v21  ;;  %v1436_v32 = vcombine.low %v52_v20, %v56_v21 }
  0x3f   :  { %1769 = vmatprep.subr.bf16.mxu1 %v1879_v46 }
  0x41   :  { %1712 = vmatpush3.bf16.msra.mxu0 %v1878_v45 }
  0x42   :  { %1770 = vmatpush3.bf16.msra.mxu1 %v1880_v48 }
  0x43   :  { %915 = vmatmul.mubr.bf16.gmra.mrb[16].mxu0 %v1432_v34  ;;  %v1445_v34 = vcombine.high %v60_v28, %v64_v29 }
  0x44   :  { %1003 = vmatmul.mubr.bf16.gmra.mrb[16].mxu1 %v1434_v36  ;;  %922 = vmatprep.mubr.bf16.mxu0 %v1441_v37  ;;  %v68_v36 = vld [vmem:[%s2399_s0 + $0x190] sm:$0x11]  ;;  %v69_v37 = vld [vmem:[%s2399_s0 + $0x198] sm:$0x11] }
  0x45   :  { %1010 = vmatprep.mubr.bf16.mxu1 %v1443_v39  ;;  %v1446_v39 = vcombine.low %v61_v30, %v65_v31  ;;  %v1453_v40 = vcombine.high %v68_v36, %v68_v36  ;;  %v1455_v41 = vcombine.high %v69_v37, %v69_v37  ;;  %v1452_v42 = vcombine.low %v68_v36, %v68_v36 }
  0x46   :  { %v1454_v43 = vcombine.low %v69_v37, %v69_v37 }
  0x4b   :  { %923 = vmatmul.mubr.bf16.gmra.mrb[20].mxu0 %v1440_v47 }
  0x4c   :  { %1011 = vmatmul.mubr.bf16.gmra.mrb[20].mxu1 %v1442_v49  ;;  %930 = vmatprep.mubr.bf16.mxu0 %v1449_v50 }
  0x4d   :  { %1018 = vmatprep.mubr.bf16.mxu1 %v1451_v51 }
  0x53   :  { %931 = vmatmul.mubr.bf16.gmra.mrb[24].mxu0 %v1448_v56 }
  0x54   :  { %1019 = vmatmul.mubr.bf16.gmra.mrb[24].mxu1 %v1450_v57  ;;  %1058 = vmatprep.mubr.bf16.mxu0 %v1405_v58 }
  0x55   :  { %1146 = vmatprep.mubr.bf16.mxu1 %v1407_v59 }
  0x5b   :  { %1059 = vmatmul.mubr.bf16.vlgmr.msra.gmra.mrb[28].mxu0 %v1404_v0 }
  0x5c   :  { %1147 = vmatmul.mubr.bf16.vlgmr.msra.gmra.mrb[28].mxu1 %v1406_v1  ;;  %1066 = vmatprep.mubr.bf16.mxu0 %v1413_v2 }
  0x5d   :  { %1154 = vmatprep.mubr.bf16.mxu1 %v1415_v3 }
  0x63   :  { %1067 = vmatmul.mubr.bf16.gmra.mrb[32].mxu0 %v1412_v8 }
  0x64   :  { %1155 = vmatmul.mubr.bf16.gmra.mrb[32].mxu1 %v1414_v9  ;;  %1074 = vmatprep.mubr.bf16.mxu0 %v1421_v10 }
  0x65   :  { %1162 = vmatprep.mubr.bf16.mxu1 %v1423_v11 }
  0x6b   :  { %1075 = vmatmul.mubr.bf16.gmra.mrb[36].mxu0 %v1420_v16 }
  0x6c   :  { %1163 = vmatmul.mubr.bf16.gmra.mrb[36].mxu1 %v1422_v17  ;;  %1082 = vmatprep.mubr.bf16.mxu0 %v1429_v18 }
  0x6d   :  { %1170 = vmatprep.mubr.bf16.mxu1 %v1431_v19 }
  0x73   :  { %1083 = vmatmul.mubr.bf16.gmra.mrb[40].mxu0 %v1428_v24 }
  0x74   :  { %1171 = vmatmul.mubr.bf16.gmra.mrb[40].mxu1 %v1430_v25  ;;  %1090 = vmatprep.mubr.bf16.mxu0 %v1437_v26 }
  0x75   :  { %1178 = vmatprep.mubr.bf16.mxu1 %v1439_v27 }
  0x7b   :  { %1091 = vmatmul.mubr.bf16.gmra.mrb[44].mxu0 %v1436_v32 }
  0x7c   :  { %1179 = vmatmul.mubr.bf16.gmra.mrb[44].mxu1 %v1438_v33  ;;  %1098 = vmatprep.mubr.bf16.mxu0 %v1445_v34 }
  0x7d   :  { %1186 = vmatprep.mubr.bf16.mxu1 %v1447_v35 }
  0x83   :  { %1099 = vmatmul.mubr.bf16.gmra.mrb[48].mxu0 %v1444_v38 }
  0x84   :  { %1187 = vmatmul.mubr.bf16.gmra.mrb[48].mxu1 %v1446_v39  ;;  %1106 = vmatprep.mubr.bf16.mxu0 %v1453_v40 }
  0x85   :  { %1194 = vmatprep.mubr.bf16.mxu1 %v1455_v41 }
  0x8b   :  { %1107 = vmatmul.mubr.bf16.gmra.mrb[52].mxu0 %v1452_v42 }
  0x8c   :  { %1195 = vmatmul.mubr.bf16.gmra.mrb[52].mxu1 %v1454_v43 }
  0xf6   :  { %v1597_v44 = vpop.f32.mrb[0].mxu0 }
  0xf7   :  { %v1655_v45 = vpop.f32.mrb[0].mxu1  ;;  %v1598_v46 = vpop.f32.mrb[1].mxu0 }
  0xf8   :  { %v1599_v47 = vadd.f32 %v1598_v46, %v1597_v44  ;;  %v1656_v48 = vpop.f32.mrb[1].mxu1  ;;  %v1600_v49 = vpop.f32.mrb[2].mxu0 }
  0xf9   :  { %v1657_v50 = vadd.f32 %v1656_v48, %v1655_v45  ;;  %v1658_v51 = vpop.f32.mrb[2].mxu1  ;;  %v1601_v52 = vpop.f32.mrb[3].mxu0 }
  0xfa   :  { %v1602_v53 = vadd.f32 %v1601_v52, %v1600_v49  ;;  %v1659_v54 = vpop.f32.mrb[3].mxu1 }
  0xfb   :  { %v2260_v55 = vadd.f32 %v1657_v50, %v1599_v47  ;;  %v1660_v56 = vadd.f32 %v1659_v54, %v1658_v51 }
  0xfd   :  { %v2262_v57 = vadd.f32 %v1660_v56, %v1602_v53 }
  0xfe   :  { %v1603_v58 = vpop.f32.mrb[4].mxu0 }
  0xff   :  { %v1661_v59 = vpop.f32.mrb[4].mxu1  ;;  %v1604_v60 = vpop.f32.mrb[5].mxu0 }
 0x100   :  { %v1605_v61 = vadd.f32 %v1604_v60, %v1603_v58  ;;  %v1662_v62 = vpop.f32.mrb[5].mxu1  ;;  %v1606_v63 = vpop.f32.mrb[6].mxu0 }
 0x101   :  { %v1663_v0 = vadd.f32 %v1662_v62, %v1661_v59  ;;  %v1664_v1 = vpop.f32.mrb[6].mxu1  ;;  %v1607_v2 = vpop.f32.mrb[7].mxu0 }
 0x102   :  { %v1608_v3 = vadd.f32 %v1607_v2, %v1606_v63  ;;  %v1665_v4 = vpop.f32.mrb[7].mxu1 }
 0x103   :  { %v2264_v5 = vadd.f32 %v1663_v0, %v1605_v61  ;;  %v1666_v6 = vadd.f32 %v1665_v4, %v1664_v1 }
 0x105   :  { %v2266_v7 = vadd.f32 %v1666_v6, %v1608_v3 }
 0x106   :  { %v1609_v8 = vpop.f32.mrb[8].mxu0 }
 0x107   :  { %v1667_v9 = vpop.f32.mrb[8].mxu1  ;;  %v1610_v10 = vpop.f32.mrb[9].mxu0 }
 0x108   :  { %v1611_v11 = vadd.f32 %v1610_v10, %v1609_v8  ;;  %v1668_v12 = vpop.f32.mrb[9].mxu1  ;;  %v1612_v13 = vpop.f32.mrb[10].mxu0 }
 0x109   :  { %v1669_v14 = vadd.f32 %v1668_v12, %v1667_v9  ;;  %v1670_v15 = vpop.f32.mrb[10].mxu1  ;;  %v1613_v16 = vpop.f32.mrb[11].mxu0 }
 0x10a   :  { %v1614_v17 = vadd.f32 %v1613_v16, %v1612_v13  ;;  %v1671_v18 = vpop.f32.mrb[11].mxu1 }
 0x10b   :  { %v2268_v19 = vadd.f32 %v1669_v14, %v1611_v11  ;;  %v1672_v20 = vadd.f32 %v1671_v18, %v1670_v15 }
 0x10d   :  { %v2270_v21 = vadd.f32 %v1672_v20, %v1614_v17 }
 0x10e   :  { %v1615_v22 = vpop.f32.mrb[12].mxu0 }
 0x10f   :  { %v1673_v23 = vpop.f32.mrb[12].mxu1  ;;  %v1616_v24 = vpop.f32.mrb[13].mxu0 }
 0x110   :  { %v1617_v25 = vadd.f32 %v1616_v24, %v1615_v22  ;;  %v1674_v26 = vpop.f32.mrb[13].mxu1  ;;  %v1618_v27 = vpop.f32.mrb[14].mxu0 }
 0x111   :  { %v1675_v28 = vadd.f32 %v1674_v26, %v1673_v23  ;;  %v1676_v29 = vpop.f32.mrb[14].mxu1  ;;  %v1619_v30 = vpop.f32.mrb[15].mxu0 }
 0x112   :  { %v1620_v31 = vadd.f32 %v1619_v30, %v1618_v27  ;;  %v1677_v32 = vpop.f32.mrb[15].mxu1 }
 0x113   :  { %v2272_v33 = vadd.f32 %v1675_v28, %v1617_v25  ;;  %v1678_v34 = vadd.f32 %v1677_v32, %v1676_v29 }
 0x115   :  { %v2274_v35 = vadd.f32 %v1678_v34, %v1620_v31 }
 0x116   :  { %v1621_v36 = vpop.f32.mrb[16].mxu0 }
 0x117   :  { %v1679_v37 = vpop.f32.mrb[16].mxu1  ;;  %v1622_v38 = vpop.f32.mrb[17].mxu0 }
 0x118   :  { %v1623_v39 = vadd.f32 %v1622_v38, %v1621_v36  ;;  %v1680_v40 = vpop.f32.mrb[17].mxu1  ;;  %v1624_v41 = vpop.f32.mrb[18].mxu0 }
 0x119   :  { %v1681_v42 = vadd.f32 %v1680_v40, %v1679_v37  ;;  %v1682_v43 = vpop.f32.mrb[18].mxu1  ;;  %v1625_v44 = vpop.f32.mrb[19].mxu0 }
 0x11a   :  { %v1626_v45 = vadd.f32 %v1625_v44, %v1624_v41  ;;  %v1683_v46 = vpop.f32.mrb[19].mxu1 }
 0x11b   :  { %v2276_v47 = vadd.f32 %v1681_v42, %v1623_v39  ;;  %v1684_v48 = vadd.f32 %v1683_v46, %v1682_v43 }
 0x11d   :  { %v2278_v49 = vadd.f32 %v1684_v48, %v1626_v45 }
 0x11e   :  { %v1627_v50 = vpop.f32.mrb[20].mxu0 }
 0x11f   :  { %v1685_v51 = vpop.f32.mrb[20].mxu1  ;;  %v1628_v52 = vpop.f32.mrb[21].mxu0 }
 0x120   :  { %v1629_v53 = vadd.f32 %v1628_v52, %v1627_v50  ;;  %v1686_v54 = vpop.f32.mrb[21].mxu1  ;;  %v1630_v56 = vpop.f32.mrb[22].mxu0 }
 0x121   :  { %v1687_v58 = vadd.f32 %v1686_v54, %v1685_v51  ;;  %v1688_v59 = vpop.f32.mrb[22].mxu1  ;;  %v1631_v60 = vpop.f32.mrb[23].mxu0 }
 0x122   :  { %v1632_v61 = vadd.f32 %v1631_v60, %v1630_v56  ;;  %v1689_v62 = vpop.f32.mrb[23].mxu1 }
 0x123   :  { %v2280_v63 = vadd.f32 %v1687_v58, %v1629_v53  ;;  %v1690_v0 = vadd.f32 %v1689_v62, %v1688_v59 }
 0x125   :  { %v2282_v1 = vadd.f32 %v1690_v0, %v1632_v61 }
 0x126   :  { %v1633_v2 = vpop.f32.mrb[24].mxu0 }
 0x127   :  { %v1691_v3 = vpop.f32.mrb[24].mxu1  ;;  %v1634_v4 = vpop.f32.mrb[25].mxu0 }
 0x128   :  { %v1635_v6 = vadd.f32 %v1634_v4, %v1633_v2  ;;  %v1692_v8 = vpop.f32.mrb[25].mxu1  ;;  %v1636_v9 = vpop.f32.mrb[26].mxu0 }
 0x129   :  { %v1693_v10 = vadd.f32 %v1692_v8, %v1691_v3  ;;  %v1694_v11 = vpop.f32.mrb[26].mxu1  ;;  %v1637_v12 = vpop.f32.mrb[27].mxu0 }
 0x12a   :  { %v1695_v13 = vpop.f32.mrb[27].mxu1 }
 0x12b   :  { %v2284_v14 = vadd.f32 %v1693_v10, %v1635_v6 }
 0x12e   :  { %v1713_v15 = vpop.f32.mrb[28].mxu0 }
 0x12f   :  { %v1771_v16 = vpop.f32.mrb[28].mxu1  ;;  %v1714_v17 = vpop.f32.mrb[29].mxu0 }
 0x130   :  { %v1715_v18 = vadd.f32 %v1714_v17, %v1713_v15  ;;  %v1772_v20 = vpop.f32.mrb[29].mxu1  ;;  %v1716_v22 = vpop.f32.mrb[30].mxu0 }
 0x131   :  { %v1773_v23 = vadd.f32 %v1772_v20, %v1771_v16  ;;  %v1774_v24 = vpop.f32.mrb[30].mxu1  ;;  %v1717_v25 = vpop.f32.mrb[31].mxu0 }
 0x132   :  { %v1061_v26 = vadd.f32 %v1715_v18, %v2260_v55  ;;  %v1718_v27 = vadd.f32 %v1717_v25, %v1716_v22  ;;  %v1775_v28 = vpop.f32.mrb[31].mxu1 }
 0x133   :  { %v1776_v29 = vadd.f32 %v1775_v28, %v1774_v24 }
 0x134   :  { %v2287_v30 = vadd.f32 %v1773_v23, %v1061_v26  ;;  %v1064_v31 = vadd.f32 %v1718_v27, %v2262_v57 }
 0x136   :  { %v2290_v32 = vadd.f32 %v1776_v29, %v1064_v31  ;;  %v1719_v34 = vpop.f32.mrb[32].mxu0  ;;  %v1223_v38 = vmul.f32 %v2287_v30, %v2287_v30 }
 0x137   :  { %v1777_v36 = vpop.f32.mrb[32].mxu1  ;;  %v1720_v37 = vpop.f32.mrb[33].mxu0 }
 0x138   :  { %v1202_v39 = vadd.f32 %v2290_v32, %v2287_v30  ;;  %v1224_v55 = vmul.f32 %v2290_v32, %v2290_v32  ;;  %v1721_v40 = vadd.f32 %v1720_v37, %v1719_v34  ;;  %v1778_v41 = vpop.f32.mrb[33].mxu1  ;;  %v1722_v42 = vpop.f32.mrb[34].mxu0 }
 0x139   :  { %v1779_v43 = vadd.f32 %v1778_v41, %v1777_v36  ;;  %v1780_v44 = vpop.f32.mrb[34].mxu1  ;;  %v1723_v57 = vpop.f32.mrb[35].mxu0 }
 0x13a   :  { %v1236_v45 = vadd.f32 %v1224_v55, %v1223_v38  ;;  %v1069_v46 = vadd.f32 %v1721_v40, %v2264_v5  ;;  %v1724_v48 = vadd.f32 %v1723_v57, %v1722_v42  ;;  %v1781_v50 = vpop.f32.mrb[35].mxu1 }
 0x13b   :  { %v1782_v51 = vadd.f32 %v1781_v50, %v1780_v44 }
 0x13c   :  { %v2299_v52 = vadd.f32 %v1779_v43, %v1069_v46  ;;  %v1072_v53 = vadd.f32 %v1724_v48, %v2266_v7 }
 0x13e   :  { %v1203_v54 = vadd.f32 %v1202_v39, %v2299_v52  ;;  %v1225_v56 = vmul.f32 %v2299_v52, %v2299_v52  ;;  %v2305_v58 = vadd.f32 %v1782_v51, %v1072_v53  ;;  %v1725_v59 = vpop.f32.mrb[36].mxu0 }
 0x13f   :  { %v1783_v60 = vpop.f32.mrb[36].mxu1  ;;  %v1726_v61 = vpop.f32.mrb[37].mxu0 }
 0x140   :  { %v1237_v62 = vadd.f32 %v1236_v45, %v1225_v56  ;;  %v1204_v5 = vadd.f32 %v1203_v54, %v2305_v58  ;;  %v1226_v0 = vmul.f32 %v2305_v58, %v2305_v58  ;;  %v1727_v2 = vadd.f32 %v1726_v61, %v1725_v59  ;;  %v1784_v3 = vpop.f32.mrb[37].mxu1  ;;  %v1728_v4 = vpop.f32.mrb[38].mxu0 }
 0x141   :  { %v1785_v7 = vadd.f32 %v1784_v3, %v1783_v60  ;;  %v1786_v6 = vpop.f32.mrb[38].mxu1  ;;  %v1729_v8 = vpop.f32.mrb[39].mxu0 }
 0x142   :  { %v1238_v9 = vadd.f32 %v1237_v62, %v1226_v0  ;;  %v1077_v10 = vadd.f32 %v1727_v2, %v2268_v19  ;;  %v1730_v11 = vadd.f32 %v1729_v8, %v1728_v4  ;;  %v1787_v12 = vpop.f32.mrb[39].mxu1 }
 0x143   :  { %v1788_v13 = vadd.f32 %v1787_v12, %v1786_v6 }
 0x144   :  { %v2311_v15 = vadd.f32 %v1785_v7, %v1077_v10  ;;  %v1080_v16 = vadd.f32 %v1730_v11, %v2270_v21 }
 0x146   :  { %v1205_v17 = vadd.f32 %v1204_v5, %v2311_v15  ;;  %v1227_v18 = vmul.f32 %v2311_v15, %v2311_v15  ;;  %v2317_v20 = vadd.f32 %v1788_v13, %v1080_v16  ;;  %v1731_v22 = vpop.f32.mrb[40].mxu0 }
 0x147   :  { %v1789_v23 = vpop.f32.mrb[40].mxu1  ;;  %v1732_v24 = vpop.f32.mrb[41].mxu0 }
 0x148   :  { %v1239_v25 = vadd.f32 %v1238_v9, %v1227_v18  ;;  %v1206_v19 = vadd.f32 %v1205_v17, %v2317_v20  ;;  %v1228_v26 = vmul.f32 %v2317_v20, %v2317_v20  ;;  %v1733_v27 = vadd.f32 %v1732_v24, %v1731_v22  ;;  %v1790_v28 = vpop.f32.mrb[41].mxu1  ;;  %v1734_v29 = vpop.f32.mrb[42].mxu0 }
 0x149   :  { %v1791_v21 = vadd.f32 %v1790_v28, %v1789_v23  ;;  %v1792_v31 = vpop.f32.mrb[42].mxu1  ;;  %v1735_v34 = vpop.f32.mrb[43].mxu0 }
 0x14a   :  { %v1240_v36 = vadd.f32 %v1239_v25, %v1228_v26  ;;  %v1085_v37 = vadd.f32 %v1733_v27, %v2272_v33  ;;  %v1736_v38 = vadd.f32 %v1735_v34, %v1734_v29  ;;  %v1793_v39 = vpop.f32.mrb[43].mxu1 }
 0x14b   :  { %v1794_v55 = vadd.f32 %v1793_v39, %v1792_v31 }
 0x14c   :  { %v2323_v40 = vadd.f32 %v1791_v21, %v1085_v37  ;;  %v1088_v41 = vadd.f32 %v1736_v38, %v2274_v35 }
 0x14e   :  { %v1207_v42 = vadd.f32 %v1206_v19, %v2323_v40  ;;  %v1229_v43 = vmul.f32 %v2323_v40, %v2323_v40  ;;  %v2329_v44 = vadd.f32 %v1794_v55, %v1088_v41  ;;  %v1737_v57 = vpop.f32.mrb[44].mxu0 }
 0x14f   :  { %v1795_v45 = vpop.f32.mrb[44].mxu1  ;;  %v1738_v46 = vpop.f32.mrb[45].mxu0 }
 0x150   :  { %v1241_v48 = vadd.f32 %v1240_v36, %v1229_v43  ;;  %v1208_v33 = vadd.f32 %v1207_v42, %v2329_v44  ;;  %v1230_v50 = vmul.f32 %v2329_v44, %v2329_v44  ;;  %v1739_v51 = vadd.f32 %v1738_v46, %v1737_v57  ;;  %v1796_v53 = vpop.f32.mrb[45].mxu1  ;;  %v1740_v54 = vpop.f32.mrb[46].mxu0 }
 0x151   :  { %v1797_v35 = vadd.f32 %v1796_v53, %v1795_v45  ;;  %v1798_v56 = vpop.f32.mrb[46].mxu1  ;;  %v1741_v59 = vpop.f32.mrb[47].mxu0 }
 0x152   :  { %v1242_v60 = vadd.f32 %v1241_v48, %v1230_v50  ;;  %v1093_v61 = vadd.f32 %v1739_v51, %v2276_v47  ;;  %v1742_v62 = vadd.f32 %v1741_v59, %v1740_v54  ;;  %v1799_v5 = vpop.f32.mrb[47].mxu1 }
 0x153   :  { %v1800_v0 = vadd.f32 %v1799_v5, %v1798_v56 }
 0x154   :  { %v2335_v2 = vadd.f32 %v1797_v35, %v1093_v61  ;;  %v1096_v3 = vadd.f32 %v1742_v62, %v2278_v49 }
 0x156   :  { %v1209_v4 = vadd.f32 %v1208_v33, %v2335_v2  ;;  %v1231_v7 = vmul.f32 %v2335_v2, %v2335_v2  ;;  %v2341_v6 = vadd.f32 %v1800_v0, %v1096_v3  ;;  %v1743_v8 = vpop.f32.mrb[48].mxu0 }
 0x157   :  { %v1801_v9 = vpop.f32.mrb[48].mxu1  ;;  %v1744_v10 = vpop.f32.mrb[49].mxu0 }
 0x158   :  { %v1243_v11 = vadd.f32 %v1242_v60, %v1231_v7  ;;  %v1210_v47 = vadd.f32 %v1209_v4, %v2341_v6  ;;  %v1232_v12 = vmul.f32 %v2341_v6, %v2341_v6  ;;  %v1745_v13 = vadd.f32 %v1744_v10, %v1743_v8  ;;  %v1802_v16 = vpop.f32.mrb[49].mxu1  ;;  %v1746_v17 = vpop.f32.mrb[50].mxu0 }
 0x159   :  { %v1803_v49 = vadd.f32 %v1802_v16, %v1801_v9  ;;  %v1804_v18 = vpop.f32.mrb[50].mxu1  ;;  %v1747_v22 = vpop.f32.mrb[51].mxu0  ;;  %v1264_v16 = vlaneseq }
 0x15a   :  { %v1244_v23 = vadd.f32 %v1243_v11, %v1232_v12  ;;  %v1101_v24 = vadd.f32 %v1745_v13, %v2280_v63  ;;  %v1748_v25 = vadd.f32 %v1747_v22, %v1746_v17  ;;  %v1805_v19 = vpop.f32.mrb[51].mxu1 }
 0x15b   :  { %v1806_v26 = vadd.f32 %v1805_v19, %v1804_v18  ;;  %v1265_v17 = vshrl.u32 %v1264_v16, 7 }
 0x15c   :  { %v2347_v27 = vadd.f32 %v1803_v49, %v1101_v24  ;;  %v1104_v28 = vadd.f32 %v1748_v25, %v2282_v1  ;;  %v1259_v49 = vld [vmem:[%s2400_s2] sm:$0x1] }
 0x15d   :  { %v1266_v18 = vsub.s32 0, %v1265_v17 }
 0x15e   :  { %v1211_v29 = vadd.f32 %v1210_v47, %v2347_v27  ;;  %v1233_v21 = vmul.f32 %v2347_v27, %v2347_v27  ;;  %v2353_v31 = vadd.f32 %v1806_v26, %v1104_v28  ;;  %v1749_v34 = vpop.f32.mrb[52].mxu0 }
 0x15f   :  { %v1807_v36 = vpop.f32.mrb[52].mxu1  ;;  %v1750_v37 = vpop.f32.mrb[53].mxu0 }
 0x160   :  { %v1245_v38 = vadd.f32 %v1244_v23, %v1233_v21  ;;  %v1212_v63 = vadd.f32 %v1211_v29, %v2353_v31  ;;  %v1234_v39 = vmul.f32 %v2353_v31, %v2353_v31  ;;  %v1751_v55 = vadd.f32 %v1750_v37, %v1749_v34  ;;  %v1808_v41 = vpop.f32.mrb[53].mxu1  ;;  %v1752_v42 = vpop.f32.mrb[54].mxu0  ;;  %v1282_v21 = vld [vmem:[%s2401_s3] sm:$0x1] }
 0x161   :  { %v1809_v1 = vadd.f32 %v1808_v41, %v1807_v36  ;;  %v1810_v43 = vpop.f32.mrb[54].mxu1  ;;  %v1753_v57 = vpop.f32.mrb[55].mxu0 }
 0x162   :  { %v1246_v45 = vadd.f32 %v1245_v38, %v1234_v39  ;;  %v1109_v46 = vadd.f32 %v1751_v55, %v2284_v14  ;;  %v1811_v48 = vpop.f32.mrb[55].mxu1 }
 0x164   :  { %v1197_v33 = vadd.f32 %v1809_v1, %v1109_v46 }
 0x166   :  { %v1214_v50 = vsel %vm1213_vm0, %v1197_v33, 0.0  ;;  %v1235_v51 = vmul.f32 %v1197_v33, %v1197_v33 }
 0x167   :  { %v1215_v53 = vadd.f32 %v1214_v50, %v1212_v63 }
 0x168   :  { %v1247_v54 = vsel %vm1213_vm0, %v1235_v51, 0.0 }
 0x169   :  { %v1216_v35 = vrot.slane %v1215_v53, 4  ;;  %v1248_v56 = vadd.f32 %v1247_v54, %v1246_v45 }
 0x16b   :  { %v1217_v59 = vadd.f32 %v1216_v35, %v1215_v53  ;;  %v1249_v60 = vrot.slane %v1248_v56, 4 }
 0x16d   :  { %v1218_v61 = vrot.slane %v1217_v59, 2  ;;  %v1250_v62 = vadd.f32 %v1249_v60, %v1248_v56 }
 0x16f   :  { %v1219_v5 = vadd.f32 %v1218_v61, %v1217_v59  ;;  %v1251_v0 = vrot.slane %v1250_v62, 2 }
 0x171   :  { %v1220_v3 = vrot.slane %v1219_v5, 1  ;;  %v1252_v4 = vadd.f32 %v1251_v0, %v1250_v62 }
 0x173   :  { %v1221_v7 = vadd.f32 %v1220_v3, %v1219_v5  ;;  %v1253_v8 = vrot.slane %v1252_v4, 1 }
 0x175   :  { %v1222_v14 = vmul.f32 0.010204081, %v1221_v7  ;;  %v1254_v9 = vadd.f32 %v1253_v8, %v1252_v4 }
 0x177   :  { %v1255_v10 = vmul.f32 0.010204081, %v1254_v9  ;;  %v1256_v11 = vmul.f32 %v1222_v14, %v1222_v14 }
 0x179   :  { %v1257_v47 = vsub.f32 %v1255_v10, %v1256_v11 }
 0x17b   :  { %v1258_v12 = vmax.f32 %v1257_v47, 0.0 }
 0x17d   :  { %v1260_v13 = vadd.f32 1e-05, %v1258_v12 }
 0x17f   :  { %1885 = vrsqrt.f32 %v1260_v13 }
 0x189   :  { %v1886_v22 = vpop.eup %1885 }
 0x18a   :  { %v1262_v23 = vmul.f32 %v1886_v22, %v1259_v49 }
 0x18c   :  { %v1267_v24 = vrot.slane %v1262_v23, %v1266_v18  ;;  %v1283_v25 = vmul.f32 %v1262_v23, %v1222_v14 }
 0x18e   :  { %v1269_v19 = vmul.f32 %v1267_v24, %v2287_v30  ;;  %v1270_v26 = vmul.f32 %v1267_v24, %v2290_v32  ;;  %v1271_v28 = vmul.f32 %v1267_v24, %v2299_v52  ;;  %v1272_v29 = vmul.f32 %v1267_v24, %v2305_v58 }
 0x18f   :  { %v1273_v34 = vmul.f32 %v1267_v24, %v2311_v15  ;;  %v1274_v36 = vmul.f32 %v1267_v24, %v2317_v20  ;;  %v1275_v37 = vmul.f32 %v1267_v24, %v2323_v40  ;;  %v1276_v38 = vmul.f32 %v1267_v24, %v2329_v44 }
 0x190   :  { %v1277_v30 = vmul.f32 %v1267_v24, %v2335_v2  ;;  %v1278_v32 = vmul.f32 %v1267_v24, %v2341_v6  ;;  %v1279_v52 = vmul.f32 %v1267_v24, %v2347_v27  ;;  %v1280_v58 = vmul.f32 %v1267_v24, %v2353_v31 }
 0x191   :  { %v1281_v63 = vmul.f32 %v1267_v24, %v1197_v33  ;;  %v1284_v39 = vsub.f32 %v1282_v21, %v1283_v25 }
 0x193   :  { %v1289_v55 = vrot.slane %v1284_v39, %v1266_v18 }
 0x195   :  { %v1291_v41 = vadd.f32 %v1289_v55, %v1269_v19  ;;  %v1292_v42 = vadd.f32 %v1289_v55, %v1270_v26  ;;  %v1293_v15 = vadd.f32 %v1289_v55, %v1271_v28  ;;  %v1294_v1 = vadd.f32 %v1289_v55, %v1272_v29 }
 0x196   :  { %v1295_v20 = vadd.f32 %v1289_v55, %v1273_v34  ;;  %v1296_v43 = vadd.f32 %v1289_v55, %v1274_v36  ;;  %v1297_v40 = vadd.f32 %v1289_v55, %v1275_v37  ;;  %v1298_v57 = vadd.f32 %v1289_v55, %v1276_v38 }
 0x197   :  { %v1299_v44 = vadd.f32 %v1289_v55, %v1277_v30  ;;  %v1300_v45 = vadd.f32 %v1289_v55, %v1278_v32  ;;  %v1301_v2 = vadd.f32 %v1289_v55, %v1279_v52  ;;  %v1302_v46 = vadd.f32 %v1289_v55, %v1280_v58 }
 0x198   :  { %v1303_v6 = vadd.f32 %v1289_v55, %v1281_v63  ;;  %v1304_v48 = vmul.f32 0.2, %v1291_v41  ;;  %v1305_v27 = vmul.f32 0.2, %v1292_v42  ;;  %v1306_v50 = vmul.f32 0.2, %v1293_v15 }
 0x199   :  { %v1307_v31 = vmul.f32 0.2, %v1294_v1  ;;  %v1308_v33 = vmul.f32 0.2, %v1295_v20  ;;  %v1309_v51 = vmul.f32 0.2, %v1296_v43 }
 0x19a   :  { %v1310_v53 = vmul.f32 0.2, %v1297_v40  ;;  %v1311_v54 = vmul.f32 0.2, %v1298_v57  ;;  %v1312_v35 = vmul.f32 0.2, %v1299_v44  ;;  %v1317_v56 = vmax.f32 %v1291_v41, %v1304_v48 }
 0x19b   :  { %v1313_v59 = vmul.f32 0.2, %v1300_v45  ;;  %v1314_v60 = vmul.f32 0.2, %v1301_v2  ;;  %v1315_v61 = vmul.f32 0.2, %v1302_v46  ;;  %v1318_v62 = vmax.f32 %v1292_v42, %v1305_v27 }
 0x19c   :  { %v1316_v5 = vmul.f32 0.2, %v1303_v6  ;;  %v1319_v0 = vmax.f32 %v1293_v15, %v1306_v50  ;;  %v1320_v3 = vmax.f32 %v1294_v1, %v1307_v31  ;;  %v1321_v4 = vmax.f32 %v1295_v20, %v1308_v33 }
 0x19d   :  { %v1322_v7 = vmax.f32 %v1296_v43, %v1309_v51  ;;  %v1323_v8 = vmax.f32 %v1297_v40, %v1310_v53  ;;  %v1324_v14 = vmax.f32 %v1298_v57, %v1311_v54  ;;  %v1325_v9 = vmax.f32 %v1299_v44, %v1312_v35 }
 0x19e   :  { %v1326_v10 = vmax.f32 %v1300_v45, %v1313_v59  ;;  %v1327_v11 = vmax.f32 %v1301_v2, %v1314_v60  ;;  %v1328_v47 = vmax.f32 %v1302_v46, %v1315_v61  ;;  %v1329_v12 = vmax.f32 %v1303_v6, %v1316_v5 }
 0x19f   :  { %v1549_v13 = vpack.c.bf16 %v1318_v62, %v1317_v56  ;;  %v1554_v16 = vpack.c.bf16 %v1320_v3, %v1319_v0  ;;  %v1559_v17 = vpack.c.bf16 %v1322_v7, %v1321_v4  ;;  %v1564_v49 = vpack.c.bf16 %v1324_v14, %v1323_v8 }
 0x1a0   :  { %v1545_v18 = vpack.c.bf16 %v1329_v12, %v1329_v12  ;;  %v1569_v22 = vpack.c.bf16 %v1326_v10, %v1325_v9  ;;  %v1574_v23 = vpack.c.bf16 %v1328_v47, %v1327_v11 }
 0x1a1   :  { %1550 = vst [vmem:[%s2402_s4] sm:$0xff] %v1549_v13   ;;  %1576 = vst [vmem:[%s2402_s4 + $0x8] sm:$0xff] %v1554_v16  }
 0x1a2   :  { %1577 = vst [vmem:[%s2402_s4 + $0x10] sm:$0xff] %v1559_v17   ;;  %1578 = vst [vmem:[%s2402_s4 + $0x18] sm:$0xff] %v1564_v49  }
 0x1a3   :  { %1579 = vst [vmem:[%s2402_s4 + $0x20] sm:$0xff] %v1569_v22   ;;  %1580 = vst [vmem:[%s2402_s4 + $0x28] sm:$0xff] %v1574_v23  }
 0x1a4   :  { %1395 = vst [vmem:[%s2402_s4 + $0x30] sm:$0x1] %v1545_v18 }

// kernel: tile.7
= control target key start
LH: loop header
LB: loop body
LE: loop exit
PB: predicated region body
PF: predicated region fallthrough
CT: control target
= control target key end

     0   :  { %s98_s0 = inlined_call_operand.vmem [shape: f32[2,9,256], index: 0, kind: input, shape index: {}]   ;;  %s99_s1 = inlined_call_operand.vmem [shape: f32[18,256], index: 1, kind: output, shape index: {}]  }
   0x1   :  { %v2_v0 = vld [vmem:[%s98_s0] sm:$0xff]   ;;  %v30_v1 = vld [vmem:[%s98_s0 + $0x8] sm:$0xff]   ;;  %v41_v5 = vld [vmem:[%s98_s0 + $0x38] sm:$0x1]  }
   0x2   :  { %v32_v2 = vld [vmem:[%s98_s0 + $0x10] ss:$8 sm:$0x7]   ;;  %3 = vst [vmem:[%s99_s1] sm:$0xff] %v2_v0   ;;  %31 = vst [vmem:[%s99_s1 + $0x8] sm:$0xff] %v30_v1   ;;  %v35_v3 = vld [vmem:[%s98_s0 + $0x21] sm:$0xff]  }
   0x3   :  { %33 = vst [vmem:[%s99_s1 + $0x10] ss:$8 sm:$0x3] %v32_v2   ;;  %34 = vst [vmem:[%s99_s1 + $0xf] sm:$0x4] %v32_v2   ;;  %v38_v4 = vld [vmem:[%s98_s0 + $0x29] sm:$0xff]  }
   0x4   :  { %36 = vst [vmem:[%s99_s1 + $0x12] sm:$0x3f] %v35_v3   ;;  %37 = vst [vmem:[%s99_s1 + $0x4a] ss:$-7 sm:$0xc0] %v35_v3  }
   0x5   :  { %39 = vst [vmem:[%s99_s1 + $0x1a] sm:$0x3f] %v38_v4   ;;  %40 = vst [vmem:[%s99_s1 + $0x52] ss:$-7 sm:$0xc0] %v38_v4  }
   0x6   :  { %42 = vst [vmem:[%s99_s1 + $0x29] sm:$0x1] %v41_v5  }

// kernel: discriminator_forward.5
= control target key start
LH: loop header
LB: loop body
LE: loop exit
PB: predicated region body
PF: predicated region fallthrough
CT: control target
= control target key end

     0   :  { %vm2128_vm0 = vcmask 1041408   ;;  %vm3163_vm1 = vmmov 0   ;;  %vm2296_vm2 = vcmask 146432   ;;  %vm2383_vm3 = vcmask 1024   ;;  %s4161_s1 = inlined_call_operand.vmem [shape: bf16[2048,256], index: 1, kind: input, shape index: {}]   ;;  %s4162_s0 = inlined_call_operand.vmem [shape: bf16[18,2048], index: 0, kind: input, shape index: {}]   ;;  %s4163_s2 = inlined_call_operand.vmem [shape: f32[1,256], index: 2, kind: input, shape index: {}]   ;;  %s4164_s3 = inlined_call_operand.vmem [shape: f32[1,256], index: 3, kind: input, shape index: {}]   ;;  %s4165_s4 = inlined_call_operand.vmem [shape: f32[18,256], index: 4, kind: input, shape index: {}]   ;;  %s4166_s5 = inlined_call_operand.vmem [shape: f32[2,18], index: 5, kind: input, shape index: {}]   ;;  %s4167_s6 = inlined_call_operand.vmem [shape: f32[2,1], index: 6, kind: output, shape index: {}]  }
   0x1   :  { %v2753_v0 = vld [vmem:[%s4161_s1 + $0x4] ss:$8 sps:$4 sm:$0xff]   ;;  %v2757_v2 = vld [vmem:[%s4161_s1] ss:$8 sps:$4 sm:$0xff]   ;;  %v2759_v4 = vld [vmem:[%s4161_s1 + $0x14] ss:$8 sps:$4 sm:$0xff]  }
   0x2   :  { %v2755_v1 = vld [vmem:[%s4161_s1 + $0x404] ss:$8 sps:$4 sm:$0xff]   ;;  %1719 = vmatprep.subr.bf16.mxu1 %v2753_v0  ;;  %v2758_v3 = vld [vmem:[%s4161_s1 + $0x400] ss:$8 sps:$4 sm:$0xff]   ;;  %v2761_v5 = vld [vmem:[%s4161_s1 + $0x414] ss:$8 sps:$4 sm:$0xff]  }
   0x3   :  { %1923 = vmatprep.subr.bf16.mxu0 %v2755_v1  ;;  %1720 = vmatpush1.bf16.msra.mxu1 %v2757_v2  ;;  %v2763_v6 = vld [vmem:[%s4161_s1 + $0x10] ss:$8 sps:$4 sm:$0xff]   ;;  %v2765_v8 = vld [vmem:[%s4161_s1 + $0x24] ss:$8 sps:$4 sm:$0xff]   ;;  %v2769_v10 = vld [vmem:[%s4161_s1 + $0x20] ss:$8 sps:$4 sm:$0xff]  }
   0x4   :  { %1924 = vmatpush1.bf16.msra.mxu0 %v2758_v3  ;;  %1721 = vmatprep.subr.bf16.mxu1 %v2759_v4  ;;  %v2764_v7 = vld [vmem:[%s4161_s1 + $0x410] ss:$8 sps:$4 sm:$0xff]   ;;  %v2767_v9 = vld [vmem:[%s4161_s1 + $0x424] ss:$8 sps:$4 sm:$0xff]   ;;  %v2770_v11 = vld [vmem:[%s4161_s1 + $0x420] ss:$8 sps:$4 sm:$0xff]  }
   0x5   :  { %1925 = vmatprep.subr.bf16.mxu0 %v2761_v5  ;;  %v2771_v12 = vld [vmem:[%s4161_s1 + $0x34] ss:$8 sps:$4 sm:$0xff]   ;;  %v2775_v14 = vld [vmem:[%s4161_s1 + $0x30] ss:$8 sps:$4 sm:$0xff]   ;;  %v2777_v16 = vld [vmem:[%s4161_s1 + $0x44] ss:$8 sps:$4 sm:$0xff]  }
   0x6   :  { %v2773_v13 = vld [vmem:[%s4161_s1 + $0x434] ss:$8 sps:$4 sm:$0xff]   ;;  %v2776_v15 = vld [vmem:[%s4161_s1 + $0x430] ss:$8 sps:$4 sm:$0xff]   ;;  %v2779_v17 = vld [vmem:[%s4161_s1 + $0x444] ss:$8 sps:$4 sm:$0xff]  }
   0x7   :  { %1722 = vmatpush1.bf16.msra.mxu1 %v2763_v6  ;;  %v2781_v18 = vld [vmem:[%s4161_s1 + $0x40] ss:$8 sps:$4 sm:$0xff]   ;;  %v2783_v20 = vld [vmem:[%s4161_s1 + $0x54] ss:$8 sps:$4 sm:$0xff]   ;;  %v2787_v22 = vld [vmem:[%s4161_s1 + $0x50] ss:$8 sps:$4 sm:$0xff]  }
   0x8   :  { %1926 = vmatpush1.bf16.msra.mxu0 %v2764_v7  ;;  %1723 = vmatprep.subr.bf16.mxu1 %v2765_v8  ;;  %v2782_v19 = vld [vmem:[%s4161_s1 + $0x440] ss:$8 sps:$4 sm:$0xff]   ;;  %v2785_v21 = vld [vmem:[%s4161_s1 + $0x454] ss:$8 sps:$4 sm:$0xff]   ;;  %v2788_v23 = vld [vmem:[%s4161_s1 + $0x450] ss:$8 sps:$4 sm:$0xff]  }
   0x9   :  { %1927 = vmatprep.subr.bf16.mxu0 %v2767_v9  ;;  %v2789_v24 = vld [vmem:[%s4161_s1 + $0x64] ss:$8 sps:$4 sm:$0xff]   ;;  %v2793_v26 = vld [vmem:[%s4161_s1 + $0x60] ss:$8 sps:$4 sm:$0xff]   ;;  %v2795_v28 = vld [vmem:[%s4161_s1 + $0x74] ss:$8 sps:$4 sm:$0xff]  }
   0xa   :  { %v2791_v25 = vld [vmem:[%s4161_s1 + $0x464] ss:$8 sps:$4 sm:$0xff]   ;;  %v2794_v27 = vld [vmem:[%s4161_s1 + $0x460] ss:$8 sps:$4 sm:$0xff]   ;;  %v2797_v29 = vld [vmem:[%s4161_s1 + $0x474] ss:$8 sps:$4 sm:$0xff]  }
   0xb   :  { %1724 = vmatpush1.bf16.msra.mxu1 %v2769_v10  ;;  %v2799_v30 = vld [vmem:[%s4161_s1 + $0x70] ss:$8 sps:$4 sm:$0xff]   ;;  %v2801_v32 = vld [vmem:[%s4161_s1 + $0x84] ss:$8 sps:$4 sm:$0xff]   ;;  %v2805_v34 = vld [vmem:[%s4161_s1 + $0x80] ss:$8 sps:$4 sm:$0xff]  }
   0xc   :  { %1928 = vmatpush1.bf16.msra.mxu0 %v2770_v11  ;;  %1725 = vmatprep.subr.bf16.mxu1 %v2771_v12  ;;  %v2800_v31 = vld [vmem:[%s4161_s1 + $0x470] ss:$8 sps:$4 sm:$0xff]   ;;  %v2803_v33 = vld [vmem:[%s4161_s1 + $0x484] ss:$8 sps:$4 sm:$0xff]   ;;  %v2806_v35 = vld [vmem:[%s4161_s1 + $0x480] ss:$8 sps:$4 sm:$0xff]  }
   0xd   :  { %1929 = vmatprep.subr.bf16.mxu0 %v2773_v13  ;;  %v2807_v36 = vld [vmem:[%s4161_s1 + $0x94] ss:$8 sps:$4 sm:$0xff]   ;;  %v2811_v38 = vld [vmem:[%s4161_s1 + $0x90] ss:$8 sps:$4 sm:$0xff]   ;;  %v2813_v40 = vld [vmem:[%s4161_s1 + $0xa4] ss:$8 sps:$4 sm:$0xff]  }
   0xe   :  { %v2809_v37 = vld [vmem:[%s4161_s1 + $0x494] ss:$8 sps:$4 sm:$0xff]   ;;  %v2812_v39 = vld [vmem:[%s4161_s1 + $0x490] ss:$8 sps:$4 sm:$0xff]   ;;  %v2815_v41 = vld [vmem:[%s4161_s1 + $0x4a4] ss:$8 sps:$4 sm:$0xff]  }
   0xf   :  { %1726 = vmatpush1.bf16.msra.mxu1 %v2775_v14  ;;  %v2817_v42 = vld [vmem:[%s4161_s1 + $0xa0] ss:$8 sps:$4 sm:$0xff]   ;;  %v2819_v44 = vld [vmem:[%s4161_s1 + $0xb4] ss:$8 sps:$4 sm:$0xff]   ;;  %v2823_v46 = vld [vmem:[%s4161_s1 + $0xb0] ss:$8 sps:$4 sm:$0xff]  }
  0x10   :  { %1930 = vmatpush1.bf16.msra.mxu0 %v2776_v15  ;;  %1727 = vmatprep.subr.bf16.mxu1 %v2777_v16  ;;  %v2818_v43 = vld [vmem:[%s4161_s1 + $0x4a0] ss:$8 sps:$4 sm:$0xff]   ;;  %v2821_v45 = vld [vmem:[%s4161_s1 + $0x4b4] ss:$8 sps:$4 sm:$0xff]   ;;  %v2824_v47 = vld [vmem:[%s4161_s1 + $0x4b0] ss:$8 sps:$4 sm:$0xff]  }
  0x11   :  { %1931 = vmatprep.subr.bf16.mxu0 %v2779_v17  ;;  %v23_v48 = vld [vmem:[%s4162_s0] sm:$0xff]  ;;  %v2831_v58 = vld [vmem:[%s4161_s1 + $0xd4] ss:$8 sps:$4 sm:$0xff]   ;;  %v2835_v60 = vld [vmem:[%s4161_s1 + $0xd0] ss:$8 sps:$4 sm:$0xff]  }
  0x12   :  { %v31_v49 = vld [vmem:[%s4162_s0 + $0x40] sm:$0xff]  ;;  %v2833_v59 = vld [vmem:[%s4161_s1 + $0x4d4] ss:$8 sps:$4 sm:$0xff]   ;;  %v2836_v61 = vld [vmem:[%s4161_s1 + $0x4d0] ss:$8 sps:$4 sm:$0xff]  }
  0x13   :  { %1728 = vmatpush1.bf16.msra.mxu1 %v2781_v18  ;;  %v2825_v50 = vld [vmem:[%s4161_s1 + $0xc4] ss:$8 sps:$4 sm:$0xff]   ;;  %v2390_v52 = vcombine.high %v23_v48, %v31_v49  ;;  %v2829_v56 = vld [vmem:[%s4161_s1 + $0xc0] ss:$8 sps:$4 sm:$0xff]   ;;  %v2843_v2 = vld [vmem:[%s4161_s1 + $0xf4] ss:$8 sps:$4 sm:$0xff]   ;;  %v2389_v8 = vcombine.low %v23_v48, %v31_v49 }
  0x14   :  { %1932 = vmatpush1.bf16.msra.mxu0 %v2782_v19  ;;  %1729 = vmatprep.subr.bf16.mxu1 %v2783_v20  ;;  %v2827_v51 = vld [vmem:[%s4161_s1 + $0x4c4] ss:$8 sps:$4 sm:$0xff]   ;;  %v2830_v57 = vld [vmem:[%s4161_s1 + $0x4c0] ss:$8 sps:$4 sm:$0xff]   ;;  %v2845_v3 = vld [vmem:[%s4161_s1 + $0x4f4] ss:$8 sps:$4 sm:$0xff]  }
  0x15   :  { %1933 = vmatprep.subr.bf16.mxu0 %v2785_v21  ;;  %v27_v53 = vld [vmem:[%s4162_s0 + $0x20] sm:$0xff]  ;;  %1751 = vmatprep.mubr.bf16.mxu1 %v2390_v52  ;;  %v2847_v4 = vld [vmem:[%s4161_s1 + $0xf0] ss:$8 sps:$4 sm:$0xff]   ;;  %v2857_v12 = vld [vmem:[%s4161_s1 + $0x114] ss:$8 sps:$4 sm:$0xff]  }
  0x16   :  { %v35_v54 = vld [vmem:[%s4162_s0 + $0x60] sm:$0xff]  ;;  %v2848_v5 = vld [vmem:[%s4161_s1 + $0x4f0] ss:$8 sps:$4 sm:$0xff]   ;;  %v2860_v13 = vld [vmem:[%s4161_s1 + $0x514] ss:$8 sps:$4 sm:$0xff]  }
  0x17   :  { %1730 = vmatpush1.bf16.msra.mxu1 %v2787_v22  ;;  %v2398_v55 = vcombine.high %v27_v53, %v35_v54  ;;  %v2837_v62 = vld [vmem:[%s4161_s1 + $0xe4] ss:$8 sps:$4 sm:$0xff]   ;;  %v2841_v0 = vld [vmem:[%s4161_s1 + $0xe0] ss:$8 sps:$4 sm:$0xff]   ;;  %v2397_v10 = vcombine.low %v27_v53, %v35_v54  ;;  %v2855_v14 = vld [vmem:[%s4161_s1 + $0x110] ss:$8 sps:$4 sm:$0xff]  }
  0x18   :  { %1934 = vmatpush1.bf16.msra.mxu0 %v2788_v23  ;;  %1731 = vmatprep.subr.bf16.mxu1 %v2789_v24  ;;  %v2839_v63 = vld [vmem:[%s4161_s1 + $0x4e4] ss:$8 sps:$4 sm:$0xff]   ;;  %v2842_v1 = vld [vmem:[%s4161_s1 + $0x4e0] ss:$8 sps:$4 sm:$0xff]   ;;  %v2858_v15 = vld [vmem:[%s4161_s1 + $0x510] ss:$8 sps:$4 sm:$0xff]  }
  0x19   :  { %1935 = vmatprep.subr.bf16.mxu0 %v2791_v25  ;;  %1955 = vmatprep.mubr.bf16.mxu0 %v2398_v55  ;;  %v2851_v6 = vld [vmem:[%s4161_s1 + $0x104] ss:$8 sps:$4 sm:$0xff]   ;;  %v2849_v9 = vld [vmem:[%s4161_s1 + $0x100] ss:$8 sps:$4 sm:$0xff]   ;;  %v2869_v20 = vld [vmem:[%s4161_s1 + $0x134] ss:$8 sps:$4 sm:$0xff]  }
  0x1a   :  { %v2854_v7 = vld [vmem:[%s4161_s1 + $0x504] ss:$8 sps:$4 sm:$0xff]   ;;  %v2852_v11 = vld [vmem:[%s4161_s1 + $0x500] ss:$8 sps:$4 sm:$0xff]   ;;  %v2872_v21 = vld [vmem:[%s4161_s1 + $0x534] ss:$8 sps:$4 sm:$0xff]  }
  0x1b   :  { %1732 = vmatpush1.bf16.msra.mxu1 %v2793_v26  ;;  %v2863_v16 = vld [vmem:[%s4161_s1 + $0x124] ss:$8 sps:$4 sm:$0xff]   ;;  %v2861_v18 = vld [vmem:[%s4161_s1 + $0x120] ss:$8 sps:$4 sm:$0xff]   ;;  %v2867_v22 = vld [vmem:[%s4161_s1 + $0x130] ss:$8 sps:$4 sm:$0xff]  }
  0x1c   :  { %1936 = vmatpush1.bf16.msra.mxu0 %v2794_v27  ;;  %1733 = vmatprep.subr.bf16.mxu1 %v2795_v28  ;;  %v2866_v17 = vld [vmem:[%s4161_s1 + $0x524] ss:$8 sps:$4 sm:$0xff]   ;;  %v2864_v19 = vld [vmem:[%s4161_s1 + $0x520] ss:$8 sps:$4 sm:$0xff]   ;;  %v2870_v23 = vld [vmem:[%s4161_s1 + $0x530] ss:$8 sps:$4 sm:$0xff]  }
  0x1d   :  { %1937 = vmatprep.subr.bf16.mxu0 %v2797_v29  ;;  %v2875_v24 = vld [vmem:[%s4161_s1 + $0x144] ss:$8 sps:$4 sm:$0xff]   ;;  %v2873_v26 = vld [vmem:[%s4161_s1 + $0x140] ss:$8 sps:$4 sm:$0xff]   ;;  %v2881_v28 = vld [vmem:[%s4161_s1 + $0x154] ss:$8 sps:$4 sm:$0xff]  }
  0x1e   :  { %v2878_v25 = vld [vmem:[%s4161_s1 + $0x544] ss:$8 sps:$4 sm:$0xff]   ;;  %v2876_v27 = vld [vmem:[%s4161_s1 + $0x540] ss:$8 sps:$4 sm:$0xff]   ;;  %v2884_v29 = vld [vmem:[%s4161_s1 + $0x554] ss:$8 sps:$4 sm:$0xff]  }
  0x1f   :  { %1734 = vmatpush1.bf16.msra.mxu1 %v2799_v30  ;;  %v39_v30 = vld [vmem:[%s4162_s0 + $0x80] sm:$0x11]  ;;  %v3520_v48 = vld [vmem:[%s4162_s0 + $0x68] sm:$0xff] }
  0x20   :  { %1938 = vmatpush1.bf16.msra.mxu0 %v2800_v31  ;;  %1735 = vmatprep.subr.bf16.mxu1 %v2801_v32  ;;  %v2406_v31 = vcombine.high %v39_v30, %v39_v30  ;;  %v43_v32 = vld [vmem:[%s4162_s0 + $0xa0] sm:$0x11] }
  0x21   :  { %1939 = vmatprep.subr.bf16.mxu0 %v2803_v33  ;;  %v2405_v33 = vcombine.low %v39_v30, %v39_v30  ;;  %v2899_v52 = vld [vmem:[%s4161_s1 + $0x184] ss:$8 sps:$4 sm:$0xff]   ;;  %v2897_v54 = vld [vmem:[%s4161_s1 + $0x180] ss:$8 sps:$4 sm:$0xff]  }
  0x22   :  { %v2902_v53 = vld [vmem:[%s4161_s1 + $0x584] ss:$8 sps:$4 sm:$0xff]   ;;  %v2900_v55 = vld [vmem:[%s4161_s1 + $0x580] ss:$8 sps:$4 sm:$0xff]  }
  0x23   :  { %1736 = vmatpush1.bf16.msra.mxu1 %v2805_v34  ;;  %v2879_v34 = vld [vmem:[%s4161_s1 + $0x150] ss:$8 sps:$4 sm:$0xff]  }
  0x24   :  { %1940 = vmatpush1.bf16.msra.mxu0 %v2806_v35  ;;  %1737 = vmatprep.subr.bf16.mxu1 %v2807_v36  ;;  %v2882_v35 = vld [vmem:[%s4161_s1 + $0x550] ss:$8 sps:$4 sm:$0xff]   ;;  %v2414_v36 = vcombine.high %v43_v32, %v43_v32 }
  0x25   :  { %1941 = vmatprep.subr.bf16.mxu0 %v2809_v37  ;;  %v2413_v37 = vcombine.low %v43_v32, %v43_v32  ;;  %v2955_v32 = vld [vmem:[%s4161_s1 + $0x210] ss:$8 sps:$4 sm:$0xff]  }
  0x27   :  { %1738 = vmatpush1.bf16.msra.mxu1 %v2811_v38  ;;  %v2887_v38 = vld [vmem:[%s4161_s1 + $0x164] ss:$8 sps:$4 sm:$0xff]  }
  0x28   :  { %1942 = vmatpush1.bf16.msra.mxu0 %v2812_v39  ;;  %1739 = vmatprep.subr.bf16.mxu1 %v2813_v40  ;;  %v2890_v39 = vld [vmem:[%s4161_s1 + $0x564] ss:$8 sps:$4 sm:$0xff]   ;;  %v2885_v40 = vld [vmem:[%s4161_s1 + $0x160] ss:$8 sps:$4 sm:$0xff]  }
  0x29   :  { %1943 = vmatprep.subr.bf16.mxu0 %v2815_v41  ;;  %v2888_v41 = vld [vmem:[%s4161_s1 + $0x560] ss:$8 sps:$4 sm:$0xff]  }
  0x2b   :  { %1740 = vmatpush1.bf16.msra.mxu1 %v2817_v42  ;;  %v3497_v42 = vld [vmem:[%s4162_s0 + $0x8] sm:$0xff] }
  0x2c   :  { %1944 = vmatpush1.bf16.msra.mxu0 %v2818_v43  ;;  %1741 = vmatprep.subr.bf16.mxu1 %v2819_v44  ;;  %v3502_v43 = vld [vmem:[%s4162_s0 + $0x48] sm:$0xff]  ;;  %v2893_v44 = vld [vmem:[%s4161_s1 + $0x174] ss:$8 sps:$4 sm:$0xff]  }
  0x2d   :  { %1945 = vmatprep.subr.bf16.mxu0 %v2821_v45  ;;  %v2392_v45 = vcombine.high %v3497_v42, %v3502_v43 }
  0x2f   :  { %1742 = vmatpush1.bf16.msra.mxu1 %v2823_v46  ;;  %v2896_v46 = vld [vmem:[%s4161_s1 + $0x574] ss:$8 sps:$4 sm:$0xff]  }
  0x30   :  { %1946 = vmatpush1.bf16.msra.mxu0 %v2824_v47  ;;  %1743 = vmatprep.subr.bf16.mxu1 %v2825_v50  ;;  %v3515_v47 = vld [vmem:[%s4162_s0 + $0x28] sm:$0xff]  ;;  %v2891_v50 = vld [vmem:[%s4161_s1 + $0x170] ss:$8 sps:$4 sm:$0xff]  }
  0x31   :  { %1947 = vmatprep.subr.bf16.mxu0 %v2827_v51  ;;  %v2400_v49 = vcombine.high %v3515_v47, %v3520_v48  ;;  %v2894_v51 = vld [vmem:[%s4161_s1 + $0x570] ss:$8 sps:$4 sm:$0xff]  }
  0x33   :  { %1744 = vmatpush1.bf16.msra.mxu1 %v2829_v56  ;;  %v2905_v56 = vld [vmem:[%s4161_s1 + $0x194] ss:$8 sps:$4 sm:$0xff]  }
  0x34   :  { %1948 = vmatpush1.bf16.msra.mxu0 %v2830_v57  ;;  %1745 = vmatprep.subr.bf16.mxu1 %v2831_v58  ;;  %v2908_v57 = vld [vmem:[%s4161_s1 + $0x594] ss:$8 sps:$4 sm:$0xff]   ;;  %v2903_v58 = vld [vmem:[%s4161_s1 + $0x190] ss:$8 sps:$4 sm:$0xff]  }
  0x35   :  { %1949 = vmatprep.subr.bf16.mxu0 %v2833_v59  ;;  %v2906_v59 = vld [vmem:[%s4161_s1 + $0x590] ss:$8 sps:$4 sm:$0xff]  }
  0x37   :  { %1746 = vmatpush1.bf16.msra.mxu1 %v2835_v60  ;;  %v2911_v60 = vld [vmem:[%s4161_s1 + $0x1a4] ss:$8 sps:$4 sm:$0xff]  }
  0x38   :  { %1950 = vmatpush1.bf16.msra.mxu0 %v2836_v61  ;;  %1747 = vmatprep.subr.bf16.mxu1 %v2837_v62  ;;  %v2914_v61 = vld [vmem:[%s4161_s1 + $0x5a4] ss:$8 sps:$4 sm:$0xff]   ;;  %v2909_v62 = vld [vmem:[%s4161_s1 + $0x1a0] ss:$8 sps:$4 sm:$0xff]  }
  0x39   :  { %1951 = vmatprep.subr.bf16.mxu0 %v2839_v63  ;;  %v2912_v63 = vld [vmem:[%s4161_s1 + $0x5a0] ss:$8 sps:$4 sm:$0xff]  }
  0x3b   :  { %1748 = vmatpush1.bf16.msra.mxu1 %v2841_v0  ;;  %v2917_v0 = vld [vmem:[%s4161_s1 + $0x1b4] ss:$8 sps:$4 sm:$0xff]  }
  0x3c   :  { %1952 = vmatpush1.bf16.msra.mxu0 %v2842_v1  ;;  %1749 = vmatprep.subr.bf16.mxu1 %v2843_v2  ;;  %v2920_v1 = vld [vmem:[%s4161_s1 + $0x5b4] ss:$8 sps:$4 sm:$0xff]   ;;  %v2915_v2 = vld [vmem:[%s4161_s1 + $0x1b0] ss:$8 sps:$4 sm:$0xff]  }
  0x3d   :  { %1953 = vmatprep.subr.bf16.mxu0 %v2845_v3  ;;  %v2918_v3 = vld [vmem:[%s4161_s1 + $0x5b0] ss:$8 sps:$4 sm:$0xff]  }
  0x3f   :  { %1750 = vmatpush1.bf16.msra.mxu1 %v2847_v4  ;;  %v2923_v4 = vld [vmem:[%s4161_s1 + $0x1c4] ss:$8 sps:$4 sm:$0xff]  }
  0x40   :  { %1954 = vmatpush1.bf16.msra.mxu0 %v2848_v5  ;;  %1770 = vmatprep.subr.bf16.mxu1 %v2851_v6  ;;  %v2926_v5 = vld [vmem:[%s4161_s1 + $0x5c4] ss:$8 sps:$4 sm:$0xff]   ;;  %v2921_v6 = vld [vmem:[%s4161_s1 + $0x1c0] ss:$8 sps:$4 sm:$0xff]  }
  0x41   :  { %1974 = vmatprep.subr.bf16.mxu0 %v2854_v7  ;;  %v2924_v7 = vld [vmem:[%s4161_s1 + $0x5c0] ss:$8 sps:$4 sm:$0xff]  }
  0x42   :  { %1752 = vmatmul.mubr.bf16.vlgmr.msra.gmra.mrb[0].mxu1 %v2389_v8  ;;  %v2929_v8 = vld [vmem:[%s4161_s1 + $0x1d4] ss:$8 sps:$4 sm:$0xff]  }
  0x43   :  { %1956 = vmatmul.mubr.bf16.vlgmr.msra.gmra.mrb[0].mxu0 %v2397_v10  ;;  %1771 = vmatpush1.bf16.msra.mxu1 %v2849_v9  ;;  %v2932_v9 = vld [vmem:[%s4161_s1 + $0x5d4] ss:$8 sps:$4 sm:$0xff]   ;;  %v2927_v10 = vld [vmem:[%s4161_s1 + $0x1d0] ss:$8 sps:$4 sm:$0xff]  }
  0x44   :  { %1975 = vmatpush1.bf16.msra.mxu0 %v2852_v11  ;;  %1772 = vmatprep.subr.bf16.mxu1 %v2857_v12  ;;  %v2930_v11 = vld [vmem:[%s4161_s1 + $0x5d0] ss:$8 sps:$4 sm:$0xff]   ;;  %v2936_v12 = vld [vmem:[%s4161_s1 + $0x1e4] ss:$8 sps:$4 sm:$0xff]  }
  0x45   :  { %1976 = vmatprep.subr.bf16.mxu0 %v2860_v13  ;;  %1761 = vmatprep.mubr.bf16.mxu1 %v2406_v31  ;;  %v2940_v13 = vld [vmem:[%s4161_s1 + $0x5e4] ss:$8 sps:$4 sm:$0xff]  }
  0x46   :  { %1965 = vmatprep.mubr.bf16.mxu0 %v2414_v36  ;;  %v2961_v36 = vld [vmem:[%s4161_s1 + $0x220] ss:$8 sps:$4 sm:$0xff]  }
  0x47   :  { %1773 = vmatpush1.bf16.msra.mxu1 %v2855_v14  ;;  %v2934_v14 = vld [vmem:[%s4161_s1 + $0x1e0] ss:$8 sps:$4 sm:$0xff]  }
  0x48   :  { %1977 = vmatpush1.bf16.msra.mxu0 %v2858_v15  ;;  %1774 = vmatprep.subr.bf16.mxu1 %v2863_v16  ;;  %v2938_v15 = vld [vmem:[%s4161_s1 + $0x5e0] ss:$8 sps:$4 sm:$0xff]   ;;  %v2945_v16 = vld [vmem:[%s4161_s1 + $0x1f4] ss:$8 sps:$4 sm:$0xff]  }
  0x49   :  { %1978 = vmatprep.subr.bf16.mxu0 %v2866_v17  ;;  %v2948_v17 = vld [vmem:[%s4161_s1 + $0x5f4] ss:$8 sps:$4 sm:$0xff]  }
  0x4a   :  { %1762 = vmatmul.mubr.bf16.gmra.mrb[4].mxu1 %v2405_v33  ;;  %v2958_v33 = vld [vmem:[%s4161_s1 + $0x610] ss:$8 sps:$4 sm:$0xff]  }
  0x4b   :  { %1775 = vmatpush1.bf16.msra.mxu1 %v2861_v18  ;;  %1966 = vmatmul.mubr.bf16.gmra.mrb[4].mxu0 %v2413_v37  ;;  %v2943_v18 = vld [vmem:[%s4161_s1 + $0x1f0] ss:$8 sps:$4 sm:$0xff]   ;;  %v2964_v37 = vld [vmem:[%s4161_s1 + $0x620] ss:$8 sps:$4 sm:$0xff]  }
  0x4c   :  { %1979 = vmatpush1.bf16.msra.mxu0 %v2864_v19  ;;  %1776 = vmatprep.subr.bf16.mxu1 %v2869_v20  ;;  %v2946_v19 = vld [vmem:[%s4161_s1 + $0x5f0] ss:$8 sps:$4 sm:$0xff]   ;;  %v2951_v20 = vld [vmem:[%s4161_s1 + $0x204] ss:$8 sps:$4 sm:$0xff]  }
  0x4d   :  { %1980 = vmatprep.subr.bf16.mxu0 %v2872_v21  ;;  %1802 = vmatprep.mubr.bf16.mxu1 %v2392_v45  ;;  %v2954_v21 = vld [vmem:[%s4161_s1 + $0x604] ss:$8 sps:$4 sm:$0xff]   ;;  %v2972_v45 = vld [vmem:[%s4161_s1 + $0x634] ss:$8 sps:$4 sm:$0xff]  }
  0x4e   :  { %2006 = vmatprep.mubr.bf16.mxu0 %v2400_v49  ;;  %v2970_v49 = vld [vmem:[%s4161_s1 + $0x630] ss:$8 sps:$4 sm:$0xff]  }
  0x4f   :  { %1777 = vmatpush1.bf16.msra.mxu1 %v2867_v22  ;;  %v2949_v22 = vld [vmem:[%s4161_s1 + $0x200] ss:$8 sps:$4 sm:$0xff]  }
  0x50   :  { %1981 = vmatpush1.bf16.msra.mxu0 %v2870_v23  ;;  %1778 = vmatprep.subr.bf16.mxu1 %v2875_v24  ;;  %v2391_v23 = vcombine.low %v3497_v42, %v3502_v43  ;;  %v2399_v24 = vcombine.low %v3515_v47, %v3520_v48  ;;  %v3685_v42 = vld [vmem:[%s4162_s0 + $0x30] sm:$0xff] }
  0x51   :  { %1982 = vmatprep.subr.bf16.mxu0 %v2878_v25  ;;  %v2952_v25 = vld [vmem:[%s4161_s1 + $0x600] ss:$8 sps:$4 sm:$0xff]   ;;  %v3690_v43 = vld [vmem:[%s4162_s0 + $0x70] sm:$0xff] }
  0x52   :  { %v2402_v47 = vcombine.high %v3685_v42, %v3690_v43  ;;  %v2967_v48 = vld [vmem:[%s4161_s1 + $0x230] ss:$8 sps:$4 sm:$0xff]  }
  0x53   :  { %1779 = vmatpush1.bf16.msra.mxu1 %v2873_v26  ;;  %v40_v26 = vld [vmem:[%s4162_s0 + $0x88] sm:$0x11] }
  0x54   :  { %1983 = vmatpush1.bf16.msra.mxu0 %v2876_v27  ;;  %1780 = vmatprep.subr.bf16.mxu1 %v2881_v28  ;;  %v44_v27 = vld [vmem:[%s4162_s0 + $0xa8] sm:$0x11]  ;;  %v2957_v28 = vld [vmem:[%s4161_s1 + $0x214] ss:$8 sps:$4 sm:$0xff]   ;;  %v2408_v30 = vcombine.high %v40_v26, %v40_v26 }
  0x55   :  { %1984 = vmatprep.subr.bf16.mxu0 %v2884_v29  ;;  %v2960_v29 = vld [vmem:[%s4161_s1 + $0x614] ss:$8 sps:$4 sm:$0xff]   ;;  %v2416_v31 = vcombine.high %v44_v27, %v44_v27 }
  0x57   :  { %1781 = vmatpush1.bf16.msra.mxu1 %v2879_v34  ;;  %v2963_v34 = vld [vmem:[%s4161_s1 + $0x224] ss:$8 sps:$4 sm:$0xff]  }
  0x58   :  { %1985 = vmatpush1.bf16.msra.mxu0 %v2882_v35  ;;  %1782 = vmatprep.subr.bf16.mxu1 %v2887_v38  ;;  %v2966_v35 = vld [vmem:[%s4161_s1 + $0x624] ss:$8 sps:$4 sm:$0xff]   ;;  %v3675_v38 = vld [vmem:[%s4162_s0 + $0x10] sm:$0xff] }
  0x59   :  { %1986 = vmatprep.subr.bf16.mxu0 %v2890_v39  ;;  %v3680_v39 = vld [vmem:[%s4162_s0 + $0x50] sm:$0xff] }
  0x5b   :  { %1783 = vmatpush1.bf16.msra.mxu1 %v2885_v40  ;;  %v2407_v40 = vcombine.low %v40_v26, %v40_v26  ;;  %v3036_v26 = vld [vmem:[%s4161_s1 + $0x2e4] ss:$8 sps:$4 sm:$0xff]  }
  0x5c   :  { %1987 = vmatpush1.bf16.msra.mxu0 %v2888_v41  ;;  %1784 = vmatprep.subr.bf16.mxu1 %v2893_v44  ;;  %v2415_v41 = vcombine.low %v44_v27, %v44_v27  ;;  %v2969_v44 = vld [vmem:[%s4161_s1 + $0x234] ss:$8 sps:$4 sm:$0xff]   ;;  %v3040_v27 = vld [vmem:[%s4161_s1 + $0x6e4] ss:$8 sps:$4 sm:$0xff]  }
  0x5d   :  { %1988 = vmatprep.subr.bf16.mxu0 %v2896_v46  ;;  %v2394_v46 = vcombine.high %v3675_v38, %v3680_v39 }
  0x5f   :  { %1785 = vmatpush1.bf16.msra.mxu1 %v2891_v50  ;;  %v2975_v50 = vld [vmem:[%s4161_s1 + $0x244] ss:$8 sps:$4 sm:$0xff]  }
  0x60   :  { %1989 = vmatpush1.bf16.msra.mxu0 %v2894_v51  ;;  %1786 = vmatprep.subr.bf16.mxu1 %v2899_v52  ;;  %v2978_v51 = vld [vmem:[%s4161_s1 + $0x644] ss:$8 sps:$4 sm:$0xff]   ;;  %v2973_v52 = vld [vmem:[%s4161_s1 + $0x240] ss:$8 sps:$4 sm:$0xff]  }
  0x61   :  { %1990 = vmatprep.subr.bf16.mxu0 %v2902_v53  ;;  %v2976_v53 = vld [vmem:[%s4161_s1 + $0x640] ss:$8 sps:$4 sm:$0xff]  }
  0x63   :  { %1787 = vmatpush1.bf16.msra.mxu1 %v2897_v54  ;;  %v2981_v54 = vld [vmem:[%s4161_s1 + $0x254] ss:$8 sps:$4 sm:$0xff]  }
  0x64   :  { %1991 = vmatpush1.bf16.msra.mxu0 %v2900_v55  ;;  %1788 = vmatprep.subr.bf16.mxu1 %v2905_v56  ;;  %v2984_v55 = vld [vmem:[%s4161_s1 + $0x654] ss:$8 sps:$4 sm:$0xff]   ;;  %v2979_v56 = vld [vmem:[%s4161_s1 + $0x250] ss:$8 sps:$4 sm:$0xff]  }
  0x65   :  { %1992 = vmatprep.subr.bf16.mxu0 %v2908_v57  ;;  %v2982_v57 = vld [vmem:[%s4161_s1 + $0x650] ss:$8 sps:$4 sm:$0xff]  }
  0x67   :  { %1789 = vmatpush1.bf16.msra.mxu1 %v2903_v58  ;;  %v2987_v58 = vld [vmem:[%s4161_s1 + $0x264] ss:$8 sps:$4 sm:$0xff]  }
  0x68   :  { %1993 = vmatpush1.bf16.msra.mxu0 %v2906_v59  ;;  %1790 = vmatprep.subr.bf16.mxu1 %v2911_v60  ;;  %v2990_v59 = vld [vmem:[%s4161_s1 + $0x664] ss:$8 sps:$4 sm:$0xff]   ;;  %v2985_v60 = vld [vmem:[%s4161_s1 + $0x260] ss:$8 sps:$4 sm:$0xff]  }
  0x69   :  { %1994 = vmatprep.subr.bf16.mxu0 %v2914_v61  ;;  %v2988_v61 = vld [vmem:[%s4161_s1 + $0x660] ss:$8 sps:$4 sm:$0xff]  }
  0x6b   :  { %1791 = vmatpush1.bf16.msra.mxu1 %v2909_v62  ;;  %v2993_v62 = vld [vmem:[%s4161_s1 + $0x274] ss:$8 sps:$4 sm:$0xff]  }
  0x6c   :  { %1995 = vmatpush1.bf16.msra.mxu0 %v2912_v63  ;;  %1792 = vmatprep.subr.bf16.mxu1 %v2917_v0  ;;  %v2996_v63 = vld [vmem:[%s4161_s1 + $0x674] ss:$8 sps:$4 sm:$0xff]   ;;  %v2991_v0 = vld [vmem:[%s4161_s1 + $0x270] ss:$8 sps:$4 sm:$0xff]  }
  0x6d   :  { %1996 = vmatprep.subr.bf16.mxu0 %v2920_v1  ;;  %v2994_v1 = vld [vmem:[%s4161_s1 + $0x670] ss:$8 sps:$4 sm:$0xff]  }
  0x6f   :  { %1793 = vmatpush1.bf16.msra.mxu1 %v2915_v2  ;;  %v2999_v2 = vld [vmem:[%s4161_s1 + $0x284] ss:$8 sps:$4 sm:$0xff]  }
  0x70   :  { %1997 = vmatpush1.bf16.msra.mxu0 %v2918_v3  ;;  %1794 = vmatprep.subr.bf16.mxu1 %v2923_v4  ;;  %v3002_v3 = vld [vmem:[%s4161_s1 + $0x684] ss:$8 sps:$4 sm:$0xff]   ;;  %v2997_v4 = vld [vmem:[%s4161_s1 + $0x280] ss:$8 sps:$4 sm:$0xff]  }
  0x71   :  { %1998 = vmatprep.subr.bf16.mxu0 %v2926_v5  ;;  %v3000_v5 = vld [vmem:[%s4161_s1 + $0x680] ss:$8 sps:$4 sm:$0xff]  }
  0x73   :  { %1795 = vmatpush1.bf16.msra.mxu1 %v2921_v6  ;;  %v3005_v6 = vld [vmem:[%s4161_s1 + $0x294] ss:$8 sps:$4 sm:$0xff]  }
  0x74   :  { %1999 = vmatpush1.bf16.msra.mxu0 %v2924_v7  ;;  %1796 = vmatprep.subr.bf16.mxu1 %v2929_v8  ;;  %v3008_v7 = vld [vmem:[%s4161_s1 + $0x694] ss:$8 sps:$4 sm:$0xff]   ;;  %v3003_v8 = vld [vmem:[%s4161_s1 + $0x290] ss:$8 sps:$4 sm:$0xff]  }
  0x75   :  { %2000 = vmatprep.subr.bf16.mxu0 %v2932_v9  ;;  %v3006_v9 = vld [vmem:[%s4161_s1 + $0x690] ss:$8 sps:$4 sm:$0xff]  }
  0x77   :  { %1797 = vmatpush1.bf16.msra.mxu1 %v2927_v10  ;;  %v3011_v10 = vld [vmem:[%s4161_s1 + $0x2a4] ss:$8 sps:$4 sm:$0xff]  }
  0x78   :  { %2001 = vmatpush1.bf16.msra.mxu0 %v2930_v11  ;;  %1798 = vmatprep.subr.bf16.mxu1 %v2936_v12  ;;  %v3014_v11 = vld [vmem:[%s4161_s1 + $0x6a4] ss:$8 sps:$4 sm:$0xff]   ;;  %v3009_v12 = vld [vmem:[%s4161_s1 + $0x2a0] ss:$8 sps:$4 sm:$0xff]  }
  0x79   :  { %2002 = vmatprep.subr.bf16.mxu0 %v2940_v13  ;;  %v3012_v13 = vld [vmem:[%s4161_s1 + $0x6a0] ss:$8 sps:$4 sm:$0xff]  }
  0x7b   :  { %1799 = vmatpush1.bf16.msra.mxu1 %v2934_v14  ;;  %v3017_v14 = vld [vmem:[%s4161_s1 + $0x2b4] ss:$8 sps:$4 sm:$0xff]  }
  0x7c   :  { %2003 = vmatpush1.bf16.msra.mxu0 %v2938_v15  ;;  %1800 = vmatprep.subr.bf16.mxu1 %v2945_v16  ;;  %v3020_v15 = vld [vmem:[%s4161_s1 + $0x6b4] ss:$8 sps:$4 sm:$0xff]   ;;  %v3015_v16 = vld [vmem:[%s4161_s1 + $0x2b0] ss:$8 sps:$4 sm:$0xff]  }
  0x7d   :  { %2004 = vmatprep.subr.bf16.mxu0 %v2948_v17  ;;  %v3018_v17 = vld [vmem:[%s4161_s1 + $0x6b0] ss:$8 sps:$4 sm:$0xff]  }
  0x7f   :  { %1801 = vmatpush1.bf16.msra.mxu1 %v2943_v18  ;;  %v3023_v18 = vld [vmem:[%s4161_s1 + $0x2c4] ss:$8 sps:$4 sm:$0xff]  }
  0x80   :  { %2005 = vmatpush1.bf16.msra.mxu0 %v2946_v19  ;;  %1821 = vmatprep.subr.bf16.mxu1 %v2951_v20  ;;  %v3026_v19 = vld [vmem:[%s4161_s1 + $0x6c4] ss:$8 sps:$4 sm:$0xff]   ;;  %v3021_v20 = vld [vmem:[%s4161_s1 + $0x2c0] ss:$8 sps:$4 sm:$0xff]  }
  0x81   :  { %2025 = vmatprep.subr.bf16.mxu0 %v2954_v21  ;;  %v3024_v21 = vld [vmem:[%s4161_s1 + $0x6c0] ss:$8 sps:$4 sm:$0xff]  }
  0x82   :  { %1803 = vmatmul.mubr.bf16.vlgmr.msra.gmra.mrb[0].mxu1 %v2391_v23  ;;  %v3032_v23 = vld [vmem:[%s4161_s1 + $0x6d4] ss:$8 sps:$4 sm:$0xff]  }
  0x83   :  { %2007 = vmatmul.mubr.bf16.vlgmr.msra.gmra.mrb[0].mxu0 %v2399_v24  ;;  %1822 = vmatpush1.bf16.msra.mxu1 %v2949_v22  ;;  %v3029_v22 = vld [vmem:[%s4161_s1 + $0x2d4] ss:$8 sps:$4 sm:$0xff]   ;;  %v3027_v24 = vld [vmem:[%s4161_s1 + $0x2d0] ss:$8 sps:$4 sm:$0xff]  }
  0x84   :  { %2026 = vmatpush1.bf16.msra.mxu0 %v2952_v25  ;;  %1823 = vmatprep.subr.bf16.mxu1 %v2957_v28  ;;  %v3030_v25 = vld [vmem:[%s4161_s1 + $0x6d0] ss:$8 sps:$4 sm:$0xff]   ;;  %v3034_v28 = vld [vmem:[%s4161_s1 + $0x2e0] ss:$8 sps:$4 sm:$0xff]  }
  0x85   :  { %2027 = vmatprep.subr.bf16.mxu0 %v2960_v29  ;;  %1812 = vmatprep.mubr.bf16.mxu1 %v2408_v30  ;;  %v3038_v29 = vld [vmem:[%s4161_s1 + $0x6e0] ss:$8 sps:$4 sm:$0xff]   ;;  %v3045_v30 = vld [vmem:[%s4161_s1 + $0x2f4] ss:$8 sps:$4 sm:$0xff]  }
  0x86   :  { %2016 = vmatprep.mubr.bf16.mxu0 %v2416_v31  ;;  %v3048_v31 = vld [vmem:[%s4161_s1 + $0x6f4] ss:$8 sps:$4 sm:$0xff]  }
  0x87   :  { %1824 = vmatpush1.bf16.msra.mxu1 %v2955_v32  ;;  %v3043_v32 = vld [vmem:[%s4161_s1 + $0x2f0] ss:$8 sps:$4 sm:$0xff]  }
  0x88   :  { %2028 = vmatpush1.bf16.msra.mxu0 %v2958_v33  ;;  %1825 = vmatprep.subr.bf16.mxu1 %v2963_v34  ;;  %v3046_v33 = vld [vmem:[%s4161_s1 + $0x6f0] ss:$8 sps:$4 sm:$0xff]   ;;  %v3051_v34 = vld [vmem:[%s4161_s1 + $0x304] ss:$8 sps:$4 sm:$0xff]  }
  0x89   :  { %2029 = vmatprep.subr.bf16.mxu0 %v2966_v35  ;;  %v3054_v35 = vld [vmem:[%s4161_s1 + $0x704] ss:$8 sps:$4 sm:$0xff]  }
  0x8a   :  { %1813 = vmatmul.mubr.bf16.gmra.mrb[4].mxu1 %v2407_v40  ;;  %v41_v40 = vld [vmem:[%s4162_s0 + $0x90] sm:$0x11] }
  0x8b   :  { %2017 = vmatmul.mubr.bf16.gmra.mrb[4].mxu0 %v2415_v41  ;;  %1826 = vmatpush1.bf16.msra.mxu1 %v2961_v36  ;;  %v2393_v36 = vcombine.low %v3675_v38, %v3680_v39  ;;  %v45_v41 = vld [vmem:[%s4162_s0 + $0xb0] sm:$0x11]  ;;  %v3052_v38 = vld [vmem:[%s4161_s1 + $0x700] ss:$8 sps:$4 sm:$0xff]  }
  0x8c   :  { %2030 = vmatpush1.bf16.msra.mxu0 %v2964_v37  ;;  %1827 = vmatprep.subr.bf16.mxu1 %v2969_v44  ;;  %v2401_v37 = vcombine.low %v3685_v42, %v3690_v43  ;;  %v3049_v44 = vld [vmem:[%s4161_s1 + $0x300] ss:$8 sps:$4 sm:$0xff]   ;;  %v3057_v39 = vld [vmem:[%s4161_s1 + $0x314] ss:$8 sps:$4 sm:$0xff]   ;;  %v2410_v43 = vcombine.high %v41_v40, %v41_v40 }
  0x8d   :  { %2031 = vmatprep.subr.bf16.mxu0 %v2972_v45  ;;  %1853 = vmatprep.mubr.bf16.mxu1 %v2394_v46  ;;  %v3060_v42 = vld [vmem:[%s4161_s1 + $0x714] ss:$8 sps:$4 sm:$0xff]   ;;  %v2418_v45 = vcombine.high %v45_v41, %v45_v41  ;;  %v3055_v46 = vld [vmem:[%s4161_s1 + $0x310] ss:$8 sps:$4 sm:$0xff]  }
  0x8e   :  { %2057 = vmatprep.mubr.bf16.mxu0 %v2402_v47  ;;  %v3058_v47 = vld [vmem:[%s4161_s1 + $0x710] ss:$8 sps:$4 sm:$0xff]  }
  0x8f   :  { %1828 = vmatpush1.bf16.msra.mxu1 %v2967_v48  ;;  %v3063_v48 = vld [vmem:[%s4161_s1 + $0x324] ss:$8 sps:$4 sm:$0xff]  }
  0x90   :  { %2032 = vmatpush1.bf16.msra.mxu0 %v2970_v49  ;;  %1829 = vmatprep.subr.bf16.mxu1 %v2975_v50  ;;  %v3066_v49 = vld [vmem:[%s4161_s1 + $0x724] ss:$8 sps:$4 sm:$0xff]   ;;  %v3895_v50 = vld [vmem:[%s4162_s0 + $0x18] sm:$0xff] }
  0x91   :  { %2033 = vmatprep.subr.bf16.mxu0 %v2978_v51  ;;  %v2409_v51 = vcombine.low %v41_v40, %v41_v40  ;;  %v3127_v40 = vld [vmem:[%s4161_s1 + $0x3d0] ss:$8 sps:$4 sm:$0xff]  }
  0x93   :  { %1830 = vmatpush1.bf16.msra.mxu1 %v2973_v52  ;;  %v2417_v52 = vcombine.low %v45_v41, %v45_v41  ;;  %v3130_v41 = vld [vmem:[%s4161_s1 + $0x7d0] ss:$8 sps:$4 sm:$0xff]  }
  0x94   :  { %2034 = vmatpush1.bf16.msra.mxu0 %v2976_v53  ;;  %1831 = vmatprep.subr.bf16.mxu1 %v2981_v54  ;;  %v3900_v53 = vld [vmem:[%s4162_s0 + $0x58] sm:$0xff] }
  0x95   :  { %2035 = vmatprep.subr.bf16.mxu0 %v2984_v55  ;;  %v3905_v54 = vld [vmem:[%s4162_s0 + $0x38] sm:$0xff] }
  0x96   :  { %v3910_v55 = vld [vmem:[%s4162_s0 + $0x78] sm:$0xff] }
  0x97   :  { %1832 = vmatpush1.bf16.msra.mxu1 %v2979_v56  ;;  %v3061_v56 = vld [vmem:[%s4161_s1 + $0x320] ss:$8 sps:$4 sm:$0xff]  }
  0x98   :  { %2036 = vmatpush1.bf16.msra.mxu0 %v2982_v57  ;;  %1833 = vmatprep.subr.bf16.mxu1 %v2987_v58  ;;  %v3064_v57 = vld [vmem:[%s4161_s1 + $0x720] ss:$8 sps:$4 sm:$0xff]   ;;  %v3069_v58 = vld [vmem:[%s4161_s1 + $0x334] ss:$8 sps:$4 sm:$0xff]  }
  0x99   :  { %2037 = vmatprep.subr.bf16.mxu0 %v2990_v59  ;;  %v3072_v59 = vld [vmem:[%s4161_s1 + $0x734] ss:$8 sps:$4 sm:$0xff]  }
  0x9b   :  { %1834 = vmatpush1.bf16.msra.mxu1 %v2985_v60  ;;  %v2396_v60 = vcombine.high %v3895_v50, %v3900_v53 }
  0x9c   :  { %2038 = vmatpush1.bf16.msra.mxu0 %v2988_v61  ;;  %1835 = vmatprep.subr.bf16.mxu1 %v2993_v62  ;;  %v2404_v61 = vcombine.high %v3905_v54, %v3910_v55  ;;  %v3067_v62 = vld [vmem:[%s4161_s1 + $0x330] ss:$8 sps:$4 sm:$0xff]  }
  0x9d   :  { %2039 = vmatprep.subr.bf16.mxu0 %v2996_v63  ;;  %v3070_v63 = vld [vmem:[%s4161_s1 + $0x730] ss:$8 sps:$4 sm:$0xff]  }
  0x9f   :  { %1836 = vmatpush1.bf16.msra.mxu1 %v2991_v0  ;;  %v3075_v0 = vld [vmem:[%s4161_s1 + $0x344] ss:$8 sps:$4 sm:$0xff]  }
  0xa0   :  { %2040 = vmatpush1.bf16.msra.mxu0 %v2994_v1  ;;  %1837 = vmatprep.subr.bf16.mxu1 %v2999_v2  ;;  %v3078_v1 = vld [vmem:[%s4161_s1 + $0x744] ss:$8 sps:$4 sm:$0xff]   ;;  %v3073_v2 = vld [vmem:[%s4161_s1 + $0x340] ss:$8 sps:$4 sm:$0xff]  }
  0xa1   :  { %2041 = vmatprep.subr.bf16.mxu0 %v3002_v3  ;;  %v3076_v3 = vld [vmem:[%s4161_s1 + $0x740] ss:$8 sps:$4 sm:$0xff]  }
  0xa3   :  { %1838 = vmatpush1.bf16.msra.mxu1 %v2997_v4  ;;  %v3081_v4 = vld [vmem:[%s4161_s1 + $0x354] ss:$8 sps:$4 sm:$0xff]  }
  0xa4   :  { %2042 = vmatpush1.bf16.msra.mxu0 %v3000_v5  ;;  %1839 = vmatprep.subr.bf16.mxu1 %v3005_v6  ;;  %v3084_v5 = vld [vmem:[%s4161_s1 + $0x754] ss:$8 sps:$4 sm:$0xff]   ;;  %v3079_v6 = vld [vmem:[%s4161_s1 + $0x350] ss:$8 sps:$4 sm:$0xff]  }
  0xa5   :  { %2043 = vmatprep.subr.bf16.mxu0 %v3008_v7  ;;  %v3082_v7 = vld [vmem:[%s4161_s1 + $0x750] ss:$8 sps:$4 sm:$0xff]  }
  0xa7   :  { %1840 = vmatpush1.bf16.msra.mxu1 %v3003_v8  ;;  %v3087_v8 = vld [vmem:[%s4161_s1 + $0x364] ss:$8 sps:$4 sm:$0xff]  }
  0xa8   :  { %2044 = vmatpush1.bf16.msra.mxu0 %v3006_v9  ;;  %1841 = vmatprep.subr.bf16.mxu1 %v3011_v10  ;;  %v3090_v9 = vld [vmem:[%s4161_s1 + $0x764] ss:$8 sps:$4 sm:$0xff]   ;;  %v3085_v10 = vld [vmem:[%s4161_s1 + $0x360] ss:$8 sps:$4 sm:$0xff]  }
  0xa9   :  { %2045 = vmatprep.subr.bf16.mxu0 %v3014_v11  ;;  %v3088_v11 = vld [vmem:[%s4161_s1 + $0x760] ss:$8 sps:$4 sm:$0xff]  }
  0xab   :  { %1842 = vmatpush1.bf16.msra.mxu1 %v3009_v12  ;;  %v3093_v12 = vld [vmem:[%s4161_s1 + $0x374] ss:$8 sps:$4 sm:$0xff]  }
  0xac   :  { %2046 = vmatpush1.bf16.msra.mxu0 %v3012_v13  ;;  %1843 = vmatprep.subr.bf16.mxu1 %v3017_v14  ;;  %v3096_v13 = vld [vmem:[%s4161_s1 + $0x774] ss:$8 sps:$4 sm:$0xff]   ;;  %v3091_v14 = vld [vmem:[%s4161_s1 + $0x370] ss:$8 sps:$4 sm:$0xff]  }
  0xad   :  { %2047 = vmatprep.subr.bf16.mxu0 %v3020_v15  ;;  %v3094_v15 = vld [vmem:[%s4161_s1 + $0x770] ss:$8 sps:$4 sm:$0xff]  }
  0xaf   :  { %1844 = vmatpush1.bf16.msra.mxu1 %v3015_v16  ;;  %v3099_v16 = vld [vmem:[%s4161_s1 + $0x384] ss:$8 sps:$4 sm:$0xff]  }
  0xb0   :  { %2048 = vmatpush1.bf16.msra.mxu0 %v3018_v17  ;;  %1845 = vmatprep.subr.bf16.mxu1 %v3023_v18  ;;  %v3102_v17 = vld [vmem:[%s4161_s1 + $0x784] ss:$8 sps:$4 sm:$0xff]   ;;  %v3097_v18 = vld [vmem:[%s4161_s1 + $0x380] ss:$8 sps:$4 sm:$0xff]  }
  0xb1   :  { %2049 = vmatprep.subr.bf16.mxu0 %v3026_v19  ;;  %v3100_v19 = vld [vmem:[%s4161_s1 + $0x780] ss:$8 sps:$4 sm:$0xff]  }
  0xb3   :  { %1846 = vmatpush1.bf16.msra.mxu1 %v3021_v20  ;;  %v3105_v20 = vld [vmem:[%s4161_s1 + $0x394] ss:$8 sps:$4 sm:$0xff]  }
  0xb4   :  { %2050 = vmatpush1.bf16.msra.mxu0 %v3024_v21  ;;  %1847 = vmatprep.subr.bf16.mxu1 %v3029_v22  ;;  %v3108_v21 = vld [vmem:[%s4161_s1 + $0x794] ss:$8 sps:$4 sm:$0xff]   ;;  %v3103_v22 = vld [vmem:[%s4161_s1 + $0x390] ss:$8 sps:$4 sm:$0xff]  }
  0xb5   :  { %2051 = vmatprep.subr.bf16.mxu0 %v3032_v23  ;;  %v3106_v23 = vld [vmem:[%s4161_s1 + $0x790] ss:$8 sps:$4 sm:$0xff]  }
  0xb7   :  { %1848 = vmatpush1.bf16.msra.mxu1 %v3027_v24  ;;  %v3111_v24 = vld [vmem:[%s4161_s1 + $0x3a4] ss:$8 sps:$4 sm:$0xff]  }
  0xb8   :  { %2052 = vmatpush1.bf16.msra.mxu0 %v3030_v25  ;;  %1849 = vmatprep.subr.bf16.mxu1 %v3036_v26  ;;  %v3114_v25 = vld [vmem:[%s4161_s1 + $0x7a4] ss:$8 sps:$4 sm:$0xff]   ;;  %v3109_v26 = vld [vmem:[%s4161_s1 + $0x3a0] ss:$8 sps:$4 sm:$0xff]  }
  0xb9   :  { %2053 = vmatprep.subr.bf16.mxu0 %v3040_v27  ;;  %v3112_v27 = vld [vmem:[%s4161_s1 + $0x7a0] ss:$8 sps:$4 sm:$0xff]  }
  0xbb   :  { %1850 = vmatpush1.bf16.msra.mxu1 %v3034_v28  ;;  %v3117_v28 = vld [vmem:[%s4161_s1 + $0x3b4] ss:$8 sps:$4 sm:$0xff]  }
  0xbc   :  { %2054 = vmatpush1.bf16.msra.mxu0 %v3038_v29  ;;  %1851 = vmatprep.subr.bf16.mxu1 %v3045_v30  ;;  %v3120_v29 = vld [vmem:[%s4161_s1 + $0x7b4] ss:$8 sps:$4 sm:$0xff]   ;;  %v3115_v30 = vld [vmem:[%s4161_s1 + $0x3b0] ss:$8 sps:$4 sm:$0xff]  }
  0xbd   :  { %2055 = vmatprep.subr.bf16.mxu0 %v3048_v31  ;;  %v3118_v31 = vld [vmem:[%s4161_s1 + $0x7b0] ss:$8 sps:$4 sm:$0xff]  }
  0xbf   :  { %1852 = vmatpush1.bf16.msra.mxu1 %v3043_v32  ;;  %v3123_v32 = vld [vmem:[%s4161_s1 + $0x3c4] ss:$8 sps:$4 sm:$0xff]  }
  0xc0   :  { %2056 = vmatpush1.bf16.msra.mxu0 %v3046_v33  ;;  %1872 = vmatprep.subr.bf16.mxu1 %v3051_v34  ;;  %v3126_v33 = vld [vmem:[%s4161_s1 + $0x7c4] ss:$8 sps:$4 sm:$0xff]   ;;  %v3121_v34 = vld [vmem:[%s4161_s1 + $0x3c0] ss:$8 sps:$4 sm:$0xff]  }
  0xc1   :  { %2076 = vmatprep.subr.bf16.mxu0 %v3054_v35  ;;  %v3124_v35 = vld [vmem:[%s4161_s1 + $0x7c0] ss:$8 sps:$4 sm:$0xff]  }
  0xc2   :  { %1854 = vmatmul.mubr.bf16.vlgmr.msra.gmra.mrb[0].mxu1 %v2393_v36  ;;  %v3129_v36 = vld [vmem:[%s4161_s1 + $0x3d4] ss:$8 sps:$4 sm:$0xff]  }
  0xc3   :  { %2058 = vmatmul.mubr.bf16.vlgmr.msra.gmra.mrb[0].mxu0 %v2401_v37  ;;  %1873 = vmatpush1.bf16.msra.mxu1 %v3049_v44  ;;  %v3132_v37 = vld [vmem:[%s4161_s1 + $0x7d4] ss:$8 sps:$4 sm:$0xff]   ;;  %v3138_v44 = vld [vmem:[%s4161_s1 + $0x3e4] ss:$8 sps:$4 sm:$0xff]  }
  0xc4   :  { %2077 = vmatpush1.bf16.msra.mxu0 %v3052_v38  ;;  %1874 = vmatprep.subr.bf16.mxu1 %v3057_v39  ;;  %v3142_v38 = vld [vmem:[%s4161_s1 + $0x7e4] ss:$8 sps:$4 sm:$0xff]   ;;  %v3136_v39 = vld [vmem:[%s4161_s1 + $0x3e0] ss:$8 sps:$4 sm:$0xff]  }
  0xc5   :  { %2078 = vmatprep.subr.bf16.mxu0 %v3060_v42  ;;  %1863 = vmatprep.mubr.bf16.mxu1 %v2410_v43  ;;  %v3140_v42 = vld [vmem:[%s4161_s1 + $0x7e0] ss:$8 sps:$4 sm:$0xff]   ;;  %v3145_v43 = vld [vmem:[%s4161_s1 + $0x3f4] ss:$8 sps:$4 sm:$0xff]  }
  0xc6   :  { %2067 = vmatprep.mubr.bf16.mxu0 %v2418_v45  ;;  %v3148_v45 = vld [vmem:[%s4161_s1 + $0x7f4] ss:$8 sps:$4 sm:$0xff]  }
  0xc7   :  { %1875 = vmatpush1.bf16.msra.mxu1 %v3055_v46  ;;  %v3143_v46 = vld [vmem:[%s4161_s1 + $0x3f0] ss:$8 sps:$4 sm:$0xff]  }
  0xc8   :  { %2079 = vmatpush1.bf16.msra.mxu0 %v3058_v47  ;;  %1876 = vmatprep.subr.bf16.mxu1 %v3063_v48  ;;  %v3146_v47 = vld [vmem:[%s4161_s1 + $0x7f0] ss:$8 sps:$4 sm:$0xff]  }
  0xc9   :  { %2080 = vmatprep.subr.bf16.mxu0 %v3066_v49  ;;  %v42_v48 = vld [vmem:[%s4162_s0 + $0x98] sm:$0x11] }
  0xca   :  { %1864 = vmatmul.mubr.bf16.gmra.mrb[4].mxu1 %v2409_v51  ;;  %v46_v49 = vld [vmem:[%s4162_s0 + $0xb8] sm:$0x11]  ;;  %v2395_v51 = vcombine.low %v3895_v50, %v3900_v53 }
  0xcb   :  { %2068 = vmatmul.mubr.bf16.gmra.mrb[4].mxu0 %v2417_v52  ;;  %1877 = vmatpush1.bf16.msra.mxu1 %v3061_v56  ;;  %v2403_v52 = vcombine.low %v3905_v54, %v3910_v55  ;;  %v2412_v56 = vcombine.high %v42_v48, %v42_v48 }
  0xcc   :  { %2081 = vmatpush1.bf16.msra.mxu0 %v3064_v57  ;;  %1878 = vmatprep.subr.bf16.mxu1 %v3069_v58  ;;  %v2420_v57 = vcombine.high %v46_v49, %v46_v49  ;;  %v2411_v58 = vcombine.low %v42_v48, %v42_v48 }
  0xcd   :  { %2082 = vmatprep.subr.bf16.mxu0 %v3072_v59  ;;  %1904 = vmatprep.mubr.bf16.mxu1 %v2396_v60  ;;  %v2419_v59 = vcombine.low %v46_v49, %v46_v49 }
  0xce   :  { %2108 = vmatprep.mubr.bf16.mxu0 %v2404_v61 }
  0xcf   :  { %1879 = vmatpush1.bf16.msra.mxu1 %v3067_v62 }
  0xd0   :  { %2083 = vmatpush1.bf16.msra.mxu0 %v3070_v63  ;;  %1880 = vmatprep.subr.bf16.mxu1 %v3075_v0 }
  0xd1   :  { %2084 = vmatprep.subr.bf16.mxu0 %v3078_v1 }
  0xd3   :  { %1881 = vmatpush1.bf16.msra.mxu1 %v3073_v2 }
  0xd4   :  { %2085 = vmatpush1.bf16.msra.mxu0 %v3076_v3  ;;  %1882 = vmatprep.subr.bf16.mxu1 %v3081_v4 }
  0xd5   :  { %2086 = vmatprep.subr.bf16.mxu0 %v3084_v5 }
  0xd7   :  { %1883 = vmatpush1.bf16.msra.mxu1 %v3079_v6 }
  0xd8   :  { %2087 = vmatpush1.bf16.msra.mxu0 %v3082_v7  ;;  %1884 = vmatprep.subr.bf16.mxu1 %v3087_v8 }
  0xd9   :  { %2088 = vmatprep.subr.bf16.mxu0 %v3090_v9 }
  0xdb   :  { %1885 = vmatpush1.bf16.msra.mxu1 %v3085_v10 }
  0xdc   :  { %2089 = vmatpush1.bf16.msra.mxu0 %v3088_v11  ;;  %1886 = vmatprep.subr.bf16.mxu1 %v3093_v12 }
  0xdd   :  { %2090 = vmatprep.subr.bf16.mxu0 %v3096_v13 }
  0xdf   :  { %1887 = vmatpush1.bf16.msra.mxu1 %v3091_v14 }
  0xe0   :  { %2091 = vmatpush1.bf16.msra.mxu0 %v3094_v15  ;;  %1888 = vmatprep.subr.bf16.mxu1 %v3099_v16 }
  0xe1   :  { %2092 = vmatprep.subr.bf16.mxu0 %v3102_v17 }
  0xe3   :  { %1889 = vmatpush1.bf16.msra.mxu1 %v3097_v18 }
  0xe4   :  { %2093 = vmatpush1.bf16.msra.mxu0 %v3100_v19  ;;  %1890 = vmatprep.subr.bf16.mxu1 %v3105_v20 }
  0xe5   :  { %2094 = vmatprep.subr.bf16.mxu0 %v3108_v21 }
  0xe7   :  { %1891 = vmatpush1.bf16.msra.mxu1 %v3103_v22 }
  0xe8   :  { %2095 = vmatpush1.bf16.msra.mxu0 %v3106_v23  ;;  %1892 = vmatprep.subr.bf16.mxu1 %v3111_v24 }
  0xe9   :  { %2096 = vmatprep.subr.bf16.mxu0 %v3114_v25 }
  0xeb   :  { %1893 = vmatpush1.bf16.msra.mxu1 %v3109_v26 }
  0xec   :  { %2097 = vmatpush1.bf16.msra.mxu0 %v3112_v27  ;;  %1894 = vmatprep.subr.bf16.mxu1 %v3117_v28 }
  0xed   :  { %2098 = vmatprep.subr.bf16.mxu0 %v3120_v29 }
  0xef   :  { %1895 = vmatpush1.bf16.msra.mxu1 %v3115_v30 }
  0xf0   :  { %2099 = vmatpush1.bf16.msra.mxu0 %v3118_v31  ;;  %1896 = vmatprep.subr.bf16.mxu1 %v3123_v32 }
  0xf1   :  { %2100 = vmatprep.subr.bf16.mxu0 %v3126_v33 }
  0xf3   :  { %1897 = vmatpush1.bf16.msra.mxu1 %v3121_v34 }
  0xf4   :  { %2101 = vmatpush1.bf16.msra.mxu0 %v3124_v35  ;;  %1898 = vmatprep.subr.bf16.mxu1 %v3129_v36 }
  0xf5   :  { %2102 = vmatprep.subr.bf16.mxu0 %v3132_v37 }
  0xf7   :  { %1899 = vmatpush1.bf16.msra.mxu1 %v3127_v40 }
  0xf8   :  { %2103 = vmatpush1.bf16.msra.mxu0 %v3130_v41  ;;  %1900 = vmatprep.subr.bf16.mxu1 %v3138_v44 }
  0xf9   :  { %2104 = vmatprep.subr.bf16.mxu0 %v3142_v38 }
  0xfb   :  { %1901 = vmatpush1.bf16.msra.mxu1 %v3136_v39 }
  0xfc   :  { %2105 = vmatpush1.bf16.msra.mxu0 %v3140_v42  ;;  %1902 = vmatprep.subr.bf16.mxu1 %v3145_v43 }
  0xfd   :  { %2106 = vmatprep.subr.bf16.mxu0 %v3148_v45 }
  0xff   :  { %1903 = vmatpush1.bf16.msra.mxu1 %v3143_v46 }
 0x100   :  { %2107 = vmatpush1.bf16.msra.mxu0 %v3146_v47 }
 0x102   :  { %1905 = vmatmul.mubr.bf16.vlgmr.msra.gmra.mrb[0].mxu1 %v2395_v51 }
 0x103   :  { %2109 = vmatmul.mubr.bf16.vlgmr.msra.gmra.mrb[0].mxu0 %v2403_v52  ;;  %1914 = vmatprep.mubr.bf16.mxu1 %v2412_v56 }
 0x104   :  { %2118 = vmatprep.mubr.bf16.mxu0 %v2420_v57 }
 0x10a   :  { %1915 = vmatmul.mubr.bf16.gmra.mrb[4].mxu1 %v2411_v58 }
 0x10b   :  { %2119 = vmatmul.mubr.bf16.gmra.mrb[4].mxu0 %v2419_v59 }
 0x1d5   :  { %v1906_v60 = vpop.f32.mrb[0].mxu1 }
 0x1d6   :  { %v2110_v61 = vpop.f32.mrb[0].mxu0  ;;  %v1908_v50 = vpop.f32.mrb[1].mxu1 }
 0x1d7   :  { %v4088_v62 = vadd.f32 %v2110_v61, %v1906_v60  ;;  %v2112_v53 = vpop.f32.mrb[1].mxu0  ;;  %v1910_v54 = vpop.f32.mrb[2].mxu1 }
 0x1d8   :  { %v4090_v63 = vadd.f32 %v2112_v53, %v1908_v50  ;;  %v2114_v55 = vpop.f32.mrb[2].mxu0  ;;  %v1912_v1 = vpop.f32.mrb[3].mxu1 }
 0x1d9   :  { %v4092_v0 = vadd.f32 %v2114_v55, %v1910_v54  ;;  %v2116_v2 = vpop.f32.mrb[3].mxu0  ;;  %v2148_v4 = vmul.f32 %v4088_v62, %v4088_v62 }
 0x1da   :  { %v4094_v3 = vadd.f32 %v2116_v2, %v1912_v1  ;;  %v2149_v7 = vmul.f32 %v4090_v63, %v4090_v63 }
 0x1db   :  { %v2127_v5 = vadd.f32 %v4092_v0, %v4088_v62  ;;  %v2150_v6 = vmul.f32 %v4092_v0, %v4092_v0 }
 0x1dc   :  { %v2137_v8 = vadd.f32 %v4094_v3, %v4090_v63  ;;  %v2151_v9 = vmul.f32 %v4094_v3, %v4094_v3 }
 0x1dd   :  { %v2154_v10 = vadd.f32 %v2150_v6, %v2148_v4  ;;  %v1916_v12 = vpop.f32.mrb[4].mxu1 }
 0x1de   :  { %v2163_v11 = vadd.f32 %v2151_v9, %v2149_v7  ;;  %v2120_v13 = vpop.f32.mrb[4].mxu0  ;;  %v1918_v15 = vpop.f32.mrb[5].mxu1 }
 0x1df   :  { %v4108_v14 = vadd.f32 %v2120_v13, %v1916_v12  ;;  %v2122_v16 = vpop.f32.mrb[5].mxu0  ;;  %v1920_v18 = vpop.f32.mrb[6].mxu1 }
 0x1e0   :  { %v4110_v17 = vadd.f32 %v2122_v16, %v1918_v15  ;;  %v2124_v19 = vpop.f32.mrb[6].mxu0  ;;  %v1921_v22 = vpop.f32.mrb[7].mxu1 }
 0x1e1   :  { %v2129_v20 = vsel %vm2128_vm0, %v4108_v14, 0.0  ;;  %v2152_v21 = vmul.f32 %v4108_v14, %v4108_v14  ;;  %v2125_v23 = vpop.f32.mrb[7].mxu0 }
 0x1e2   :  { %v2130_v24 = vadd.f32 %v2129_v20, %v2127_v5  ;;  %v2138_v25 = vsel %vm2128_vm0, %v4110_v17, 0.0  ;;  %v2153_v26 = vmul.f32 %v4110_v17, %v4110_v17  ;;  %v2180_v20 = vld [vmem:[%s4163_s2] sm:$0x3] }
 0x1e3   :  { %v2155_v27 = vsel %vm2128_vm0, %v2152_v21, 0.0  ;;  %v2139_v28 = vadd.f32 %v2138_v25, %v2137_v8  ;;  %v3161_v8 = vmov 1966171168  }
 0x1e4   :  { %v2131_v29 = vrot.slane %v2130_v24, 4  ;;  %v2156_v30 = vadd.f32 %v2155_v27, %v2154_v10  ;;  %v2164_v31 = vsel %vm2128_vm0, %v2153_v26, 0.0  ;;  %v2189_v9 = vunpack.c.l.s4 %v3161_v8 }
 0x1e5   :  { %v2140_v32 = vrot.slane %v2139_v28, 4  ;;  %v2165_v33 = vadd.f32 %v2164_v31, %v2163_v11  ;;  %v2191_v10 = vlaneseq }
 0x1e6   :  { %v2132_v34 = vadd.f32 %v2131_v29, %v2130_v24  ;;  %v2157_v35 = vrot.slane %v2156_v30, 4  ;;  %v2190_v11 = vunpack.c.0.s8 %v2189_v9 }
 0x1e7   :  { %v2141_v36 = vadd.f32 %v2140_v32, %v2139_v28  ;;  %v2166_v37 = vrot.slane %v2165_v33, 4  ;;  %v2192_v12 = vshrl.u32 %v2191_v10, 7 }
 0x1e8   :  { %v2133_v40 = vrot.slane %v2132_v34, 2  ;;  %v2158_v41 = vadd.f32 %v2157_v35, %v2156_v30 }
 0x1e9   :  { %v2142_v44 = vrot.slane %v2141_v36, 2  ;;  %v2167_v38 = vadd.f32 %v2166_v37, %v2165_v33  ;;  %v2193_v15 = vsub.s32 %v2190_v11, %v2192_v12  ;;  %v2211_v22 = vsub.s32 1, %v2192_v12  ;;  %v2221_v37 = vld [vmem:[%s4164_s3] sm:$0x3] }
 0x1ea   :  { %v2134_v39 = vadd.f32 %v2133_v40, %v2132_v34  ;;  %v2159_v42 = vrot.slane %v2158_v41, 2  ;;  %v2207_v23 = vsub.s32 0, %v2192_v12  ;;  %v3162_v11 = vmov 0.0|0.0  }
 0x1eb   :  { %v2143_v43 = vadd.f32 %v2142_v44, %v2141_v36  ;;  %v2168_v45 = vrot.slane %v2167_v38, 2  ;;  %2692 = vmatprep.subr.bf16.mxu1 %v3162_v11  ;;  %v3164_v12 = vmov 0.0  }
 0x1ec   :  { %v2135_v46 = vrot.slane %v2134_v39, 1  ;;  %v2160_v47 = vadd.f32 %v2159_v42, %v2158_v41  ;;  %2689 = vmatprep.mubr.msk.f32.mxu1 %vm3163_vm1, %v3164_v12 }
 0x1ed   :  { %v2144_v48 = vrot.slane %v2143_v43, 1  ;;  %v2169_v49 = vadd.f32 %v2168_v45, %v2167_v38 }
 0x1ee   :  { %v2136_v51 = vadd.f32 %v2135_v46, %v2134_v39  ;;  %v2161_v52 = vrot.slane %v2160_v47, 1 }
 0x1ef   :  { %v2145_v56 = vadd.f32 %v2144_v48, %v2143_v43  ;;  %v2170_v57 = vrot.slane %v2169_v49, 1 }
 0x1f0   :  { %v2146_v58 = vmul.f32 0.055555556, %v2136_v51  ;;  %v2162_v59 = vadd.f32 %v2161_v52, %v2160_v47 }
 0x1f1   :  { %v2147_v60 = vmul.f32 0.055555556, %v2145_v56  ;;  %v2171_v61 = vadd.f32 %v2170_v57, %v2169_v49 }
 0x1f2   :  { %v2172_v50 = vmul.f32 0.055555556, %v2162_v59  ;;  %v2174_v53 = vmul.f32 %v2146_v58, %v2146_v58  ;;  %v2274_v59 = vld [vmem:[%s4165_s4 + $0x10] sm:$0xff] }
 0x1f3   :  { %v2173_v54 = vmul.f32 0.055555556, %v2171_v61  ;;  %v2175_v55 = vmul.f32 %v2147_v60, %v2147_v60 }
 0x1f4   :  { %v2176_v1 = vsub.f32 %v2172_v50, %v2174_v53 }
 0x1f5   :  { %v2177_v2 = vsub.f32 %v2173_v54, %v2175_v55 }
 0x1f6   :  { %v2178_v4 = vmax.f32 %v2176_v1, 0.0 }
 0x1f7   :  { %v2179_v5 = vmax.f32 %v2177_v2, 0.0 }
 0x1f8   :  { %v2181_v6 = vadd.f32 1e-05, %v2178_v4 }
 0x1f9   :  { %v2182_v7 = vadd.f32 1e-05, %v2179_v5 }
 0x1fa   :  { %3153 = vrsqrt.f32 %v2181_v6 }
 0x1fb   :  { %3155 = vrsqrt.f32 %v2182_v7 }
 0x204   :  { %v3154_v13 = vpop.eup %3153 }
 0x205   :  { %v3156_v16 = vpop.eup %3155 }
 0x206   :  { %v2187_v18 = vcombine.low %v3154_v13, %v3156_v16 }
 0x208   :  { %v2194_v19 = vrot.slane %v2187_v18, %v2193_v15  ;;  %v2295_v18 = vld [vmem:[%s4166_s5] sm:$0x3] }
 0x20a   :  { %v2201_v21 = vrot.slane %v2194_v19, %v2193_v15 }
 0x20c   :  { %v2203_v24 = vmul.f32 %v2201_v21, %v2180_v20 }
 0x20e   :  { %v2212_v25 = vrot.slane %v2203_v24, %v2211_v22  ;;  %v2208_v26 = vrot.slane %v2203_v24, %v2207_v23 }
 0x210   :  { %v2220_v27 = vmul.f32 %v4110_v17, %v2212_v25  ;;  %v2223_v28 = vmul.f32 %v2212_v25, %v2147_v60  ;;  %v2215_v29 = vmul.f32 %v4088_v62, %v2208_v26  ;;  %v2216_v30 = vmul.f32 %v4090_v63, %v2212_v25  ;;  %v2275_v60 = vld [vmem:[%s4165_s4 + $0x18] sm:$0xff] }
 0x211   :  { %v2222_v31 = vmul.f32 %v2208_v26, %v2146_v58  ;;  %v2219_v32 = vmul.f32 %v4108_v14, %v2208_v26  ;;  %v2217_v33 = vmul.f32 %v4092_v0, %v2208_v26  ;;  %v2218_v34 = vmul.f32 %v4094_v3, %v2212_v25  ;;  %v2272_v0 = vld [vmem:[%s4165_s4] sm:$0xff]  ;;  %v2273_v3 = vld [vmem:[%s4165_s4 + $0x8] sm:$0xff] }
 0x212   :  { %v2276_v14 = vld [vmem:[%s4165_s4 + $0x20] sm:$0x3]  ;;  %v2277_v58 = vld [vmem:[%s4165_s4 + $0x28] sm:$0x3] }
 0x213   :  { %v2226_v35 = vcombine.low %v2222_v31, %v2223_v28 }
 0x215   :  { %v2233_v36 = vrot.slane %v2226_v35, %v2193_v15 }
 0x217   :  { %v2240_v40 = vrot.slane %v2233_v36, %v2193_v15 }
 0x219   :  { %v2242_v17 = vsub.f32 %v2221_v37, %v2240_v40 }
 0x21b   :  { %v2247_v41 = vrot.slane %v2242_v17, %v2207_v23  ;;  %v2251_v44 = vrot.slane %v2242_v17, %v2211_v22 }
 0x21d   :  { %v2254_v62 = vadd.f32 %v2247_v41, %v2215_v29  ;;  %v2255_v38 = vadd.f32 %v2251_v44, %v2216_v30  ;;  %v2258_v63 = vadd.f32 %v2247_v41, %v2219_v32  ;;  %v2259_v39 = vadd.f32 %v2251_v44, %v2220_v27 }
 0x21e   :  { %v2256_v42 = vadd.f32 %v2247_v41, %v2217_v33  ;;  %v2257_v43 = vadd.f32 %v2251_v44, %v2218_v34 }
 0x21f   :  { %v2260_v45 = vmul.f32 0.2, %v2254_v62  ;;  %v2261_v46 = vmul.f32 0.2, %v2255_v38  ;;  %v2264_v47 = vmul.f32 0.2, %v2258_v63 }
 0x220   :  { %v2265_v48 = vmul.f32 0.2, %v2259_v39  ;;  %v2262_v49 = vmul.f32 0.2, %v2256_v42  ;;  %v2263_v51 = vmul.f32 0.2, %v2257_v43 }
 0x221   :  { %v2266_v52 = vmax.f32 %v2254_v62, %v2260_v45  ;;  %v2267_v56 = vmax.f32 %v2255_v38, %v2261_v46  ;;  %v2270_v57 = vmax.f32 %v2258_v63, %v2264_v47 }
 0x222   :  { %v2271_v61 = vmax.f32 %v2259_v39, %v2265_v48  ;;  %v2268_v50 = vmax.f32 %v2256_v42, %v2262_v49  ;;  %v2269_v53 = vmax.f32 %v2257_v43, %v2263_v51 }
 0x223   :  { %v2278_v54 = vmul.f32 %v2272_v0, %v2266_v52  ;;  %v2279_v55 = vmul.f32 %v2273_v3, %v2267_v56  ;;  %v2282_v1 = vmul.f32 %v2276_v14, %v2270_v57 }
 0x224   :  { %v2283_v2 = vmul.f32 %v2277_v58, %v2271_v61  ;;  %v2280_v4 = vmul.f32 %v2274_v59, %v2268_v50  ;;  %v2281_v5 = vmul.f32 %v2275_v60, %v2269_v53 }
 0x225   :  { %v2284_v6 = vadd.f32 %v2279_v55, %v2278_v54  ;;  %v2290_v7 = vsel %vm2128_vm0, %v2282_v1, 0.0 }
 0x226   :  { %v2291_v8 = vsel %vm2128_vm0, %v2283_v2, 0.0  ;;  %v2287_v9 = vadd.f32 %v2281_v5, %v2280_v4 }
 0x227   :  { %2285 = vadd.xlane.f32.xlu0 %v2284_v6  ;;  %v2292_v10 = vadd.f32 %v2291_v8, %v2290_v7 }
 0x229   :  { %2293 = vadd.xlane.f32.xlu1 %v2292_v10 }
 0x22b   :  { %2288 = vadd.xlane.f32.xlu0 %v2287_v9 }
 0x2b4   :  { %v2286_v13 = vpop.xlane.xlu0 %2285 }
 0x2b6   :  { %v2294_v19 = vpop.xlane.xlu1 %2293 }
 0x2b8   :  { %v2289_v15 = vpop.xlane.xlu0 %2288 }
 0x2b9   :  { %v2693_v16 = vpack.c.bf16 %v2289_v15, %v2286_v13 }
 0x2bb   :  { %2694 = vmatpush3.bf16.msra.mxu1 %v2693_v16 }
 0x2bc   :  { %2687 = vmatprep.subr.mxu1 %v3164_v12 }
 0x2bf   :  { %2688 = vmatpush3.msk.msra.mxu1 %vm2128_vm0, %v2294_v19 }
 0x2c0   :  { %2690 = vmatmul.mubr.msk.f32.vlgmr.msra.gmra.mrb[8].mxu1 %vm2296_vm2, %v2295_v18 }
 0x393   :  { %v2369_v20 = vpop.f32.mrb[8].mxu1 }
 0x394   :  { %v2373_v21 = vand.u32 2147483647, %v2369_v20  ;;  %v2691_v22 = vpop.f32.mrb[9].mxu1  ;;  %vm2377_vm4 = vcmp.ge.f32.partialorder %v2369_v20, 0.0 }
 0x396   :  { %v2374_v23 = vsub.f32 0.0, %v2373_v21 }
 0x398   :  { %v2375_v24 = vmul.f32 1.442695, %v2374_v23 }
 0x39a   :  { %3157 = vpow2.f32 %v2375_v24 }
 0x3a4   :  { %v3158_v25 = vpop.eup %3157 }
 0x3a5   :  { %v2378_v26 = vadd.f32 1.0, %v3158_v25 }
 0x3a7   :  { %3159 = vrcp.f32 %v2378_v26 }
 0x3b1   :  { %v3160_v27 = vpop.eup %3159 }
 0x3b2   :  { %v2381_v28 = vmul.f32 %v3160_v27, %v3158_v25 }
 0x3b4   :  { %v2382_v29 = vsel %vm2377_vm4, %v3160_v27, %v2381_v28 }
 0x3b5   :  { %2384 = vst.msk [vmem:[%s4167_s6] sm:$0x3] %vm2383_vm3, %v2382_v29 }

</bundles_post_ra>
